<compile_context>
chip_gen: v6e
topology: v6e:2x2x1
jax: 0.10.0
libtpu: 0.0.40
codegen_flags: <defaults>
</compile_context>

<pallas_src>
import functools

import jax
import jax.numpy as jnp
import numpy as np
from jax import lax
from jax.experimental import pallas as pl
from jax.experimental.pallas import tpu as pltpu


def _mha_kernel(x_ref, wq_ref, wk_ref, wv_ref, wp_ref, bp_ref, o_ref,
                k_cache, v_cache, *, T, TQ, n_head, head_size):
    """Causal multi-head attention for one (batch, query-tile) grid cell.

    x_ref   : (T, C)     bf16/f32  full sequence for this batch element
    wq_ref  : (C, H*D)   bf16      query weight with 1/sqrt(D) pre-folded
    wk/wv   : (C, H*D)   bf16
    wp_ref  : (H*D, C)   bf16      output projection weight
    bp_ref  : (1, C)     f32       output projection bias
    o_ref   : (TQ, C)    f32       output rows for this query tile
    k_cache : (H, T, D)  bf16      VMEM scratch: filled at qi == 0, reused later
    v_cache : (H, T, D)  bf16
    """
    H, D = n_head, head_size
    qi = pl.program_id(1)
    q_start = pl.multiple_of(qi * TQ, TQ)

    # ---- K/V projection: once per batch element (qi == 0), cached in VMEM ----
    @pl.when(qi == 0)
    def _fill_kv_cache():
        xf = x_ref[...].astype(jnp.bfloat16)                      # (T, C)
        k = jnp.dot(xf, wk_ref[...], preferred_element_type=jnp.float32)
        v = jnp.dot(xf, wv_ref[...], preferred_element_type=jnp.float32)
        k_cache[...] = jnp.swapaxes(k.astype(jnp.bfloat16).reshape(T, H, D), 0, 1)
        v_cache[...] = jnp.swapaxes(v.astype(jnp.bfloat16).reshape(T, H, D), 0, 1)
        # TODO(synk): chunk this fill over T for very long sequences so the f32
        # projection temporaries never exceed VMEM (not needed at GPT-small T).

    # ---- Q projection for this query tile (scale already folded into wq) ----
    xq = x_ref[pl.ds(q_start, TQ), :].astype(jnp.bfloat16)        # (TQ, C)
    q = jnp.dot(xq, wq_ref[...], preferred_element_type=jnp.float32)
    qh = jnp.swapaxes(q.astype(jnp.bfloat16).reshape(TQ, H, D), 0, 1)  # (H,TQ,D)

    # ---- Flash-style online softmax over causal KV tiles (TK == TQ) ----
    TK = TQ

    def attend(kv_start, m, l, acc, masked):
        kt = k_cache[:, pl.ds(kv_start, TK), :]                   # (H, TK, D)
        vt = v_cache[:, pl.ds(kv_start, TK), :]
        s = jnp.einsum("hqd,hkd->hqk", qh, kt,
                       preferred_element_type=jnp.float32)        # (H, TQ, TK)
        if masked:  # diagonal tile only: local lower-triangular mask
            row = lax.broadcasted_iota(jnp.int32, (TQ, TK), 0)
            col = lax.broadcasted_iota(jnp.int32, (TQ, TK), 1)
            s = jnp.where((row >= col)[None, :, :], s, -jnp.inf)
        m_new = jnp.maximum(m, jnp.max(s, axis=-1, keepdims=True))
        alpha = jnp.exp(m - m_new)
        # TODO(synk): exp could run in bf16 on v6e/v7x (bf16 EUP); kept f32 so
        # the same kernel is dtype-safe on v5e.
        p = jnp.exp(s - m_new)
        l_new = alpha * l + jnp.sum(p, axis=-1, keepdims=True)
        acc_new = alpha * acc + jnp.einsum(
            "hqk,hkd->hqd", p.astype(jnp.bfloat16), vt,
            preferred_element_type=jnp.float32)
        return m_new, l_new, acc_new

    def body(i, carry):
        m, l, acc = carry
        kv_start = pl.multiple_of(i * TK, TK)
        return attend(kv_start, m, l, acc, masked=False)

    init = (jnp.full((H, TQ, 1), -jnp.inf, jnp.float32),
            jnp.zeros((H, TQ, 1), jnp.float32),
            jnp.zeros((H, TQ, D), jnp.float32))
    # Fully visible KV tiles 0 .. qi-1; fully-masked future tiles are skipped.
    m, l, acc = lax.fori_loop(0, qi, body, init)
    # Diagonal tile with the causal mask.
    m, l, acc = attend(q_start, m, l, acc, masked=True)

    # NOTE: attention / projection dropout (p=0.2) are identity in eval mode.
    o = acc * pl.reciprocal(l, approx=True)                        # (H, TQ, D)
    o = jnp.swapaxes(o.astype(jnp.bfloat16), 0, 1).reshape(TQ, H * D)
    out = jnp.dot(o, wp_ref[...], preferred_element_type=jnp.float32) + bp_ref[...]
    o_ref[...] = out.astype(o_ref.dtype)


def _choose_q_tile(T):
    # Cap at 256 so the (H, TQ, TK) softmax state stays small even on v7x VMEM.
    for cand in (256, 128):
        if T % cand == 0:
            return cand
    return T


def _vmem_limit_bytes():
    # Per-generation scoped-VMEM limit: large on v5e/v6e (128 MiB physical),
    # conservative on v7x (64 MiB physical).  Leave ~16 MiB headroom.
    try:
        cap = int(getattr(pltpu.get_tpu_info(), "vmem_capacity_bytes",
                          64 * 1024 * 1024))
    except Exception:  # info unavailable (e.g. interpret mode)
        cap = 64 * 1024 * 1024
    return int(min(max(cap - 16 * 1024 * 1024, 32 * 1024 * 1024),
                   96 * 1024 * 1024))


def multi_head_attention(x, wq, wk, wv, wp, bp, *, num_heads, head_size,
                         q_tile=None):
    """x: (B, T, C) f32/bf16 -> (B, T, n_embd) f32 (eval-mode forward)."""
    B, T, C = x.shape
    n_out = wp.shape[1]
    assert wq.shape == (C, num_heads * head_size)
    TQ = q_tile if q_tile is not None else _choose_q_tile(T)
    assert T % TQ == 0 and TQ % 8 == 0
    grid = (B, T // TQ)

    # Fold 1/sqrt(head_size) into the query weight (removes an in-kernel
    # (TQ, H*D) VPU multiply); store all weights as bf16 (half the weight DMA).
    scale = head_size ** -0.5
    wq = (wq.astype(jnp.float32) * scale).astype(jnp.bfloat16)
    wk = wk.astype(jnp.bfloat16)
    wv = wv.astype(jnp.bfloat16)
    wp = wp.astype(jnp.bfloat16)
    bp = bp.astype(jnp.float32).reshape(1, n_out)

    kernel = functools.partial(_mha_kernel, T=T, TQ=TQ,
                               n_head=num_heads, head_size=head_size)

    def run(single_buffer_weights):
        def rep(shape):
            # Grid-invariant weights/bias: constant block index; single-buffered
            # (double-buffering a never-changing block only wastes VMEM).
            kwargs = {}
            if single_buffer_weights:
                kwargs["pipeline_mode"] = pl.Buffered(1)
            return pl.BlockSpec(shape, lambda b, qi: (0,) * len(shape), **kwargs)

        return pl.pallas_call(
            kernel,
            out_shape=jax.ShapeDtypeStruct((B, T, n_out), jnp.float32),
            grid=grid,
            in_specs=[
                # Full per-batch sequence; constant over qi => DMA'd once per batch.
                pl.BlockSpec((None, T, C), lambda b, qi: (b, 0, 0)),
                rep(wq.shape), rep(wk.shape), rep(wv.shape),
                rep(wp.shape), rep(bp.shape),
            ],
            out_specs=pl.BlockSpec((None, TQ, n_out), lambda b, qi: (b, qi, 0)),
            scratch_shapes=[
                pltpu.VMEM((num_heads, T, head_size), jnp.bfloat16),  # K cache
                pltpu.VMEM((num_heads, T, head_size), jnp.bfloat16),  # V cache
            ],
            compiler_params=pltpu.CompilerParams(
                # batch axis "parallel" (megacore on v7x shards on b); the
                # query-tile axis must be "arbitrary" because the per-batch K/V
                # scratch cache carries across it.
                # TODO(synk): for B == 1 on v7x, move the K/V projection into a
                # separate pallas_call so qi can be "parallel" across both cores.
                dimension_semantics=("parallel", "arbitrary"),
                vmem_limit_bytes=_vmem_limit_bytes(),
            ),
        )(x, wq, wk, wv, wp, bp)

    try:
        return run(True)
    except Exception:
        # pipeline_mode=pl.Buffered(1) unsupported on this jax version; fall back
        # to default double buffering of the grid-invariant weights.
        return run(False)


def mha_reference(x, wq, wk, wv, wp, bp, num_heads, head_size):
    """Pure-JAX f32 reference mirroring the PyTorch module (eval mode)."""
    B, T, _ = x.shape
    f = jnp.float32
    xf = x.astype(f)
    q = xf @ wq.astype(f)
    k = xf @ wk.astype(f)
    v = xf @ wv.astype(f)
    split = lambda a: a.reshape(B, T, num_heads, head_size).transpose(0, 2, 1, 3)
    qh, kh, vh = split(q), split(k), split(v)
    s = jnp.einsum("bhqd,bhkd->bhqk", qh, kh) * head_size ** -0.5
    mask = jnp.tril(jnp.ones((T, T), dtype=bool))
    s = jnp.where(mask, s, -jnp.inf)
    p = jax.nn.softmax(s, axis=-1)
    o = jnp.einsum("bhqk,bhkd->bhqd", p, vh)
    o = o.transpose(0, 2, 1, 3).reshape(B, T, num_heads * head_size)
    return o @ wp.astype(f) + bp.astype(f)


if __name__ == "__main__":
    # Small GPT-style config: n_embd = num_heads * head_size = 128 so the output
    # projection and stores are lane-dense (multiple of 128 lanes).
    num_heads, head_size = 4, 32
    n_embd = num_heads * head_size           # 128
    block_size = 16                          # T
    B, T = 2, block_size

    key = jax.random.PRNGKey(0)
    kx, kq, kk, kv, kp, kb = jax.random.split(key, 6)

    def w(k, shape, scale=0.1):
        # nn.Linear stores (out, in) and computes x @ W.T; storing (in, out) here
        # is the same module under an i.i.d. initializer.  bf16 weights halve the
        # weight DMA; the kernel accumulates in f32 on the MXU.
        return (scale * jax.random.normal(k, shape, dtype=jnp.float32)
                ).astype(jnp.bfloat16)

    wq = w(kq, (n_embd, num_heads * head_size))
    wk = w(kk, (n_embd, num_heads * head_size))
    wv = w(kv, (n_embd, num_heads * head_size))
    wp = w(kp, (num_heads * head_size, n_embd))
    bp = 0.1 * jax.random.normal(kb, (1, n_embd), dtype=jnp.float32)
    # Activations in bf16 (as the surrounding model would provide) -> half x DMA.
    x = jax.random.normal(kx, (B, T, n_embd), dtype=jnp.float32).astype(jnp.bfloat16)

    # q_tile=8 forces the multi-tile path (K/V cache reuse + causal KV-tile
    # skipping + online softmax) even at this tiny sequence length.
    out = multi_head_attention(x, wq, wk, wv, wp, bp,
                               num_heads=num_heads, head_size=head_size,
                               q_tile=8)
    out = jax.block_until_ready(out)
    assert out.shape == (B, T, n_embd)
    assert bool(jnp.all(jnp.isfinite(out)))

    ref = mha_reference(x, wq, wk, wv, wp, bp, num_heads, head_size)
    # bf16 operands (q/k/v/p/o casts) + approx reciprocal vs f32 reference.
    np.testing.assert_allclose(np.asarray(out), np.asarray(ref),
                               rtol=5e-2, atol=3e-2)
    print("KERNEL_OK")
</pallas_src>

<mosaic_0001>
module attributes {stable_mosaic.version = 11 : i64} {
  func.func @_mha_kernel(%arg0: i32, %arg1: i32, %arg2: memref<1x16x128xbf16, #tpu.memory_space<vmem>>, %arg3: memref<128x128xbf16, #tpu.memory_space<vmem>>, %arg4: memref<128x128xbf16, #tpu.memory_space<vmem>>, %arg5: memref<128x128xbf16, #tpu.memory_space<vmem>>, %arg6: memref<128x128xbf16, #tpu.memory_space<vmem>>, %arg7: memref<1x128xf32, #tpu.memory_space<vmem>>, %arg8: memref<1x8x128xf32, #tpu.memory_space<vmem>>, %arg9: memref<4x16x32xbf16, #tpu.memory_space<vmem>>, %arg10: memref<4x16x32xbf16, #tpu.memory_space<vmem>>) attributes {dimension_semantics = [#tpu.dimension_semantics<parallel>, #tpu.dimension_semantics<arbitrary>], iteration_bounds = array<i64: 2, 2>, scalar_prefetch = 0 : i64, scratch_operands = 2 : i64, tpu.core_type = #tpu.core_type<tc>, window_params = [{transform_indices = @transform_0, window_bounds = array<i64: 1, 16, 128>}, {pipeline_mode = #tpu.pipeline_mode<synchronous>, transform_indices = @transform_1, window_bounds = array<i64: 128, 128>}, {pipeline_mode = #tpu.pipeline_mode<synchronous>, transform_indices = @transform_2, window_bounds = array<i64: 128, 128>}, {pipeline_mode = #tpu.pipeline_mode<synchronous>, transform_indices = @transform_3, window_bounds = array<i64: 128, 128>}, {pipeline_mode = #tpu.pipeline_mode<synchronous>, transform_indices = @transform_4, window_bounds = array<i64: 128, 128>}, {pipeline_mode = #tpu.pipeline_mode<synchronous>, transform_indices = @transform_5, window_bounds = array<i64: 1, 128>}, {transform_indices = @transform_6, window_bounds = array<i64: 1, 8, 128>}]} {
    %c8_i32 = arith.constant 8 : i32
    %0 = arith.muli %arg1, %c8_i32 : i32
    %1 = tpu.assume_multiple %0, 8 : i32
    %c0_i32 = arith.constant 0 : i32
    %2 = arith.cmpi eq, %arg1, %c0_i32 : i32
    %3 = arith.extui %2 : i1 to i32
    %c0_i32_0 = arith.constant 0 : i32
    %4 = arith.cmpi ne, %3, %c0_i32_0 : i32
    scf.if %4 {
      %c0_25 = arith.constant 0 : index
      %c0_26 = arith.constant 0 : index
      %c0_27 = arith.constant 0 : index
      %63 = vector.load %arg2[%c0_25, %c0_26, %c0_27] : memref<1x16x128xbf16, #tpu.memory_space<vmem>>, vector<1x16x128xbf16>
      %64 = vector.shape_cast %63 : vector<1x16x128xbf16> to vector<16x128xbf16>
      %c0_28 = arith.constant 0 : index
      %c0_29 = arith.constant 0 : index
      %65 = vector.load %arg4[%c0_28, %c0_29] : memref<128x128xbf16, #tpu.memory_space<vmem>>, vector<128x128xbf16>
      %cst_30 = arith.constant dense<0.000000e+00> : vector<16x128xf32>
      %66 = tpu.matmul %64, %65, %cst_30 {dimension_numbers = #tpu.dot_dimension_numbers<[1], [0], [0], [1], [0, 0, 1, 1], [], []>} : vector<16x128xbf16>, vector<128x128xbf16>, vector<16x128xf32> -> vector<16x128xf32>
      %c0_31 = arith.constant 0 : index
      %c0_32 = arith.constant 0 : index
      %67 = vector.load %arg5[%c0_31, %c0_32] : memref<128x128xbf16, #tpu.memory_space<vmem>>, vector<128x128xbf16>
      %cst_33 = arith.constant dense<0.000000e+00> : vector<16x128xf32>
      %68 = tpu.matmul %64, %67, %cst_33 {dimension_numbers = #tpu.dot_dimension_numbers<[1], [0], [0], [1], [0, 0, 1, 1], [], []>} : vector<16x128xbf16>, vector<128x128xbf16>, vector<16x128xf32> -> vector<16x128xf32>
      %69 = arith.truncf %66 : vector<16x128xf32> to vector<16x128xbf16>
      %70 = vector.shape_cast %69 : vector<16x128xbf16> to vector<16x4x32xbf16>
      %71 = tpu.transpose %70, [1, 0, 2] : vector<16x4x32xbf16> -> vector<4x16x32xbf16>
      %c0_34 = arith.constant 0 : index
      %c0_35 = arith.constant 0 : index
      %c0_36 = arith.constant 0 : index
      %72 = vector.load %arg9[%c0_34, %c0_35, %c0_36] : memref<4x16x32xbf16, #tpu.memory_space<vmem>>, vector<4x16x32xbf16>
      tpu.vector_store %arg9[%c0_34, %c0_35, %c0_36], %71 {strides = array<i32>} : memref<4x16x32xbf16, #tpu.memory_space<vmem>>, vector<4x16x32xbf16>,
      %73 = arith.truncf %68 : vector<16x128xf32> to vector<16x128xbf16>
      %74 = vector.shape_cast %73 : vector<16x128xbf16> to vector<16x4x32xbf16>
      %75 = tpu.transpose %74, [1, 0, 2] : vector<16x4x32xbf16> -> vector<4x16x32xbf16>
      %c0_37 = arith.constant 0 : index
      %c0_38 = arith.constant 0 : index
      %c0_39 = arith.constant 0 : index
      %76 = vector.load %arg10[%c0_37, %c0_38, %c0_39] : memref<4x16x32xbf16, #tpu.memory_space<vmem>>, vector<4x16x32xbf16>
      tpu.vector_store %arg10[%c0_37, %c0_38, %c0_39], %75 {strides = array<i32>} : memref<4x16x32xbf16, #tpu.memory_space<vmem>>, vector<4x16x32xbf16>,
    } else {
    }
    %c0 = arith.constant 0 : index
    %5 = arith.index_cast %1 : i32 to index
    %c0_1 = arith.constant 0 : index
    %6 = vector.load %arg2[%c0, %5, %c0_1] : memref<1x16x128xbf16, #tpu.memory_space<vmem>>, vector<1x8x128xbf16>
    %7 = vector.shape_cast %6 : vector<1x8x128xbf16> to vector<8x128xbf16>
    %c0_2 = arith.constant 0 : index
    %c0_3 = arith.constant 0 : index
    %8 = vector.load %arg3[%c0_2, %c0_3] : memref<128x128xbf16, #tpu.memory_space<vmem>>, vector<128x128xbf16>
    %cst = arith.constant dense<0.000000e+00> : vector<8x128xf32>
    %9 = tpu.matmul %7, %8, %cst {dimension_numbers = #tpu.dot_dimension_numbers<[1], [0], [0], [1], [0, 0, 1, 1], [], []>} : vector<8x128xbf16>, vector<128x128xbf16>, vector<8x128xf32> -> vector<8x128xf32>
    %10 = arith.truncf %9 : vector<8x128xf32> to vector<8x128xbf16>
    %11 = vector.shape_cast %10 : vector<8x128xbf16> to vector<8x4x32xbf16>
    %12 = tpu.transpose %11, [1, 0, 2] : vector<8x4x32xbf16> -> vector<4x8x32xbf16>
    %cst_4 = arith.constant 0xFF800000 : f32
    %13 = vector.broadcast %cst_4 : f32 to vector<4x8x1xf32>
    %cst_5 = arith.constant 0.000000e+00 : f32
    %14 = vector.broadcast %cst_5 : f32 to vector<4x8x1xf32>
    %cst_6 = arith.constant 0.000000e+00 : f32
    %15 = vector.broadcast %cst_6 : f32 to vector<4x8x32xf32>
    %c0_i32_7 = arith.constant 0 : i32
    %16 = arith.subi %arg1, %c0_i32_7 : i32
    %17 = arith.addi %c0_i32_7, %16 : i32
    %c1_i32 = arith.constant 1 : i32
    %18:3 = scf.for %arg11 = %c0_i32_7 to %17 step %c1_i32 iter_args(%arg12 = %13, %arg13 = %14, %arg14 = %15) -> (vector<4x8x1xf32>, vector<4x8x1xf32>, vector<4x8x32xf32>)  : i32 {
      %c8_i32_25 = arith.constant 8 : i32
      %63 = arith.muli %arg11, %c8_i32_25 : i32
      %64 = tpu.assume_multiple %63, 8 : i32
      %c0_26 = arith.constant 0 : index
      %65 = arith.index_cast %64 : i32 to index
      %c0_27 = arith.constant 0 : index
      %66 = vector.load %arg9[%c0_26, %65, %c0_27] : memref<4x16x32xbf16, #tpu.memory_space<vmem>>, vector<4x8x32xbf16>
      %c0_28 = arith.constant 0 : index
      %67 = arith.index_cast %64 : i32 to index
      %c0_29 = arith.constant 0 : index
      %68 = vector.load %arg10[%c0_28, %67, %c0_29] : memref<4x16x32xbf16, #tpu.memory_space<vmem>>, vector<4x8x32xbf16>
      "tpu.trace_start"() <{level = 10 : i32, message = "hqd,hkd->hqk"}> : () -> ()
      %cst_30 = arith.constant dense<0.000000e+00> : vector<4x8x8xf32>
      %69 = tpu.matmul %12, %66, %cst_30 {dimension_numbers = #tpu.dot_dimension_numbers<[2], [2], [1], [1], [0, 0, 0, 1, 1, 1], [0], [0]>} : vector<4x8x32xbf16>, vector<4x8x32xbf16>, vector<4x8x8xf32> -> vector<4x8x8xf32>
      "tpu.trace_stop"() : () -> ()
      %cst_31 = arith.constant dense<0xFF800000> : vector<4x8xf32>
      %70 = vector.multi_reduction <maximumf>, %69, %cst_31 [2] : vector<4x8x8xf32> to vector<4x8xf32>
      %71 = vector.shape_cast %70 : vector<4x8xf32> to vector<4x8x1xf32>
      %72 = arith.maximumf %arg12, %71 : vector<4x8x1xf32>
      %73 = arith.subf %arg12, %72 : vector<4x8x1xf32>
      %74 = math.exp %73 : vector<4x8x1xf32>
      %75 = vector.broadcast %72 : vector<4x8x1xf32> to vector<4x8x8xf32>
      %76 = arith.subf %69, %75 : vector<4x8x8xf32>
      %77 = math.exp %76 : vector<4x8x8xf32>
      %78 = arith.mulf %74, %arg13 : vector<4x8x1xf32>
      %cst_32 = arith.constant dense<0.000000e+00> : vector<4x8xf32>
      %79 = vector.multi_reduction <add>, %77, %cst_32 [2] : vector<4x8x8xf32> to vector<4x8xf32>
      %80 = vector.shape_cast %79 : vector<4x8xf32> to vector<4x8x1xf32>
      %81 = arith.addf %78, %80 : vector<4x8x1xf32>
      %82 = vector.broadcast %74 : vector<4x8x1xf32> to vector<4x8x32xf32>
      %83 = arith.mulf %82, %arg14 : vector<4x8x32xf32>
      %84 = arith.truncf %77 : vector<4x8x8xf32> to vector<4x8x8xbf16>
      "tpu.trace_start"() <{level = 10 : i32, message = "hqk,hkd->hqd"}> : () -> ()
      %cst_33 = arith.constant dense<0.000000e+00> : vector<4x8x32xf32>
      %85 = tpu.matmul %84, %68, %cst_33 {dimension_numbers = #tpu.dot_dimension_numbers<[2], [1], [1], [2], [0, 0, 0, 1, 1, 2], [0], [0]>} : vector<4x8x8xbf16>, vector<4x8x32xbf16>, vector<4x8x32xf32> -> vector<4x8x32xf32>
      "tpu.trace_stop"() : () -> ()
      %86 = arith.addf %83, %85 : vector<4x8x32xf32>
      scf.yield %72, %81, %86 : vector<4x8x1xf32>, vector<4x8x1xf32>, vector<4x8x32xf32>
    }
    %c0_8 = arith.constant 0 : index
    %19 = arith.index_cast %1 : i32 to index
    %c0_9 = arith.constant 0 : index
    %20 = vector.load %arg9[%c0_8, %19, %c0_9] : memref<4x16x32xbf16, #tpu.memory_space<vmem>>, vector<4x8x32xbf16>
    %c0_10 = arith.constant 0 : index
    %21 = arith.index_cast %1 : i32 to index
    %c0_11 = arith.constant 0 : index
    %22 = vector.load %arg10[%c0_10, %21, %c0_11] : memref<4x16x32xbf16, #tpu.memory_space<vmem>>, vector<4x8x32xbf16>
    "tpu.trace_start"() <{level = 10 : i32, message = "hqd,hkd->hqk"}> : () -> ()
    %cst_12 = arith.constant dense<0.000000e+00> : vector<4x8x8xf32>
    %23 = tpu.matmul %12, %20, %cst_12 {dimension_numbers = #tpu.dot_dimension_numbers<[2], [2], [1], [1], [0, 0, 0, 1, 1, 1], [0], [0]>} : vector<4x8x32xbf16>, vector<4x8x32xbf16>, vector<4x8x8xf32> -> vector<4x8x8xf32>
    "tpu.trace_stop"() : () -> ()
    %24 = tpu.iota {dimensions = array<i32: 0>} : vector<8x8xi32>
    %25 = tpu.iota {dimensions = array<i32: 1>} : vector<8x8xi32>
    %26 = arith.cmpi sge, %24, %25 : vector<8x8xi32>
    %27 = vector.shape_cast %26 : vector<8x8xi1> to vector<1x8x8xi1>
    %cst_13 = arith.constant 0xFF800000 : f32
    %28 = vector.shape_cast %27 : vector<1x8x8xi1> to vector<1x8x8xi1>
    %29 = vector.broadcast %28 : vector<1x8x8xi1> to vector<4x8x8xi1>
    %30 = vector.broadcast %cst_13 : f32 to vector<4x8x8xf32>
    %31 = arith.select %29, %23, %30 : vector<4x8x8xi1>, vector<4x8x8xf32>
    %cst_14 = arith.constant dense<0xFF800000> : vector<4x8xf32>
    %32 = vector.multi_reduction <maximumf>, %31, %cst_14 [2] : vector<4x8x8xf32> to vector<4x8xf32>
    %33 = vector.shape_cast %32 : vector<4x8xf32> to vector<4x8x1xf32>
    %34 = arith.maximumf %18#0, %33 : vector<4x8x1xf32>
    %35 = arith.subf %18#0, %34 : vector<4x8x1xf32>
    %36 = math.exp %35 : vector<4x8x1xf32>
    %37 = vector.broadcast %34 : vector<4x8x1xf32> to vector<4x8x8xf32>
    %38 = arith.subf %31, %37 : vector<4x8x8xf32>
    %39 = math.exp %38 : vector<4x8x8xf32>
    %40 = arith.mulf %36, %18#1 : vector<4x8x1xf32>
    %cst_15 = arith.constant dense<0.000000e+00> : vector<4x8xf32>
    %41 = vector.multi_reduction <add>, %39, %cst_15 [2] : vector<4x8x8xf32> to vector<4x8xf32>
    %42 = vector.shape_cast %41 : vector<4x8xf32> to vector<4x8x1xf32>
    %43 = arith.addf %40, %42 : vector<4x8x1xf32>
    %44 = vector.broadcast %36 : vector<4x8x1xf32> to vector<4x8x32xf32>
    %45 = arith.mulf %44, %18#2 : vector<4x8x32xf32>
    %46 = arith.truncf %39 : vector<4x8x8xf32> to vector<4x8x8xbf16>
    "tpu.trace_start"() <{level = 10 : i32, message = "hqk,hkd->hqd"}> : () -> ()
    %cst_16 = arith.constant dense<0.000000e+00> : vector<4x8x32xf32>
    %47 = tpu.matmul %46, %22, %cst_16 {dimension_numbers = #tpu.dot_dimension_numbers<[2], [1], [1], [2], [0, 0, 0, 1, 1, 2], [0], [0]>} : vector<4x8x8xbf16>, vector<4x8x32xbf16>, vector<4x8x32xf32> -> vector<4x8x32xf32>
    "tpu.trace_stop"() : () -> ()
    %48 = arith.addf %45, %47 : vector<4x8x32xf32>
    %49 = tpu.reciprocal %43 {approx = true} : vector<4x8x1xf32> -> vector<4x8x1xf32>
    %50 = vector.broadcast %49 : vector<4x8x1xf32> to vector<4x8x32xf32>
    %51 = arith.mulf %48, %50 : vector<4x8x32xf32>
    %52 = arith.truncf %51 : vector<4x8x32xf32> to vector<4x8x32xbf16>
    %53 = tpu.transpose %52, [1, 0, 2] : vector<4x8x32xbf16> -> vector<8x4x32xbf16>
    %54 = vector.shape_cast %53 : vector<8x4x32xbf16> to vector<8x128xbf16>
    %c0_17 = arith.constant 0 : index
    %c0_18 = arith.constant 0 : index
    %55 = vector.load %arg6[%c0_17, %c0_18] : memref<128x128xbf16, #tpu.memory_space<vmem>>, vector<128x128xbf16>
    %cst_19 = arith.constant dense<0.000000e+00> : vector<8x128xf32>
    %56 = tpu.matmul %54, %55, %cst_19 {dimension_numbers = #tpu.dot_dimension_numbers<[1], [0], [0], [1], [0, 0, 1, 1], [], []>} : vector<8x128xbf16>, vector<128x128xbf16>, vector<8x128xf32> -> vector<8x128xf32>
    %c0_20 = arith.constant 0 : index
    %c0_21 = arith.constant 0 : index
    %57 = vector.load %arg7[%c0_20, %c0_21] : memref<1x128xf32, #tpu.memory_space<vmem>>, vector<1x128xf32>
    %58 = vector.broadcast %57 : vector<1x128xf32> to vector<8x128xf32>
    %59 = arith.addf %56, %58 : vector<8x128xf32>
    %c0_22 = arith.constant 0 : index
    %c0_23 = arith.constant 0 : index
    %c0_24 = arith.constant 0 : index
    %60 = vector.load %arg8[%c0_22, %c0_23, %c0_24] : memref<1x8x128xf32, #tpu.memory_space<vmem>>, vector<1x8x128xf32>
    %61 = vector.shape_cast %60 : vector<1x8x128xf32> to vector<8x128xf32>
    %62 = vector.shape_cast %59 : vector<8x128xf32> to vector<1x8x128xf32>
    tpu.vector_store %arg8[%c0_22, %c0_23, %c0_24], %62 {strides = array<i32>} : memref<1x8x128xf32, #tpu.memory_space<vmem>>, vector<1x8x128xf32>,
    return
  }
  func.func @transform_0(%arg0: i32, %arg1: i32) -> (i32, i32, i32) {
    %c0_i32 = arith.constant 0 : i32
    %c0_i32_0 = arith.constant 0 : i32
    %c0_i32_1 = arith.constant 0 : i32
    return %arg0, %c0_i32, %c0_i32_0 : i32, i32, i32
  }
  func.func @transform_1(%arg0: i32, %arg1: i32) -> (i32, i32) {
    %c0_i32 = arith.constant 0 : i32
    %c0_i32_0 = arith.constant 0 : i32
    %c0_i32_1 = arith.constant 0 : i32
    return %c0_i32, %c0_i32_0 : i32, i32
  }
  func.func @transform_2(%arg0: i32, %arg1: i32) -> (i32, i32) {
    %c0_i32 = arith.constant 0 : i32
    %c0_i32_0 = arith.constant 0 : i32
    %c0_i32_1 = arith.constant 0 : i32
    return %c0_i32, %c0_i32_0 : i32, i32
  }
  func.func @transform_3(%arg0: i32, %arg1: i32) -> (i32, i32) {
    %c0_i32 = arith.constant 0 : i32
    %c0_i32_0 = arith.constant 0 : i32
    %c0_i32_1 = arith.constant 0 : i32
    return %c0_i32, %c0_i32_0 : i32, i32
  }
  func.func @transform_4(%arg0: i32, %arg1: i32) -> (i32, i32) {
    %c0_i32 = arith.constant 0 : i32
    %c0_i32_0 = arith.constant 0 : i32
    %c0_i32_1 = arith.constant 0 : i32
    return %c0_i32, %c0_i32_0 : i32, i32
  }
  func.func @transform_5(%arg0: i32, %arg1: i32) -> (i32, i32) {
    %c0_i32 = arith.constant 0 : i32
    %c0_i32_0 = arith.constant 0 : i32
    %c0_i32_1 = arith.constant 0 : i32
    return %c0_i32, %c0_i32_0 : i32, i32
  }
  func.func @transform_6(%arg0: i32, %arg1: i32) -> (i32, i32, i32) {
    %c0_i32 = arith.constant 0 : i32
    %c0_i32_0 = arith.constant 0 : i32
    return %arg0, %arg1, %c0_i32 : i32, i32, i32
  }
}

module attributes {stable_mosaic.version = 11 : i64} {
  func.func @_mha_kernel(%arg0: i32, %arg1: i32, %arg2: memref<1x16x128xbf16, #tpu.memory_space<vmem>>, %arg3: memref<128x128xbf16, #tpu.memory_space<vmem>>, %arg4: memref<128x128xbf16, #tpu.memory_space<vmem>>, %arg5: memref<128x128xbf16, #tpu.memory_space<vmem>>, %arg6: memref<128x128xbf16, #tpu.memory_space<vmem>>, %arg7: memref<1x128xf32, #tpu.memory_space<vmem>>, %arg8: memref<1x8x128xf32, #tpu.memory_space<vmem>>, %arg9: memref<4x16x32xbf16, #tpu.memory_space<vmem>>, %arg10: memref<4x16x32xbf16, #tpu.memory_space<vmem>>) attributes {dimension_semantics = [#tpu.dimension_semantics<parallel>, #tpu.dimension_semantics<arbitrary>], iteration_bounds = array<i64: 2, 2>, scalar_prefetch = 0 : i64, scratch_operands = 2 : i64, tpu.core_type = #tpu.core_type<tc>, window_params = [{transform_indices = @transform_0, window_bounds = array<i64: 1, 16, 128>}, {pipeline_mode = #tpu.pipeline_mode<synchronous>, transform_indices = @transform_1, window_bounds = array<i64: 128, 128>}, {pipeline_mode = #tpu.pipeline_mode<synchronous>, transform_indices = @transform_2, window_bounds = array<i64: 128, 128>}, {pipeline_mode = #tpu.pipeline_mode<synchronous>, transform_indices = @transform_3, window_bounds = array<i64: 128, 128>}, {pipeline_mode = #tpu.pipeline_mode<synchronous>, transform_indices = @transform_4, window_bounds = array<i64: 128, 128>}, {pipeline_mode = #tpu.pipeline_mode<synchronous>, transform_indices = @transform_5, window_bounds = array<i64: 1, 128>}, {transform_indices = @transform_6, window_bounds = array<i64: 1, 8, 128>}]} {
    %c8_i32 = arith.constant 8 : i32
    %0 = arith.muli %arg1, %c8_i32 : i32
    %1 = tpu.assume_multiple %0, 8 : i32
    %c0_i32 = arith.constant 0 : i32
    %2 = arith.cmpi eq, %arg1, %c0_i32 : i32
    %3 = arith.extui %2 : i1 to i32
    %c0_i32_0 = arith.constant 0 : i32
    %4 = arith.cmpi ne, %3, %c0_i32_0 : i32
    scf.if %4 {
      %c0_25 = arith.constant 0 : index
      %c0_26 = arith.constant 0 : index
      %c0_27 = arith.constant 0 : index
      %63 = vector.load %arg2[%c0_25, %c0_26, %c0_27] : memref<1x16x128xbf16, #tpu.memory_space<vmem>>, vector<1x16x128xbf16>
      %64 = vector.shape_cast %63 : vector<1x16x128xbf16> to vector<16x128xbf16>
      %c0_28 = arith.constant 0 : index
      %c0_29 = arith.constant 0 : index
      %65 = vector.load %arg4[%c0_28, %c0_29] : memref<128x128xbf16, #tpu.memory_space<vmem>>, vector<128x128xbf16>
      %cst_30 = arith.constant dense<0.000000e+00> : vector<16x128xf32>
      %66 = tpu.matmul %64, %65, %cst_30 {dimension_numbers = #tpu.dot_dimension_numbers<[1], [0], [0], [1], [0, 0, 1, 1], [], []>} : vector<16x128xbf16>, vector<128x128xbf16>, vector<16x128xf32> -> vector<16x128xf32>
      %c0_31 = arith.constant 0 : index
      %c0_32 = arith.constant 0 : index
      %67 = vector.load %arg5[%c0_31, %c0_32] : memref<128x128xbf16, #tpu.memory_space<vmem>>, vector<128x128xbf16>
      %cst_33 = arith.constant dense<0.000000e+00> : vector<16x128xf32>
      %68 = tpu.matmul %64, %67, %cst_33 {dimension_numbers = #tpu.dot_dimension_numbers<[1], [0], [0], [1], [0, 0, 1, 1], [], []>} : vector<16x128xbf16>, vector<128x128xbf16>, vector<16x128xf32> -> vector<16x128xf32>
      %69 = arith.truncf %66 : vector<16x128xf32> to vector<16x128xbf16>
      %70 = vector.shape_cast %69 : vector<16x128xbf16> to vector<16x4x32xbf16>
      %71 = tpu.transpose %70, [1, 0, 2] : vector<16x4x32xbf16> -> vector<4x16x32xbf16>
      %c0_34 = arith.constant 0 : index
      %c0_35 = arith.constant 0 : index
      %c0_36 = arith.constant 0 : index
      %72 = vector.load %arg9[%c0_34, %c0_35, %c0_36] : memref<4x16x32xbf16, #tpu.memory_space<vmem>>, vector<4x16x32xbf16>
      tpu.vector_store %arg9[%c0_34, %c0_35, %c0_36], %71 {strides = array<i32>} : memref<4x16x32xbf16, #tpu.memory_space<vmem>>, vector<4x16x32xbf16>,
      %73 = arith.truncf %68 : vector<16x128xf32> to vector<16x128xbf16>
      %74 = vector.shape_cast %73 : vector<16x128xbf16> to vector<16x4x32xbf16>
      %75 = tpu.transpose %74, [1, 0, 2] : vector<16x4x32xbf16> -> vector<4x16x32xbf16>
      %c0_37 = arith.constant 0 : index
      %c0_38 = arith.constant 0 : index
      %c0_39 = arith.constant 0 : index
      %76 = vector.load %arg10[%c0_37, %c0_38, %c0_39] : memref<4x16x32xbf16, #tpu.memory_space<vmem>>, vector<4x16x32xbf16>
      tpu.vector_store %arg10[%c0_37, %c0_38, %c0_39], %75 {strides = array<i32>} : memref<4x16x32xbf16, #tpu.memory_space<vmem>>, vector<4x16x32xbf16>,
    } else {
    }
    %c0 = arith.constant 0 : index
    %5 = arith.index_cast %1 : i32 to index
    %c0_1 = arith.constant 0 : index
    %6 = vector.load %arg2[%c0, %5, %c0_1] : memref<1x16x128xbf16, #tpu.memory_space<vmem>>, vector<1x8x128xbf16>
    %7 = vector.shape_cast %6 : vector<1x8x128xbf16> to vector<8x128xbf16>
    %c0_2 = arith.constant 0 : index
    %c0_3 = arith.constant 0 : index
    %8 = vector.load %arg3[%c0_2, %c0_3] : memref<128x128xbf16, #tpu.memory_space<vmem>>, vector<128x128xbf16>
    %cst = arith.constant dense<0.000000e+00> : vector<8x128xf32>
    %9 = tpu.matmul %7, %8, %cst {dimension_numbers = #tpu.dot_dimension_numbers<[1], [0], [0], [1], [0, 0, 1, 1], [], []>} : vector<8x128xbf16>, vector<128x128xbf16>, vector<8x128xf32> -> vector<8x128xf32>
    %10 = arith.truncf %9 : vector<8x128xf32> to vector<8x128xbf16>
    %11 = vector.shape_cast %10 : vector<8x128xbf16> to vector<8x4x32xbf16>
    %12 = tpu.transpose %11, [1, 0, 2] : vector<8x4x32xbf16> -> vector<4x8x32xbf16>
    %cst_4 = arith.constant 0xFF800000 : f32
    %13 = vector.broadcast %cst_4 : f32 to vector<4x8x1xf32>
    %cst_5 = arith.constant 0.000000e+00 : f32
    %14 = vector.broadcast %cst_5 : f32 to vector<4x8x1xf32>
    %cst_6 = arith.constant 0.000000e+00 : f32
    %15 = vector.broadcast %cst_6 : f32 to vector<4x8x32xf32>
    %c0_i32_7 = arith.constant 0 : i32
    %16 = arith.subi %arg1, %c0_i32_7 : i32
    %17 = arith.addi %c0_i32_7, %16 : i32
    %c1_i32 = arith.constant 1 : i32
    %18:3 = scf.for %arg11 = %c0_i32_7 to %17 step %c1_i32 iter_args(%arg12 = %13, %arg13 = %14, %arg14 = %15) -> (vector<4x8x1xf32>, vector<4x8x1xf32>, vector<4x8x32xf32>)  : i32 {
      %c8_i32_25 = arith.constant 8 : i32
      %63 = arith.muli %arg11, %c8_i32_25 : i32
      %64 = tpu.assume_multiple %63, 8 : i32
      %c0_26 = arith.constant 0 : index
      %65 = arith.index_cast %64 : i32 to index
      %c0_27 = arith.constant 0 : index
      %66 = vector.load %arg9[%c0_26, %65, %c0_27] : memref<4x16x32xbf16, #tpu.memory_space<vmem>>, vector<4x8x32xbf16>
      %c0_28 = arith.constant 0 : index
      %67 = arith.index_cast %64 : i32 to index
      %c0_29 = arith.constant 0 : index
      %68 = vector.load %arg10[%c0_28, %67, %c0_29] : memref<4x16x32xbf16, #tpu.memory_space<vmem>>, vector<4x8x32xbf16>
      "tpu.trace_start"() <{level = 10 : i32, message = "hqd,hkd->hqk"}> : () -> ()
      %cst_30 = arith.constant dense<0.000000e+00> : vector<4x8x8xf32>
      %69 = tpu.matmul %12, %66, %cst_30 {dimension_numbers = #tpu.dot_dimension_numbers<[2], [2], [1], [1], [0, 0, 0, 1, 1, 1], [0], [0]>} : vector<4x8x32xbf16>, vector<4x8x32xbf16>, vector<4x8x8xf32> -> vector<4x8x8xf32>
      "tpu.trace_stop"() : () -> ()
      %cst_31 = arith.constant dense<0xFF800000> : vector<4x8xf32>
      %70 = vector.multi_reduction <maximumf>, %69, %cst_31 [2] : vector<4x8x8xf32> to vector<4x8xf32>
      %71 = vector.shape_cast %70 : vector<4x8xf32> to vector<4x8x1xf32>
      %72 = arith.maximumf %arg12, %71 : vector<4x8x1xf32>
      %73 = arith.subf %arg12, %72 : vector<4x8x1xf32>
      %74 = math.exp %73 : vector<4x8x1xf32>
      %75 = vector.broadcast %72 : vector<4x8x1xf32> to vector<4x8x8xf32>
      %76 = arith.subf %69, %75 : vector<4x8x8xf32>
      %77 = math.exp %76 : vector<4x8x8xf32>
      %78 = arith.mulf %74, %arg13 : vector<4x8x1xf32>
      %cst_32 = arith.constant dense<0.000000e+00> : vector<4x8xf32>
      %79 = vector.multi_reduction <add>, %77, %cst_32 [2] : vector<4x8x8xf32> to vector<4x8xf32>
      %80 = vector.shape_cast %79 : vector<4x8xf32> to vector<4x8x1xf32>
      %81 = arith.addf %78, %80 : vector<4x8x1xf32>
      %82 = vector.broadcast %74 : vector<4x8x1xf32> to vector<4x8x32xf32>
      %83 = arith.mulf %82, %arg14 : vector<4x8x32xf32>
      %84 = arith.truncf %77 : vector<4x8x8xf32> to vector<4x8x8xbf16>
      "tpu.trace_start"() <{level = 10 : i32, message = "hqk,hkd->hqd"}> : () -> ()
      %cst_33 = arith.constant dense<0.000000e+00> : vector<4x8x32xf32>
      %85 = tpu.matmul %84, %68, %cst_33 {dimension_numbers = #tpu.dot_dimension_numbers<[2], [1], [1], [2], [0, 0, 0, 1, 1, 2], [0], [0]>} : vector<4x8x8xbf16>, vector<4x8x32xbf16>, vector<4x8x32xf32> -> vector<4x8x32xf32>
      "tpu.trace_stop"() : () -> ()
      %86 = arith.addf %83, %85 : vector<4x8x32xf32>
      scf.yield %72, %81, %86 : vector<4x8x1xf32>, vector<4x8x1xf32>, vector<4x8x32xf32>
    }
    %c0_8 = arith.constant 0 : index
    %19 = arith.index_cast %1 : i32 to index
    %c0_9 = arith.constant 0 : index
    %20 = vector.load %arg9[%c0_8, %19, %c0_9] : memref<4x16x32xbf16, #tpu.memory_space<vmem>>, vector<4x8x32xbf16>
    %c0_10 = arith.constant 0 : index
    %21 = arith.index_cast %1 : i32 to index
    %c0_11 = arith.constant 0 : index
    %22 = vector.load %arg10[%c0_10, %21, %c0_11] : memref<4x16x32xbf16, #tpu.memory_space<vmem>>, vector<4x8x32xbf16>
    "tpu.trace_start"() <{level = 10 : i32, message = "hqd,hkd->hqk"}> : () -> ()
    %cst_12 = arith.constant dense<0.000000e+00> : vector<4x8x8xf32>
    %23 = tpu.matmul %12, %20, %cst_12 {dimension_numbers = #tpu.dot_dimension_numbers<[2], [2], [1], [1], [0, 0, 0, 1, 1, 1], [0], [0]>} : vector<4x8x32xbf16>, vector<4x8x32xbf16>, vector<4x8x8xf32> -> vector<4x8x8xf32>
    "tpu.trace_stop"() : () -> ()
    %24 = tpu.iota {dimensions = array<i32: 0>} : vector<8x8xi32>
    %25 = tpu.iota {dimensions = array<i32: 1>} : vector<8x8xi32>
    %26 = arith.cmpi sge, %24, %25 : vector<8x8xi32>
    %27 = vector.shape_cast %26 : vector<8x8xi1> to vector<1x8x8xi1>
    %cst_13 = arith.constant 0xFF800000 : f32
    %28 = vector.shape_cast %27 : vector<1x8x8xi1> to vector<1x8x8xi1>
    %29 = vector.broadcast %28 : vector<1x8x8xi1> to vector<4x8x8xi1>
    %30 = vector.broadcast %cst_13 : f32 to vector<4x8x8xf32>
    %31 = arith.select %29, %23, %30 : vector<4x8x8xi1>, vector<4x8x8xf32>
    %cst_14 = arith.constant dense<0xFF800000> : vector<4x8xf32>
    %32 = vector.multi_reduction <maximumf>, %31, %cst_14 [2] : vector<4x8x8xf32> to vector<4x8xf32>
    %33 = vector.shape_cast %32 : vector<4x8xf32> to vector<4x8x1xf32>
    %34 = arith.maximumf %18#0, %33 : vector<4x8x1xf32>
    %35 = arith.subf %18#0, %34 : vector<4x8x1xf32>
    %36 = math.exp %35 : vector<4x8x1xf32>
    %37 = vector.broadcast %34 : vector<4x8x1xf32> to vector<4x8x8xf32>
    %38 = arith.subf %31, %37 : vector<4x8x8xf32>
    %39 = math.exp %38 : vector<4x8x8xf32>
    %40 = arith.mulf %36, %18#1 : vector<4x8x1xf32>
    %cst_15 = arith.constant dense<0.000000e+00> : vector<4x8xf32>
    %41 = vector.multi_reduction <add>, %39, %cst_15 [2] : vector<4x8x8xf32> to vector<4x8xf32>
    %42 = vector.shape_cast %41 : vector<4x8xf32> to vector<4x8x1xf32>
    %43 = arith.addf %40, %42 : vector<4x8x1xf32>
    %44 = vector.broadcast %36 : vector<4x8x1xf32> to vector<4x8x32xf32>
    %45 = arith.mulf %44, %18#2 : vector<4x8x32xf32>
    %46 = arith.truncf %39 : vector<4x8x8xf32> to vector<4x8x8xbf16>
    "tpu.trace_start"() <{level = 10 : i32, message = "hqk,hkd->hqd"}> : () -> ()
    %cst_16 = arith.constant dense<0.000000e+00> : vector<4x8x32xf32>
    %47 = tpu.matmul %46, %22, %cst_16 {dimension_numbers = #tpu.dot_dimension_numbers<[2], [1], [1], [2], [0, 0, 0, 1, 1, 2], [0], [0]>} : vector<4x8x8xbf16>, vector<4x8x32xbf16>, vector<4x8x32xf32> -> vector<4x8x32xf32>
    "tpu.trace_stop"() : () -> ()
    %48 = arith.addf %45, %47 : vector<4x8x32xf32>
    %49 = tpu.reciprocal %43 {approx = true} : vector<4x8x1xf32> -> vector<4x8x1xf32>
    %50 = vector.broadcast %49 : vector<4x8x1xf32> to vector<4x8x32xf32>
    %51 = arith.mulf %48, %50 : vector<4x8x32xf32>
    %52 = arith.truncf %51 : vector<4x8x32xf32> to vector<4x8x32xbf16>
    %53 = tpu.transpose %52, [1, 0, 2] : vector<4x8x32xbf16> -> vector<8x4x32xbf16>
    %54 = vector.shape_cast %53 : vector<8x4x32xbf16> to vector<8x128xbf16>
    %c0_17 = arith.constant 0 : index
    %c0_18 = arith.constant 0 : index
    %55 = vector.load %arg6[%c0_17, %c0_18] : memref<128x128xbf16, #tpu.memory_space<vmem>>, vector<128x128xbf16>
    %cst_19 = arith.constant dense<0.000000e+00> : vector<8x128xf32>
    %56 = tpu.matmul %54, %55, %cst_19 {dimension_numbers = #tpu.dot_dimension_numbers<[1], [0], [0], [1], [0, 0, 1, 1], [], []>} : vector<8x128xbf16>, vector<128x128xbf16>, vector<8x128xf32> -> vector<8x128xf32>
    %c0_20 = arith.constant 0 : index
    %c0_21 = arith.constant 0 : index
    %57 = vector.load %arg7[%c0_20, %c0_21] : memref<1x128xf32, #tpu.memory_space<vmem>>, vector<1x128xf32>
    %58 = vector.broadcast %57 : vector<1x128xf32> to vector<8x128xf32>
    %59 = arith.addf %56, %58 : vector<8x128xf32>
    %c0_22 = arith.constant 0 : index
    %c0_23 = arith.constant 0 : index
    %c0_24 = arith.constant 0 : index
    %60 = vector.load %arg8[%c0_22, %c0_23, %c0_24] : memref<1x8x128xf32, #tpu.memory_space<vmem>>, vector<1x8x128xf32>
    %61 = vector.shape_cast %60 : vector<1x8x128xf32> to vector<8x128xf32>
    %62 = vector.shape_cast %59 : vector<8x128xf32> to vector<1x8x128xf32>
    tpu.vector_store %arg8[%c0_22, %c0_23, %c0_24], %62 {strides = array<i32>} : memref<1x8x128xf32, #tpu.memory_space<vmem>>, vector<1x8x128xf32>,
    return
  }
  func.func @transform_0(%arg0: i32, %arg1: i32) -> (i32, i32, i32) {
    %c0_i32 = arith.constant 0 : i32
    %c0_i32_0 = arith.constant 0 : i32
    %c0_i32_1 = arith.constant 0 : i32
    return %arg0, %c0_i32, %c0_i32_0 : i32, i32, i32
  }
  func.func @transform_1(%arg0: i32, %arg1: i32) -> (i32, i32) {
    %c0_i32 = arith.constant 0 : i32
    %c0_i32_0 = arith.constant 0 : i32
    %c0_i32_1 = arith.constant 0 : i32
    return %c0_i32, %c0_i32_0 : i32, i32
  }
  func.func @transform_2(%arg0: i32, %arg1: i32) -> (i32, i32) {
    %c0_i32 = arith.constant 0 : i32
    %c0_i32_0 = arith.constant 0 : i32
    %c0_i32_1 = arith.constant 0 : i32
    return %c0_i32, %c0_i32_0 : i32, i32
  }
  func.func @transform_3(%arg0: i32, %arg1: i32) -> (i32, i32) {
    %c0_i32 = arith.constant 0 : i32
    %c0_i32_0 = arith.constant 0 : i32
    %c0_i32_1 = arith.constant 0 : i32
    return %c0_i32, %c0_i32_0 : i32, i32
  }
  func.func @transform_4(%arg0: i32, %arg1: i32) -> (i32, i32) {
    %c0_i32 = arith.constant 0 : i32
    %c0_i32_0 = arith.constant 0 : i32
    %c0_i32_1 = arith.constant 0 : i32
    return %c0_i32, %c0_i32_0 : i32, i32
  }
  func.func @transform_5(%arg0: i32, %arg1: i32) -> (i32, i32) {
    %c0_i32 = arith.constant 0 : i32
    %c0_i32_0 = arith.constant 0 : i32
    %c0_i32_1 = arith.constant 0 : i32
    return %c0_i32, %c0_i32_0 : i32, i32
  }
  func.func @transform_6(%arg0: i32, %arg1: i32) -> (i32, i32, i32) {
    %c0_i32 = arith.constant 0 : i32
    %c0_i32_0 = arith.constant 0 : i32
    return %arg0, %arg1, %c0_i32 : i32, i32, i32
  }
}

</mosaic_0001>

<bundles_post_ra>
// kernel: tpu_custom_call.1
= control target key start
LH: loop header
LB: loop body
LE: loop exit
PB: predicated region body
PF: predicated region fallthrough
CT: control target
= control target key end

     0   :  { %s5034_s0 = inlined_call_operand.hbm [shape: bf16[2,16,128], index: 0, kind: input, shape index: {}]   ;;  %s5035_s1 = inlined_call_operand.hbm [shape: bf16[128,128], index: 1, kind: input, shape index: {}]   ;;  %s5036_s2 = inlined_call_operand.hbm [shape: bf16[128,128], index: 2, kind: input, shape index: {}]   ;;  %s5037_s3 = inlined_call_operand.hbm [shape: bf16[128,128], index: 3, kind: input, shape index: {}]   ;;  %s5038_s4 = inlined_call_operand.hbm [shape: bf16[128,128], index: 4, kind: input, shape index: {}]   ;;  %s5039_s5 = inlined_call_operand.vmem [shape: f32[1,128], index: 5, kind: input, shape index: {}]   ;;  %s5040_s6 = inlined_call_operand.hbm [shape: f32[2,16,128], index: 6, kind: output, shape index: {}]  }
   0x1   :  { %5048 = sst [smem:[#allocation22_spill]] %s5035_s1 }
   0x2   :  { %5049 = sst [smem:[#allocation23_spill]] %s5036_s2 }
   0x3   :  { %5050 = sst [smem:[#allocation24_spill]] %s5037_s3 }
   0x4   :  { %5051 = sst [smem:[#allocation25_spill]] %s5038_s4 }
   0x5   :  { %5052 = sst [smem:[#allocation26_spill]] %s5039_s5 }
   0x6   :  { %5053 = sst [smem:[#allocation27_spill]] %s5040_s6 }
   0x7   :  { %11 = vsyncpa [#allocation5], 0 }
   0x8   :  { %13 = vsyncpa [#allocation5 + $0x1], 0 }
   0x9   :  { %14 = vsyncpa [#allocation8], 0 }
   0xa   :  { %15 = vsyncpa [#allocation11], 0 }
   0xb   :  { %16 = vsyncpa [#allocation6], 0 }
   0xc   :  { %18 = vsyncpa [#allocation6 + $0x1], 0  ;;  %s4189_s21 = smov 0   ;;  %s4191_s22 = smov 0  }
   0xd   :  { %s4193_s23 = smov 0   ;;  %s4195_s24 = smov 0  }
   0xe   :  { %s4197_s25 = smov 0   ;;  %s4199_s26 = smov 0  }
   0xf   :  { %s4201_s27 = smov 0   ;;  %s4203_s28 = smov 0  }
  0x10   :  { %s4205_s29 = smov 0   ;;  %s4207_s30 = smov 0  }
  0x11   :  { %s4209_s7 = smov 0  }
  0x12 LB: > { %5054 = sst [smem:[#allocation18_spill]] %s3986_s21  ;;  %s2879_s8 = sadd.s32 4294967295, %s4026_s7   ;;  %s4026_s7 = sphi %s4209_s7, %s24_s7   ;;  %s4022_s30 = sphi %s4207_s30, %s5109_s30   ;;  %s4018_s29 = sphi %s4205_s29, %s5101_s29   ;;  %s4014_s28 = sphi %s4203_s28, %s5108_s28   ;;  %s4010_s27 = sphi %s4201_s27, %s5100_s27   ;;  %s4006_s26 = sphi %s4199_s26, %s5107_s26   ;;  %s4002_s25 = sphi %s4197_s25, %s5106_s25   ;;  %s3998_s24 = sphi %s4195_s24, %s5105_s24   ;;  %s3994_s23 = sphi %s4193_s23, %s5104_s23   ;;  %s3990_s22 = sphi %s4191_s22, %s5103_s22   ;;  %s3986_s21 = sphi %s4189_s21, %s5102_s21  }
  0x13   : > { %5055 = sst [smem:[#allocation19_spill]] %s4018_s29  ;;  %s2880_s9 = sadd.s32 4294967294, %s4026_s7  }
  0x14   : > { %p56_p0 = scmp.ne.s32.totalorder %s4002_s25, %s3998_s24  ;;  %p4245_p1 = scmp.eq.s32.totalorder %s2879_s8, 0 }
  0x15   : > { %p186_p2 = scmp.ne.s32.totalorder %s3994_s23, %s3990_s22  ;;  %p187_p3 = scmp.eq.s32.totalorder %s2879_s8, 3 }
  0x16   : > { %p4253_p4 = por %p4245_p1, %p56_p0  ;;  %p192_p5 = scmp.ne.s32.totalorder %s3990_s22, %s3986_s21 }
  0x17   : > { %p4259_p6 = por %p187_p3, %p186_p2  ;;  %p193_p7 = scmp.eq.s32.totalorder %s2880_s9, 3 }
  0x18   : > { %p2881_p8 = scmp.ge.s32.totalorder %s4026_s7, 1  ;;  %p200_p9 = scmp.lt.s32.totalorder %s4026_s7, 5 }
  0x19   : > { %p4265_p10 = por %p193_p7, %p192_p5  ;;  %s4128_s15 = smov [#allocation7]  }
  0x1a   : > { %p4269_p11 = pnand %p2881_p8, %p200_p9  ;;  %s212_s16 = sshll.u32 %s4128_s15, 4  ;;  %s213_s16 = int_to_ptr.vmem [resolvable:$true] %s212_s16 }
  0x1b   : > { %s5059_s13 = scalar_select %p4265_p10, 1, 0 }
  0x1c   : > { %p3250_p12 = pneg %p4269_p11  ;;  %s4129_s18 = smov [#allocation10]  }
  0x1d   : > { %5060 = sst [smem:[#allocation20_spill]] %s5059_s13  ;;  %s238_s19 = sshll.u32 %s4129_s18, 4  ;;  %s239_s19 = int_to_ptr.vmem [resolvable:$true] %s238_s19 }
  0x1e   : > { %p4277_p13 = pnand %p3250_p12, %p4245_p1  ;;  %s3677_s20 = scalar_lea.vmem %s213_s16, 1024 }
  0x1f   : > { %p3678_p2 = scmp.ne.s32.totalorder %s213_s16, %s3677_s20  ;;  %p3685_p7 = scmp.lt.s32.totalorder %s213_s16, %s213_s16 }
  0x20   : > { %p3668_p0 = pneg %p4277_p13  ;;  %p3686_p8 = scmp.lt.s32.totalorder %s3677_s20, %s3677_s20 }
  0x22   : > { %p3680_p3 = pnand %p3678_p2, %p3668_p0  ;;  %p3687_p9 = por %p3686_p8, %p3685_p7 }
  0x24   : > { %p3681_p5 = pneg %p3680_p3 }
  0x26   : > { %p3688_p12 = pnand %p3687_p9, %p3681_p5 }
  0x28   : > { %3691 = shalt.err (!%p3688_p12)
}
  0x29   : > { %s5043_s24 = smov 64   ;;  %s5044_s8 = smov 4  }
  0x2a   : > { %s5063_s1 = sld [smem:[#allocation22_spill]]  ;;  %s3703_s18 = scalar_lea.vmem %s239_s19, 1024 }
  0x2b   : > { %p3704_p2 = scmp.ne.s32.totalorder %s239_s19, %s3703_s18  ;;  %p3711_p5 = scmp.lt.s32.totalorder %s239_s19, %s239_s19 }
  0x2c   : > { %p3712_p8 = scmp.lt.s32.totalorder %s3703_s18, %s3703_s18 }
  0x2d   : > { %p3706_p3 = pnand %p3704_p2, %p3668_p0 }
  0x2e   : > { %p3713_p9 = por %p3712_p8, %p3711_p5 }
  0x2f   : > { %p3707_p7 = pneg %p3706_p3 }
  0x30   : > { %3253 = dma.hbm_to_vmem [thread:$0]  (!%p4277_p13), %s5063_s1, 1024, %s213_s16, [#allocation8], %s5043_s24, %s5043_s24, %s5044_s8  }
  0x31   : > { %p3714_p12 = pnand %p3713_p9, %p3707_p7 }
  0x33   : > { %3717 = shalt.err (!%p3714_p12)
}
  0x34   : > { %s5064_s3 = sld [smem:[#allocation24_spill]]  ;;  %s4132_s16 = smov [#allocation9]  }
  0x35   : > { %s225_s9 = sshll.u32 %s4132_s16, 4  ;;  %s4133_s15 = smov [#allocation12]   ;;  %s226_s9 = int_to_ptr.vmem [resolvable:$true] %s225_s9 }
  0x36   : > { %s251_s1 = sshll.u32 %s4133_s15, 4  ;;  %s3729_s21 = scalar_lea.vmem %s226_s9, 1024  ;;  %s252_s1 = int_to_ptr.vmem [resolvable:$true] %s251_s1 }
  0x37   : > { %p3730_p2 = scmp.ne.s32.totalorder %s226_s9, %s3729_s21  ;;  %p3737_p5 = scmp.lt.s32.totalorder %s226_s9, %s226_s9 }
  0x38   : > { %p3738_p8 = scmp.lt.s32.totalorder %s3729_s21, %s3729_s21 }
  0x39   : > { %p3732_p3 = pnand %p3730_p2, %p3668_p0 }
  0x3a   : > { %3259 = dma.hbm_to_vmem [thread:$0]  (!%p4277_p13), %s5064_s3, 1024, %s239_s19, [#allocation11], %s5043_s24, %s5043_s24, %s5044_s8  }
  0x3b   : > { %p3733_p7 = pneg %p3732_p3  ;;  %p3739_p9 = por %p3738_p8, %p3737_p5 }
  0x3d   : > { %p3740_p12 = pnand %p3739_p9, %p3733_p7 }
  0x3f   : > { %3743 = shalt.err (!%p3740_p12)
}
  0x40   : > { %s5065_s2 = sld [smem:[#allocation23_spill]]  ;;  %s3755_s18 = scalar_lea.vmem %s252_s1, 1024 }
  0x41   : > { %p3756_p10 = scmp.ne.s32.totalorder %s252_s1, %s3755_s18  ;;  %p3763_p5 = scmp.lt.s32.totalorder %s252_s1, %s252_s1 }
  0x42   : > { %p3764_p7 = scmp.lt.s32.totalorder %s3755_s18, %s3755_s18 }
  0x43   : > { %p3758_p2 = pnand %p3756_p10, %p3668_p0 }
  0x44   : > { %p3765_p8 = por %p3764_p7, %p3763_p5 }
  0x45   : > { %p3759_p3 = pneg %p3758_p2 }
  0x46   : > { %3256 = dma.hbm_to_vmem [thread:$0]  (!%p4277_p13), %s5065_s2, 1024, %s226_s9, [#allocation8], %s5043_s24, %s5043_s24, %s5044_s8  }
  0x47   : > { %p3766_p9 = pnand %p3765_p8, %p3759_p3 }
  0x49   : > { %3769 = shalt.err (!%p3766_p9)
}
  0x4a   : > { %s5066_s4 = sld [smem:[#allocation25_spill]]  ;;  %s33_s17 = sadd.s32 1, %s4018_s29 }
  0x4b   : > { %p34_p10 = scmp.ge.s32.totalorder %s33_s17, 2  ;;  %s36_s16 = sadd.s32 1, %s4022_s30 }
  0x4c   : > { %s43_s9 = sadd.s32 1, %s4006_s26  ;;  %p50_p0 = scmp.ne.s32.totalorder %s4006_s26, %s4002_s25 }
  0x4d   : > { %s5111_s17 = smov (%p34_p10, %s33_s17), 0  ;;  %s5113_s16 = smov (!%p34_p10, %s36_s16), %s4022_s30 }
  0x4e   : > { %5067 = sst [smem:[#allocation21_spill]] %s5111_s17  ;;  %p51_p12 = scmp.eq.s32.totalorder %s4026_s7, 0 }
  0x4f   : > { %s172_s15 = ssub.s32 %s4018_s29, %s5111_s17  ;;  %p38_p2 = scmp.ge.s32.totalorder %s5113_s16, 2 }
  0x50   : > { %3262 = dma.hbm_to_vmem [thread:$0]  (!%p4277_p13), %s5066_s4, 1024, %s252_s1, [#allocation11], %s5043_s24, %s5043_s24, %s5044_s8  }
  0x51   : > { %s176_s13 = sadd.s32 1, %s3994_s23  ;;  %p4339_p3 = por %p51_p12, %p50_p0 }
  0x52   : > { %p3275_p13 = scmp.lt.s32.totalorder %s4026_s7, 4  ;;  %s5115_s16 = smov (%p38_p2, %s5113_s16), 0 }
  0x53   : > { %s268_s19 = sand.u32 1, %s4006_s26   ;;  %s2985_s18 = sshll.u32 %s4022_s30, 7 }
  0x54   : > { %s40_s21 = ssub.s32 %s4022_s30, %s5115_s16  ;;  %s2887_s24 = sshll.u32 %s268_s19, 3 }
  0x55   : > { %p41_p5 = scmp.eq.s32.totalorder %s40_s21, 0  ;;  %s173_s20 = sor.u32 %s172_s15, %s40_s21 }
  0x56   : > { %p174_p7 = scmp.eq.s32.totalorder %s173_s20, 0  ;;  %s278_s17 = scalar_lea.hbm %s5034_s0, %s2985_s18 }
  0x57   : > { %s4351_s8 = scalar_select %p41_p5, %s4006_s26, %s43_s9  }
  0x58   : > { %s4354_s2 = scalar_select %p174_p7, %s3994_s23, %s176_s13  }
  0x59   : > { %s272_s29 = scalar_lea.vmem [#allocation4], %s2887_s24  ;;  %p4363_p8 = pnand %p3275_p13, %p4339_p3 }
  0x5a   : > { %s279_s6 = sshll.u32 %s272_s29, 4  ;;  %s269_s15 = scalar_lea.sflag [#allocation5], %s268_s19  ;;  %s280_s6 = int_to_ptr.vmem [resolvable:$true] %s279_s6 }
  0x5b   : > { %p3772_p9 = pneg %p4363_p8  ;;  %s3783_s9 = scalar_lea.vmem %s280_s6, 128 }
  0x5c   : > { %p3784_p10 = scmp.ne.s32.totalorder %s280_s6, %s3783_s9  ;;  %s4134_s13 = smov [#allocation4]  }
  0x5d   : > { %s3788_s3 = sshll.u32 %s4134_s13, 4  ;;  %s3789_s3 = int_to_ptr.vmem [resolvable:$false] %s3788_s3 }
  0x5e   : > { %p3786_p0 = pnand %p3784_p10, %p3772_p9  ;;  %s3790_s4 = scalar_lea.vmem %s3789_s3, 256 }
  0x5f   : > { %p3791_p2 = scmp.lt.s32.totalorder %s280_s6, %s3789_s3  ;;  %p3792_p5 = scmp.lt.s32.totalorder %s3790_s4, %s3783_s9 }
  0x60   : > { %p3787_p12 = pneg %p3786_p0 }
  0x61   : > { %p3793_p7 = por %p3792_p5, %p3791_p2 }
  0x63   : > { %p3794_p3 = pnand %p3793_p7, %p3787_p12 }
  0x65   : > { %3797 = shalt.err (!%p3794_p3)
}
  0x66   : > { %s5070_s29 = smov 4   ;;  %s5071_s24 = smov 64  }
  0x67   : > { %3266 = dma.hbm_to_vmem [thread:$0]  (!%p4363_p8), %s278_s17, 128, %s280_s6, %s269_s15, %s5071_s24, %s5071_s24, %s5070_s29  }
  0x68   : > { %291 = sbr.rel (%p4269_p11) target bundleno = 2419 (0x973), region = 44  ;;  %s293_s1 = sand.u32 (!%p4269_p11), 1, %s4002_s25  }
  0x69   : > { %s4377_s19 = sshll.u32 (!%p4269_p11), %s293_s1, 3  ;;  %s294_s18 = scalar_lea.sflag (!%p4269_p11), [#allocation5], %s293_s1 }
  0x6a   : > { %s297_s21 = scalar_lea.vmem (!%p4269_p11), [#allocation4], %s4377_s19 }
  0x6d   : > { %3969 = dma.done.wait (%p4253_p4), %s294_s18, 128  }
  0x6e   : > { %3971 = vsyncadd (%p4253_p4), %s294_s18, 4294967168 }
  0x6f   : > { %3973 = dma.done.wait (%p4245_p1), [#allocation8], 2048  }
  0x70   : > { %3975 = vsyncadd (%p4245_p1), [#allocation8], 4294965248 }
  0x71   : > { %3977 = dma.done.wait (%p4245_p1), [#allocation11], 2048  }
  0x72   : > { %3979 = vsyncadd (%p4245_p1), [#allocation11], 4294965248  ;;  %s339_s5 = sand.u32 1, %s3990_s22   ;;  %s2897_s6 = sshll.u32 %s4010_s27, 3 }
  0x73   : > { %s4396_s11 = sshll.u32 %s339_s5, 3  ;;  %p2898_p4 = scmp.ne.s32.totalorder %s4010_s27, 0 }
  0x74   : > { %s341_s14 = scalar_lea.vmem [#allocation13], %s4396_s11  ;;  %s4137_s10 = smov (!%p2898_p4), 32  }
  0x75   : > { %347 = sbr.rel (%p2898_p4) target bundleno = 523 (0x20b), region = 68  ;;  %s4138_s17 = smov (!%p2898_p4), 96  }
  0x76   : > { %s4139_s20 = smov (!%p2898_p4), 64  }
  0x7a   : > { %v3593_v0 = vld [vmem:[#allocation9 + $0x38] sm:$0xff]   ;;  %v4135_v1 = vmov 0.0   ;;  %v3595_v3 = vld [vmem:[#allocation9 + $0x30] sm:$0xff]   ;;  %vm4136_vm0 = vmmov 0   ;;  %v3597_v5 = vld [vmem:[#allocation9 + $0x28] sm:$0xff]   ;;  %v600_v30 = vlaneseq  ;;  %v4142_v35 = vmov 0  }
  0x7b   : > { %3054 = vmatprep.subr.bf16.mxu0 %v4135_v1  ;;  %3074 = vmatprep.subr.bf16.mxu1 %v4135_v1  ;;  %v3594_v2 = vld [vmem:[#allocation10 + $0x38] sm:$0xff]   ;;  %v3596_v4 = vld [vmem:[#allocation10 + $0x30] sm:$0xff]   ;;  %v3598_v6 = vld [vmem:[#allocation10 + $0x28] sm:$0xff]   ;;  %v4140_v28 = vmov 1983009808   ;;  %v4402_v36 = vpack.i.b16 %v4142_v35, %v4142_v35  ;;  %vm864_vm1 = vcmask 257024  }
  0x7c   : > { %3055 = vmatpush3.bf16.msra.mxu0 %v3593_v0  ;;  %3070 = vmatprep.mubr.msk.bf16.mxu0 %vm4136_vm0, %v4135_v1  ;;  %v3599_v7 = vld [vmem:[#allocation9 + $0x20] sm:$0xff]   ;;  %v3601_v9 = vld [vmem:[#allocation9 + $0x18] sm:$0xff]   ;;  %v3603_v11 = vld [vmem:[#allocation9 + $0x10] sm:$0xff]   ;;  %v598_v29 = vunpack.c.l.s4 %v4140_v28  ;;  %v4141_v31 = vmov 1934713408   ;;  %v601_v34 = vshrl.u32 %v600_v30, 7 }
  0x7d   : > { %3075 = vmatpush3.bf16.msra.mxu1 %v3594_v2  ;;  %3056 = vmatprep.subr.bf16.mxu0 %v4135_v1  ;;  %v3600_v8 = vld [vmem:[#allocation10 + $0x20] sm:$0xff]   ;;  %v3602_v10 = vld [vmem:[#allocation10 + $0x18] sm:$0xff]   ;;  %v3604_v12 = vld [vmem:[#allocation10 + $0x10] sm:$0xff]   ;;  %v629_v32 = vunpack.c.l.s4 %v4141_v31 }
  0x7e   : > { %3076 = vmatprep.subr.bf16.mxu1 %v4135_v1  ;;  %3090 = vmatprep.mubr.msk.bf16.mxu1 %vm4136_vm0, %v4135_v1  ;;  %v3605_v13 = vld [vmem:[#allocation9 + $0x8] sm:$0xff]   ;;  %v3607_v15 = vld [vmem:[#allocation9] sm:$0xff]   ;;  %v3609_v17 = vld [vmem:[%s297_s21] sm:$0xff]   ;;  %v599_v33 = vunpack.c.0.s8 %v598_v29 }
  0x7f   : > { %v3606_v14 = vld [vmem:[#allocation10 + $0x8] sm:$0xff]   ;;  %v3608_v16 = vld [vmem:[#allocation10] sm:$0xff]   ;;  %v630_v39 = vunpack.c.0.s8 %v629_v32 }
  0x80   : > { %3057 = vmatpush3.bf16.msra.mxu0 %v3595_v3  ;;  %v4404_v40 = vsub.s32 %v599_v33, %v601_v34 }
  0x81   : > { %3077 = vmatpush3.bf16.msra.mxu1 %v3596_v4  ;;  %3058 = vmatprep.subr.bf16.mxu0 %v4135_v1  ;;  %v4407_v48 = vsub.s32 %v630_v39, %v601_v34 }
  0x82   : > { %3078 = vmatprep.subr.bf16.mxu1 %v4135_v1 }
  0x84   : > { %3059 = vmatpush3.bf16.msra.mxu0 %v3597_v5 }
  0x85   : > { %3079 = vmatpush3.bf16.msra.mxu1 %v3598_v6  ;;  %3060 = vmatprep.subr.bf16.mxu0 %v4135_v1 }
  0x86   : > { %3080 = vmatprep.subr.bf16.mxu1 %v4135_v1 }
  0x88   : > { %3061 = vmatpush3.bf16.msra.mxu0 %v3599_v7 }
  0x89   : > { %3081 = vmatpush3.bf16.msra.mxu1 %v3600_v8  ;;  %3062 = vmatprep.subr.bf16.mxu0 %v4135_v1 }
  0x8a   : > { %3082 = vmatprep.subr.bf16.mxu1 %v4135_v1 }
  0x8c   : > { %3063 = vmatpush3.bf16.msra.mxu0 %v3601_v9 }
  0x8d   : > { %3083 = vmatpush3.bf16.msra.mxu1 %v3602_v10  ;;  %3064 = vmatprep.subr.bf16.mxu0 %v4135_v1 }
  0x8e   : > { %3084 = vmatprep.subr.bf16.mxu1 %v4135_v1 }
  0x90   : > { %3065 = vmatpush3.bf16.msra.mxu0 %v3603_v11 }
  0x91   : > { %3085 = vmatpush3.bf16.msra.mxu1 %v3604_v12  ;;  %3066 = vmatprep.subr.bf16.mxu0 %v4135_v1 }
  0x92   : > { %3086 = vmatprep.subr.bf16.mxu1 %v4135_v1 }
  0x94   : > { %3067 = vmatpush3.bf16.msra.mxu0 %v3605_v13 }
  0x95   : > { %3087 = vmatpush3.bf16.msra.mxu1 %v3606_v14  ;;  %3068 = vmatprep.subr.bf16.mxu0 %v4135_v1 }
  0x96   : > { %3088 = vmatprep.subr.bf16.mxu1 %v4135_v1 }
  0x98   : > { %3069 = vmatpush3.bf16.msra.mxu0 %v3607_v15 }
  0x99   : > { %3089 = vmatpush3.bf16.msra.mxu1 %v3608_v16 }
  0x9b   : > { %3071 = vmatmul.mubr.bf16.vlgmr.msra.gmra.mxu0 %v3609_v17 }
  0x9c   : > { %3091 = vmatmul.mubr.bf16.vlgmr.msra.gmra.mxu1 %v3609_v17 }
 0x15b   : > { %v454_v18 = vpop.f32.mrf.mxu0 }
 0x15c   : > { %v559_v19 = vpop.f32.mrf.mxu1 }
 0x15d   : > { %v3072_v20 = vpop.f32.mrf.mxu0 }
 0x15e   : > { %v3092_v21 = vpop.f32.mrf.mxu1 }
 0x15f   : > { %v457_v22 = vpop.f32.mrf.mxu0 }
 0x160   : > { %v566_v23 = vpack.c.bf16 %v457_v22, %v454_v18  ;;  %v562_v24 = vpop.f32.mrf.mxu1 }
 0x161   : > { %v3073_v25 = vpop.f32.mrf.mxu0  ;;  %v873_v27 = vpack.c.bf16 %v562_v24, %v559_v19 }
 0x162   : > { %v3093_v26 = vpop.f32.mrf.mxu1  ;;  %572 = vrot.lane.b32.xlu1 %v566_v23, %s4137_s10  ;;  %568 = vrot.lane.b32.xlu0 %v566_v23, %s4138_s17  ;;  %v578_v42 = vshrl.u32 %v566_v23, 16 }
 0x163   : > { %v885_v46 = vshrl.u32 %v873_v27, 16 }
 0x166   : > { %875 = vrot.lane.b32.xlu1 %v873_v27, %s4138_s17  ;;  %570 = vrot.lane.b32.xlu0 %v566_v23, %s4139_s20 }
 0x16a   : > { %879 = vrot.lane.b32.xlu1 %v873_v27, %s4137_s10  ;;  %877 = vrot.lane.b32.xlu0 %v873_v27, %s4139_s20 }
 0x1d4   : > { %v573_v37 = vpop.permute.xlu1 %572  ;;  %v569_v38 = vpop.permute.xlu0 %568 }
 0x1d5   : > { %v576_v41 = vpack.i.b16 %v569_v38, %v566_v23  ;;  %v579_v43 = vshrl.u32 %v569_v38, 16  ;;  %v587_v50 = vshrl.u32 %v573_v37, 16 }
 0x1d7   : > { %v580_v44 = vpack.i.b16 %v579_v43, %v578_v42  ;;  %v596_v45 = vcombine.high %v576_v41, %v4402_v36  ;;  %v603_v51 = vrot.slane %v576_v41, %v4404_v40 }
 0x1d8   : > { %v876_v47 = vpop.permute.xlu1 %875  ;;  %v571_v49 = vpop.permute.xlu0 %570 }
 0x1d9   : > { %v662_v52 = vcombine.high %v580_v44, %v4402_v36  ;;  %v883_v53 = vpack.i.b16 %v876_v47, %v873_v27  ;;  %v610_v54 = vrot.slane %v596_v45, %v4404_v40  ;;  %v886_v55 = vshrl.u32 %v876_v47, 16 }
 0x1da   : > { %v584_v56 = vpack.i.b16 %v573_v37, %v571_v49  ;;  %v586_v57 = vshrl.u32 %v571_v49, 16  ;;  %v669_v58 = vrot.slane %v580_v44, %v4404_v40 }
 0x1db   : > { %v676_v59 = vrot.slane %v662_v52, %v4404_v40  ;;  %v897_v60 = vcombine.high %v883_v53, %v4402_v36  ;;  %v4416_v61 = vrot.slane %v883_v53, %v4404_v40  ;;  %v887_v62 = vpack.i.b16 %v886_v55, %v885_v46 }
 0x1dc   : > { %v588_v63 = vpack.i.b16 %v587_v50, %v586_v57  ;;  %v611_v0 = vcombine.high %v584_v56, %v4402_v36  ;;  %v618_v1 = vrot.slane %v584_v56, %v4404_v40  ;;  %v880_v2 = vpop.permute.xlu1 %879  ;;  %v878_v3 = vpop.permute.xlu0 %877 }
 0x1dd   : > { %v4421_v4 = vrot.slane %v897_v60, %v4404_v40  ;;  %v894_v5 = vshrl.u32 %v880_v2, 16  ;;  %v891_v6 = vpack.i.b16 %v880_v2, %v878_v3  ;;  %v893_v7 = vshrl.u32 %v878_v3, 16 }
 0x1de   : > { %v963_v8 = vcombine.high %v887_v62, %v4402_v36  ;;  %v4425_v9 = vrot.slane %v887_v62, %v4404_v40  ;;  %v625_v10 = vrot.slane %v611_v0, %v4404_v40  ;;  %v626_v11 = vcombine.low %v603_v51, %v618_v1 }
 0x1df   : > { %v627_v12 = vcombine.high %v603_v51, %v618_v1  ;;  %v677_v13 = vcombine.high %v588_v63, %v4402_v36  ;;  %v684_v14 = vrot.slane %v588_v63, %v4404_v40  ;;  %v895_v15 = vpack.i.b16 %v894_v5, %v893_v7 }
 0x1e0   : > { %v4431_v16 = vrot.slane %v963_v8, %v4404_v40  ;;  %v634_v17 = vrot.slane %v626_v11, %v4407_v48  ;;  %v642_v18 = vcombine.low %v610_v54, %v625_v10  ;;  %v643_v19 = vcombine.high %v610_v54, %v625_v10 }
 0x1e1   : > { %v641_v20 = vrot.slane %v627_v12, %v4407_v48  ;;  %v691_v21 = vrot.slane %v677_v13, %v4404_v40  ;;  %v692_v22 = vcombine.low %v669_v58, %v684_v14  ;;  %v693_v23 = vcombine.high %v669_v58, %v684_v14 }
 0x1e2   : > { %v650_v24 = vrot.slane %v642_v18, %v4407_v48  ;;  %v657_v25 = vrot.slane %v643_v19, %v4407_v48  ;;  %v912_v26 = vcombine.high %v891_v6, %v4402_v36  ;;  %v919_v27 = vrot.slane %v891_v6, %v4404_v40 }
 0x1e3   : > { %v700_v28 = vrot.slane %v692_v22, %v4407_v48  ;;  %v707_v29 = vrot.slane %v693_v23, %v4407_v48  ;;  %v708_v30 = vcombine.low %v676_v59, %v691_v21  ;;  %v709_v31 = vcombine.high %v676_v59, %v691_v21 }
 0x1e4   : > { %v728_v32 = vcombine.low %v634_v17, %v641_v20  ;;  %v2916_v33 = vcombine.high %v634_v17, %v641_v20  ;;  %v744_v34 = vcombine.low %v650_v24, %v657_v25  ;;  %v2917_v35 = vcombine.high %v650_v24, %v657_v25 }
 0x1e5   : > { %v716_v37 = vrot.slane %v708_v30, %v4407_v48  ;;  %v723_v38 = vrot.slane %v709_v31, %v4407_v48  ;;  %v778_v39 = vcombine.low %v700_v28, %v707_v29  ;;  %v2918_v41 = vcombine.high %v700_v28, %v707_v29 }
 0x1e6   : > { %v735_v42 = vrot.slane %v728_v32, %v4404_v40  ;;  %v743_v43 = vrot.slane %v2916_v33, %v4404_v40  ;;  %v751_v44 = vrot.slane %v744_v34, %v4404_v40  ;;  %v759_v45 = vrot.slane %v2917_v35, %v4404_v40 }
 0x1e7   : > { %v785_v46 = vrot.slane %v778_v39, %v4404_v40  ;;  %v793_v47 = vrot.slane %v2918_v41, %v4404_v40  ;;  %v794_v49 = vcombine.low %v716_v37, %v723_v38  ;;  %v2919_v50 = vcombine.high %v716_v37, %v723_v38 }
 0x1e8   : > { %v760_v51 = vcombine.low %v735_v42, %v743_v43  ;;  %v768_v52 = vcombine.low %v751_v44, %v759_v45  ;;  %v926_v53 = vrot.slane %v912_v26, %v4404_v40  ;;  %v927_v54 = vcombine.low %v4416_v61, %v919_v27 }
 0x1e9   : > { %v801_v55 = vrot.slane %v794_v49, %v4404_v40  ;;  %v809_v56 = vrot.slane %v2919_v50, %v4404_v40  ;;  %v810_v57 = vcombine.low %v785_v46, %v793_v47  ;;  %v928_v58 = vcombine.high %v4416_v61, %v919_v27 }
 0x1ea   : > { %v767_v59 = vrot.slane %v760_v51, %v4407_v48  ;;  %v775_v60 = vrot.slane %v768_v52, %v4407_v48  ;;  %v935_v62 = vrot.slane %v927_v54, %v4407_v48  ;;  %v943_v63 = vcombine.low %v4421_v4, %v926_v53 }
 0x1eb   : > { %v817_v0 = vrot.slane %v810_v57, %v4407_v48  ;;  %v818_v1 = vcombine.low %v801_v55, %v809_v56  ;;  %v942_v2 = vrot.slane %v928_v58, %v4407_v48  ;;  %v944_v3 = vcombine.high %v4421_v4, %v926_v53 }
 0x1ec   : > { %v776_v5 = vcombine.low %v767_v59, %v775_v60  ;;  %v777_v6 = vcombine.high %v767_v59, %v775_v60  ;;  %v951_v61 = vrot.slane %v943_v63, %v4407_v48  ;;  %v978_v7 = vcombine.high %v895_v15, %v4402_v36 }
 0x1ed   : > { %v825_v8 = vrot.slane %v818_v1, %v4407_v48  ;;  %v958_v10 = vrot.slane %v944_v3, %v4407_v48  ;;  %v985_v11 = vrot.slane %v895_v15, %v4404_v40  ;;  %v1029_v12 = vcombine.low %v935_v62, %v942_v2 }
 0x1ee   : > { %v831_v13 = vshrl.u32 %v776_v5, 16  ;;  %v837_v14 = vshrl.u32 %v777_v6, 16  ;;  %v992_v17 = vrot.slane %v978_v7, %v4404_v40  ;;  %v2928_v18 = vcombine.high %v935_v62, %v942_v2 }
 0x1ef   : > { %v826_v19 = vcombine.low %v817_v0, %v825_v8  ;;  %v827_v4 = vcombine.high %v817_v0, %v825_v8  ;;  %v993_v20 = vcombine.low %v4425_v9, %v985_v11  ;;  %v994_v21 = vcombine.high %v4425_v9, %v985_v11 }
 0x1f0   : > { %v1009_v36 = vcombine.low %v4431_v16, %v992_v17  ;;  %v1010_v22 = vcombine.high %v4431_v16, %v992_v17  ;;  %v1036_v23 = vrot.slane %v1029_v12, %v4404_v40  ;;  %v1044_v15 = vrot.slane %v2928_v18, %v4404_v40 }
 0x1f1   : > { %v830_v24 = vpack.i.b16 %v826_v19, %v776_v5  ;;  %v832_v25 = vshrl.u32 %v826_v19, 16  ;;  %v836_v26 = vpack.i.b16 %v827_v4, %v777_v6  ;;  %v838_v27 = vshrl.u32 %v827_v4, 16 }
 0x1f2   : > { %v1001_v28 = vrot.slane %v993_v20, %v4407_v48  ;;  %v1008_v29 = vrot.slane %v994_v21, %v4407_v48  ;;  %v1017_v30 = vrot.slane %v1009_v36, %v4407_v48  ;;  %v1024_v9 = vrot.slane %v1010_v22, %v4407_v48 }
 0x1f3   : > { %v833_v31 = vpack.i.b16 %v832_v25, %v831_v13  ;;  %v839_v32 = vpack.i.b16 %v838_v27, %v837_v14  ;;  %v2920_v33 = vcombine.low %v830_v24, %v830_v24  ;;  %v2921_v16 = vcombine.high %v830_v24, %v830_v24 }
 0x1f4   : > { %v2924_v34 = vcombine.low %v836_v26, %v836_v26  ;;  %v2925_v35 = vcombine.high %v836_v26, %v836_v26  ;;  %v1045_v37 = vcombine.low %v951_v61, %v958_v10  ;;  %v2929_v38 = vcombine.high %v951_v61, %v958_v10 }
 0x1f5   : > { %v2922_v39 = vcombine.low %v833_v31, %v833_v31  ;;  %v2923_v41 = vcombine.high %v833_v31, %v833_v31  ;;  %v2926_v42 = vcombine.low %v839_v32, %v839_v32  ;;  %v2927_v43 = vcombine.high %v839_v32, %v839_v32  ;;  %865 = vst.msk [vmem:[#allocation2] sm:$0xf] %vm864_vm1, %v2920_v33 }
 0x1f6   : > { %866 = vst.msk [vmem:[#allocation2 + $0x4] sm:$0xf] %vm864_vm1, %v2921_v16  ;;  %869 = vst.msk [vmem:[#allocation2 + $0x10] sm:$0xf] %vm864_vm1, %v2924_v34  ;;  %v1052_v44 = vrot.slane %v1045_v37, %v4404_v40  ;;  %v1060_v45 = vrot.slane %v2929_v38, %v4404_v40  ;;  %v1061_v46 = vcombine.low %v1036_v23, %v1044_v15 }
 0x1f7   : > { %870 = vst.msk [vmem:[#allocation2 + $0x14] sm:$0xf] %vm864_vm1, %v2925_v35  ;;  %v1079_v47 = vcombine.low %v1001_v28, %v1008_v29  ;;  %867 = vst.msk [vmem:[#allocation2 + $0x8] sm:$0xf] %vm864_vm1, %v2922_v39  ;;  %v2930_v49 = vcombine.high %v1001_v28, %v1008_v29  ;;  %v1095_v50 = vcombine.low %v1017_v30, %v1024_v9 }
 0x1f8   : > { %868 = vst.msk [vmem:[#allocation2 + $0xc] sm:$0xf] %vm864_vm1, %v2923_v41  ;;  %871 = vst.msk [vmem:[#allocation2 + $0x18] sm:$0xf] %vm864_vm1, %v2926_v42  ;;  %v2931_v51 = vcombine.high %v1017_v30, %v1024_v9  ;;  %v1069_v52 = vcombine.low %v1052_v44, %v1060_v45  ;;  %v1068_v57 = vrot.slane %v1061_v46, %v4407_v48 }
 0x1f9   : > { %872 = vst.msk [vmem:[#allocation2 + $0x1c] sm:$0xf] %vm864_vm1, %v2927_v43  ;;  %v1086_v53 = vrot.slane %v1079_v47, %v4404_v40  ;;  %v1094_v54 = vrot.slane %v2930_v49, %v4404_v40  ;;  %v1102_v55 = vrot.slane %v1095_v50, %v4404_v40 }
 0x1fa   : > { %v1110_v56 = vrot.slane %v2931_v51, %v4404_v40  ;;  %v1076_v58 = vrot.slane %v1069_v52, %v4407_v48 }
 0x1fb   : > { %v1111_v59 = vcombine.low %v1086_v53, %v1094_v54 }
 0x1fc   : > { %v1119_v60 = vcombine.low %v1102_v55, %v1110_v56  ;;  %v1077_v62 = vcombine.low %v1068_v57, %v1076_v58  ;;  %v1078_v63 = vcombine.high %v1068_v57, %v1076_v58 }
 0x1fd   : > { %v1118_v0 = vrot.slane %v1111_v59, %v4407_v48 }
 0x1fe   : > { %v1126_v1 = vrot.slane %v1119_v60, %v4407_v48  ;;  %v1132_v5 = vshrl.u32 %v1077_v62, 16  ;;  %v1138_v6 = vshrl.u32 %v1078_v63, 16 }
 0x200   : > { %v1127_v2 = vcombine.low %v1118_v0, %v1126_v1  ;;  %v1128_v3 = vcombine.high %v1118_v0, %v1126_v1 }
 0x202   : > { %v1131_v61 = vpack.i.b16 %v1127_v2, %v1077_v62  ;;  %v1133_v7 = vshrl.u32 %v1127_v2, 16  ;;  %v1137_v8 = vpack.i.b16 %v1128_v3, %v1078_v63  ;;  %v1139_v40 = vshrl.u32 %v1128_v3, 16 }
 0x204   : > { %v1134_v10 = vpack.i.b16 %v1133_v7, %v1132_v5  ;;  %v1140_v11 = vpack.i.b16 %v1139_v40, %v1138_v6  ;;  %v2932_v12 = vcombine.low %v1131_v61, %v1131_v61  ;;  %v2933_v13 = vcombine.high %v1131_v61, %v1131_v61 }
 0x205   : > { %v2936_v14 = vcombine.low %v1137_v8, %v1137_v8  ;;  %v2937_v17 = vcombine.high %v1137_v8, %v1137_v8 }
 0x206   : > { %v2934_v18 = vcombine.low %v1134_v10, %v1134_v10  ;;  %v2935_v19 = vcombine.high %v1134_v10, %v1134_v10  ;;  %v2938_v4 = vcombine.low %v1140_v11, %v1140_v11  ;;  %v2939_v20 = vcombine.high %v1140_v11, %v1140_v11  ;;  %1165 = vst.msk [vmem:[#allocation3] sm:$0xf] %vm864_vm1, %v2932_v12 }
 0x207   : > { %1166 = vst.msk [vmem:[#allocation3 + $0x4] sm:$0xf] %vm864_vm1, %v2933_v13  ;;  %1169 = vst.msk [vmem:[#allocation3 + $0x10] sm:$0xf] %vm864_vm1, %v2936_v14 }
 0x208   : > { %1170 = vst.msk [vmem:[#allocation3 + $0x14] sm:$0xf] %vm864_vm1, %v2937_v17  ;;  %1167 = vst.msk [vmem:[#allocation3 + $0x8] sm:$0xf] %vm864_vm1, %v2934_v18 }
 0x209   : > { %1168 = vst.msk [vmem:[#allocation3 + $0xc] sm:$0xf] %vm864_vm1, %v2935_v19  ;;  %1171 = vst.msk [vmem:[#allocation3 + $0x18] sm:$0xf] %vm864_vm1, %v2938_v4 }
 0x20a   : > { %1172 = vst.msk [vmem:[#allocation3 + $0x1c] sm:$0xf] %vm864_vm1, %v2939_v20 }
 0x20b PF: > { %v3610_v48 = vld [vmem:[#allocation7 + $0x38] sm:$0xff]   ;;  %v4143_v21 = vmov 0.0   ;;  %v3611_v36 = vld [vmem:[#allocation7 + $0x30] sm:$0xff]   ;;  %vm4144_vm2 = vmmov 0   ;;  %v3612_v22 = vld [vmem:[#allocation7 + $0x28] sm:$0xff]   ;;  %s1173_s15 = sshra.s32 %s2897_s6, 3  ;;  %v1293_v16 = vlaneseq }
 0x20c   : > { %3094 = vmatprep.subr.bf16.mxu0 %v4143_v21  ;;  %3110 = vmatprep.mubr.msk.bf16.mxu0 %vm4144_vm2, %v4143_v21  ;;  %v3613_v23 = vld [vmem:[#allocation7 + $0x20] sm:$0xff]   ;;  %v3614_v15 = vld [vmem:[#allocation7 + $0x18] sm:$0xff]   ;;  %v3615_v24 = vld [vmem:[#allocation7 + $0x10] sm:$0xff]   ;;  %s4515_s9 = sshll.u32 %s1173_s15, 2  ;;  %s4145_s3 = smov 32   ;;  %v4150_v57 = vmov 0  }
 0x20d   : > { %3095 = vmatpush3.bf16.msra.mxu0 %v3610_v48  ;;  %v3616_v25 = vld [vmem:[#allocation7 + $0x8] sm:$0xff]   ;;  %v3617_v26 = vld [vmem:[#allocation7] sm:$0xff]   ;;  %s1176_s13 = scalar_lea.vmem %s297_s21, %s4515_s9 [#allocation4]  ;;  %s4146_s4 = smov 96   ;;  %v4148_v32 = vmov 1983009808   ;;  %v4525_v38 = vshrl.u32 %v1293_v16, 7 }
 0x20e   : > { %3096 = vmatprep.subr.bf16.mxu0 %v4143_v21  ;;  %v1177_v27 = vld [vmem:[%s1176_s13] sm:$0xf]  ;;  %s4147_s29 = smov 64   ;;  %v1291_v33 = vunpack.c.l.s4 %v4148_v32  ;;  %v4149_v34 = vmov 1934713408   ;;  %p2949_p1 = scmp.le.s32.totalorder %s4010_s27, 0 }
 0x20f   : > { %v1308_v35 = vunpack.c.l.s4 %v4149_v34  ;;  %s4610_s24 = smov (!%p2949_p1), 0  }
 0x210   : > { %v1292_v37 = vunpack.c.0.s8 %v1291_v33 }
 0x211   : > { %3097 = vmatpush3.bf16.msra.mxu0 %v3611_v36  ;;  %v1309_v39 = vunpack.c.0.s8 %v1308_v35 }
 0x212   : > { %3098 = vmatprep.subr.bf16.mxu0 %v4143_v21  ;;  %v4528_v41 = vsub.s32 %v1292_v37, %v4525_v38 }
 0x213   : > { %v4532_v45 = vsub.s32 %v1309_v39, %v4525_v38  ;;  %v4562_v39 = vmov 0.0  }
 0x215   : > { %3099 = vmatpush3.bf16.msra.mxu0 %v3612_v22 }
 0x216   : > { %3100 = vmatprep.subr.bf16.mxu0 %v4143_v21 }
 0x219   : > { %3101 = vmatpush3.bf16.msra.mxu0 %v3613_v23 }
 0x21a   : > { %3102 = vmatprep.subr.bf16.mxu0 %v4143_v21 }
 0x21d   : > { %3103 = vmatpush3.bf16.msra.mxu0 %v3614_v15 }
 0x21e   : > { %3104 = vmatprep.subr.bf16.mxu0 %v4143_v21 }
 0x221   : > { %3105 = vmatpush3.bf16.msra.mxu0 %v3615_v24 }
 0x222   : > { %3106 = vmatprep.subr.bf16.mxu0 %v4143_v21 }
 0x225   : > { %3107 = vmatpush3.bf16.msra.mxu0 %v3616_v25 }
 0x226   : > { %3108 = vmatprep.subr.bf16.mxu0 %v4143_v21 }
 0x229   : > { %3109 = vmatpush3.bf16.msra.mxu0 %v3617_v26 }
 0x22c   : > { %3111 = vmatmul.mubr.bf16.vlgmr.msra.gmra.mxu0 %v1177_v27 }
 0x2ec   : > { %v1276_v28 = vpop.f32.mrf.mxu0 }
 0x2ed   : > { %v1282_v29 = vpack.c.bf16 %v1276_v28, %v1276_v28 }
 0x2ee   : > { %v3112_v30 = vpop.f32.mrf.mxu0 }
 0x2ef   : > { %1288 = vrot.lane.b32.xlu1 %v1282_v29, %s4145_s3  ;;  %1284 = vrot.lane.b32.xlu0 %v1282_v29, %s4146_s4  ;;  %v1296_v53 = vrot.slane %v1282_v29, %v4528_v41 }
 0x2f0   : > { %v1279_v9 = vpop.f32.mrf.mxu0 }
 0x2f2   : > { %v3113_v31 = vpop.f32.mrf.mxu0 }
 0x2f3   : > { %1286 = vrot.lane.b32.xlu0 %v1282_v29, %s4147_s29 }
 0x361   : > { %v1289_v42 = vpop.permute.xlu1 %1288  ;;  %v1285_v43 = vpop.permute.xlu0 %1284 }
 0x362   : > { %v1338_v44 = vrot.slane %v1289_v42, %v4528_v41  ;;  %v1330_v46 = vrot.slane %v1285_v43, %v4528_v41  ;;  %v4564_v42 = vmov 0.0   ;;  %v4566_v43 = vmov 0.0  }
 0x364   : > { %v1339_v47 = vcombine.low %v1330_v46, %v1338_v44  ;;  %v1340_v49 = vcombine.high %v1330_v46, %v1338_v44  ;;  %v4568_v44 = vmov 0.0   ;;  %v4570_v46 = vmov 0.0  }
 0x365   : > { %v1287_v50 = vpop.permute.xlu0 %1286 }
 0x366   : > { %v1347_v51 = vrot.slane %v1339_v47, %v4532_v45  ;;  %v1304_v52 = vrot.slane %v1287_v50, %v4528_v41  ;;  %v1354_v54 = vrot.slane %v1340_v49, %v4532_v45  ;;  %v4572_v47 = vmov 0.0  }
 0x367   : > { %v4574_v49 = vmov 0.0   ;;  %v4576_v50 = vmov 0.0  }
 0x368   : > { %v1305_v55 = vcombine.low %v1296_v53, %v1304_v52  ;;  %v1306_v56 = vcombine.high %v1296_v53, %v1304_v52  ;;  %v1355_v58 = vcombine.high %v1347_v51, %v4150_v57  ;;  %v1356_v62 = vcombine.high %v1354_v54, %v4150_v57 }
 0x369   : > { %v1362_v63 = vshrl.u32 %v1347_v51, 16  ;;  %v1378_v6 = vshrl.u32 %v1354_v54, 16  ;;  %v4580_v52 = vmov -inf   ;;  %v4582_v53 = vmov -inf  }
 0x36a   : > { %v1313_v59 = vrot.slane %v1305_v55, %v4532_v45  ;;  %v1320_v60 = vrot.slane %v1306_v56, %v4532_v45  ;;  %v1370_v5 = vshrl.u32 %v1355_v58, 16  ;;  %v1386_v12 = vshrl.u32 %v1356_v62, 16 }
 0x36c   : > { %v1321_v0 = vcombine.high %v1313_v59, %v4150_v57  ;;  %v1322_v1 = vcombine.high %v1320_v60, %v4150_v57  ;;  %v1359_v2 = vpack.i.b16 %v1347_v51, %v1313_v59  ;;  %v1361_v3 = vshrl.u32 %v1313_v59, 16 }
 0x36d   : > { %v1375_v61 = vpack.i.b16 %v1354_v54, %v1320_v60  ;;  %v1377_v7 = vshrl.u32 %v1320_v60, 16  ;;  %v4578_v51 = vmov -inf   ;;  %v4584_v54 = vmov -inf  }
 0x36e   : > { %v1363_v8 = vpack.i.b16 %v1362_v63, %v1361_v3  ;;  %v1367_v40 = vpack.i.b16 %v1355_v58, %v1321_v0  ;;  %v1369_v10 = vshrl.u32 %v1321_v0, 16  ;;  %v1383_v11 = vpack.i.b16 %v1356_v62, %v1322_v1 }
 0x36f   : > { %v1379_v13 = vpack.i.b16 %v1378_v6, %v1377_v7  ;;  %v1385_v14 = vshrl.u32 %v1322_v1, 16  ;;  %v1389_v17 = vcombine.low %v1359_v2, %v1375_v61 }
 0x370   : > { %v1371_v18 = vpack.i.b16 %v1370_v5, %v1369_v10  ;;  %v1397_v19 = vcombine.low %v1367_v40, %v1383_v11 }
 0x371   : > { %v1387_v4 = vpack.i.b16 %v1386_v12, %v1385_v14  ;;  %v1414_v20 = vcombine.low %v1363_v8, %v1379_v13  ;;  %v1396_v48 = vrot.slane %v1389_v17, %v4528_v41 }
 0x372   : > { %v1404_v36 = vrot.slane %v1397_v19, %v4528_v41 }
 0x373   : > { %v1422_v22 = vcombine.low %v1371_v18, %v1387_v4  ;;  %v1421_v15 = vrot.slane %v1414_v20, %v4528_v41 }
 0x374   : > { %v1405_v23 = vcombine.low %v1396_v48, %v1404_v36 }
 0x375   : > { %v1429_v24 = vrot.slane %v1422_v22, %v4528_v41 }
 0x376   : > { %v1412_v25 = vrot.slane %v1405_v23, %v4532_v45 }
 0x377   : > { %v1430_v26 = vcombine.low %v1421_v15, %v1429_v24 }
 0x378   : > { %v1413_v27 = vcombine.high %v1412_v25, %v4150_v57  ;;  %v1442_v9 = vshrl.u32 %v1412_v25, 16 }
 0x379   : > { %v1437_v28 = vrot.slane %v1430_v26, %v4532_v45 }
 0x37a   : > { %v1448_v34 = vshrl.u32 %v1413_v27, 16 }
 0x37b   : > { %v1438_v29 = vcombine.high %v1437_v28, %v4150_v57  ;;  %v4553_v30 = vpack.i.b16 %v1437_v28, %v1412_v25  ;;  %v1443_v31 = vshrl.u32 %v1437_v28, 16  ;;  %2781 = sbr.rel (%p2949_p1) target bundleno = 1477 (0x5c5), region = 115 }
 0x37d   : > { %v4555_v32 = vpack.i.b16 %v1443_v31, %v1442_v9  ;;  %v4557_v33 = vpack.i.b16 %v1438_v29, %v1413_v27  ;;  %v1449_v35 = vshrl.u32 %v1438_v29, 16 }
 0x37f   : > { %v4559_v37 = vpack.i.b16 %v1449_v35, %v1448_v34 }
 0x380   : > { %v4586_v55 = vmov 0.0   ;;  %v4588_v56 = vmov 0.0   ;;  %v4590_v58 = vmov 0.0   ;;  %v4592_v59 = vmov 0.0  }
 0x381   : > { %v4594_v60 = vmov 0.0   ;;  %v4596_v62 = vmov 0.0   ;;  %v4598_v63 = vmov 0.0   ;;  %v4600_v0 = vmov 0.0  }
 0x382   : > { %v4602_v1 = vmov -inf   ;;  %v4604_v2 = vmov -inf   ;;  %v4606_v3 = vmov -inf   ;;  %v4608_v5 = vmov -inf  }
 0x383 LB: >> { %v4151_v6 = vmov 0.0   ;;  %s2950_s1 = sshll.u32 %s4078_s24, 3  ;;  %vm4152_vm3 = vmmov 0   ;;  %vm1484_vm4 = vcmask 261120   ;;  %vm1669_vm5 = vcmask 64512   ;;  %s1454_s24 = sadd.s32 1, %s4078_s24   ;;  %s4078_s24 = sphi %s4610_s24, %s1454_s24   ;;  %v4074_v5 = vphi %v4608_v5, %v5085_v5   ;;  %v4070_v3 = vphi %v4606_v3, %v5084_v3   ;;  %v4066_v2 = vphi %v4604_v2, %v5083_v2   ;;  %v4062_v1 = vphi %v4602_v1, %v5082_v1   ;;  %v4058_v0 = vphi %v4600_v0, %v5081_v0   ;;  %v4054_v63 = vphi %v4598_v63, %v5080_v63   ;;  %v4050_v62 = vphi %v4596_v62, %v5079_v62   ;;  %v4046_v60 = vphi %v4594_v60, %v5078_v60   ;;  %v4042_v59 = vphi %v4592_v59, %v5077_v59   ;;  %v4038_v58 = vphi %v4590_v58, %v5076_v58   ;;  %v4034_v56 = vphi %v4588_v56, %v5075_v56   ;;  %v4030_v55 = vphi %v4586_v55, %v5074_v55  }
 0x384   : >> { %3114 = vmatprep.subr.bf16.mxu0 %v4151_v6  ;;  %3120 = vmatprep.subr.bf16.mxu1 %v4151_v6  ;;  %s4658_s19 = sshra.s32 %s2950_s1, 3  ;;  %vm1741_vm6 = vcmask 1043456   ;;  %p4741_p11 = scmp.ge.s32.totalorder %s1454_s24, %s4010_s27 }
 0x385   : >> { %3116 = vmatprep.mubr.msk.bf16.mxu0 %vm4152_vm3, %v4151_v6  ;;  %3122 = vmatprep.mubr.msk.bf16.mxu1 %vm4152_vm3, %v4151_v6  ;;  %s2951_s18 = sshll.u32 %s4658_s19, 2 }
 0x386   : >> { %s1473_s21 = scalar_lea.vmem [#allocation2], %s2951_s18  ;;  %s1479_s6 = scalar_lea.vmem [#allocation3], %s2951_s18 }
 0x387   : >> { %v1474_v61 = vld [vmem:[%s1473_s21] sm:$0xf]  ;;  %v1475_v7 = vld [vmem:[%s1473_s21 + $0x8] sm:$0xf]  ;;  %v1476_v10 = vld [vmem:[%s1473_s21 + $0x10] sm:$0xf] }
 0x388   : >> { %v1489_v8 = vsel %vm1484_vm4, %v1474_v61, 0  ;;  %v1535_v40 = vsel %vm1484_vm4, %v1475_v7, 0  ;;  %v1477_v11 = vld [vmem:[%s1473_s21 + $0x18] sm:$0xf]  ;;  %v1581_v12 = vsel %vm1484_vm4, %v1476_v10, 0 }
 0x389   : >> { %3115 = vmatpush3.bf16.xpose.msra.mxu0 %v1489_v8  ;;  %3121 = vmatpush3.bf16.xpose.msra.mxu1 %v1535_v40  ;;  %v1627_v13 = vsel %vm1484_vm4, %v1477_v11, 0  ;;  %v1480_v35 = vld [vmem:[%s1479_s6] sm:$0xf]  ;;  %v1481_v42 = vld [vmem:[%s1479_s6 + $0x8] sm:$0xf] }
 0x38a   : >> { %3126 = vmatprep.subr.bf16.mxu0 %v4151_v6  ;;  %3132 = vmatprep.subr.bf16.mxu1 %v4151_v6  ;;  %v1743_v39 = vsel %vm1741_vm6, %v1480_v35, 0  ;;  %v1789_v43 = vsel %vm1741_vm6, %v1481_v42, 0  ;;  %v1482_v44 = vld [vmem:[%s1479_s6 + $0x10] sm:$0xf]  ;;  %v1483_v47 = vld [vmem:[%s1479_s6 + $0x18] sm:$0xf] }
 0x38b   : >> { %v1835_v46 = vsel %vm1741_vm6, %v1482_v44, 0  ;;  %v1881_v49 = vsel %vm1741_vm6, %v1483_v47, 0 }
 0x390   : >> { %3117 = vmatmul.mubr.msk.bf16.vlgmr.msra.gmra.mxu0 %vm1484_vm4, %v4553_v30  ;;  %3123 = vmatmul.mubr.msk.bf16.vlgmr.msra.gmra.mxu1 %vm1484_vm4, %v4555_v32 }
 0x391   : >> { %3127 = vmatpush3.bf16.xpose.msra.mxu0 %v1581_v12  ;;  %3133 = vmatpush3.bf16.xpose.msra.mxu1 %v1627_v13 }
 0x392   : >> { %3128 = vmatprep.mubr.msk.bf16.mxu0 %vm4152_vm3, %v4151_v6  ;;  %3134 = vmatprep.mubr.msk.bf16.mxu1 %vm4152_vm3, %v4151_v6 }
 0x393   : >> { %3138 = vmatprep.subr.bf16.mxu0 %v4151_v6  ;;  %3144 = vmatprep.subr.bf16.mxu1 %v4151_v6 }
 0x398   : >> { %3129 = vmatmul.mubr.msk.bf16.vlgmr.msra.gmra.mxu0 %vm1484_vm4, %v4557_v33  ;;  %3135 = vmatmul.mubr.msk.bf16.vlgmr.msra.gmra.mxu1 %vm1484_vm4, %v4559_v37 }
 0x399   : >> { %3140 = vmatprep.mubr.msk.bf16.mxu0 %vm4152_vm3, %v4151_v6  ;;  %3146 = vmatprep.mubr.msk.bf16.mxu1 %vm4152_vm3, %v4151_v6 }
 0x39a   : >> { %3139 = vmatpush3.bf16.msra.mxu0 %v1743_v39  ;;  %3145 = vmatpush3.bf16.msra.mxu1 %v1789_v43 }
 0x39b   : >> { %3150 = vmatprep.subr.bf16.mxu0 %v4151_v6  ;;  %3156 = vmatprep.subr.bf16.mxu1 %v4151_v6 }
 0x450   : >> { %v1525_v14 = vpop.f32.mrf.mxu0  ;;  %v1571_v17 = vpop.f32.mrf.mxu1 }
 0x451   : >> { %v1670_v18 = vsel %vm1669_vm5, %v1525_v14, -inf  ;;  %v1673_v20 = vsel %vm1669_vm5, %v1571_v17, -inf }
 0x452   : >> { %v3124_v19 = vpop.f32.mrf.mxu1  ;;  %1671 = vmax.xlane.f32.xlu0 %v1670_v18  ;;  %v3118_v4 = vpop.f32.mrf.mxu0 }
 0x454   : >> { %v1528_v48 = vpop.f32.mrf.mxu0  ;;  %v1574_v36 = vpop.f32.mrf.mxu1 }
 0x456   : >> { %v3125_v22 = vpop.f32.mrf.mxu1  ;;  %1674 = vmax.xlane.f32.xlu0 %v1673_v20  ;;  %v3119_v23 = vpop.f32.mrf.mxu0 }
 0x458   : >> { %v1617_v15 = vpop.f32.mrf.mxu0  ;;  %v1663_v24 = vpop.f32.mrf.mxu1 }
 0x459   : >> { %v1676_v25 = vsel %vm1669_vm5, %v1617_v15, -inf  ;;  %v1679_v28 = vsel %vm1669_vm5, %v1663_v24, -inf }
 0x45a   : >> { %v3136_v26 = vpop.f32.mrf.mxu1  ;;  %1677 = vmax.xlane.f32.xlu1 %v1676_v25  ;;  %v3130_v27 = vpop.f32.mrf.mxu0 }
 0x45c   : >> { %v1620_v29 = vpop.f32.mrf.mxu0  ;;  %v1666_v9 = vpop.f32.mrf.mxu1 }
 0x45e   : >> { %v3137_v31 = vpop.f32.mrf.mxu1  ;;  %1680 = vmax.xlane.f32.xlu1 %v1679_v28  ;;  %v3131_v34 = vpop.f32.mrf.mxu0 }
 0x4db   : >> { %v1672_v50 = vpop.xlane.xlu0 %1671 }
 0x4dc   : >> { %v4696_v51 = vmax.f32 %v4074_v5, %v1672_v50  }
 0x4de   : >> { %v5072_v54 = vmov %v4696_v51 }
 0x4df   : >> { %v1686_v52 = vsub.f32 %v4074_v5, %v5072_v54  ;;  %v1698_v53 = vsub.f32 %v1525_v14, %v5072_v54  ;;  %v1675_v61 = vpop.xlane.xlu0 %1674 }
 0x4e0   : >> { %v4702_v8 = vmax.f32 %v4070_v3, %v1675_v61  }
 0x4e1   : >> { %v1702_v7 = vmul.f32 1.442695, %v1698_v53  ;;  %v1690_v29 = vmul.f32 1.442695, %v1686_v52 }
 0x4e2   : >> { %v1687_v40 = vsub.f32 %v4070_v3, %v4702_v8  ;;  %v1699_v10 = vsub.f32 %v1571_v17, %v4702_v8 }
 0x4e3   : >> { %3618 = vpow2.f32 %v1702_v7  ;;  %v1678_v11 = vpop.xlane.xlu1 %1677 }
 0x4e4   : >> { %v1704_v12 = vmul.f32 1.442695, %v1699_v10  ;;  %v4708_v13 = vmax.f32 %v4066_v2, %v1678_v11   ;;  %v1692_v9 = vmul.f32 1.442695, %v1687_v40 }
 0x4e6   : >> { %v1688_v5 = vsub.f32 %v4066_v2, %v4708_v13  ;;  %v1700_v14 = vsub.f32 %v1617_v15, %v4708_v13  ;;  %3620 = vpow2.f32 %v1704_v12 }
 0x4e7   : >> { %v1681_v18 = vpop.xlane.xlu1 %1680 }
 0x4e8   : >> { %v1706_v19 = vmul.f32 1.442695, %v1700_v14  ;;  %v4714_v4 = vmax.f32 %v4062_v1, %v1681_v18   ;;  %v1694_v31 = vmul.f32 1.442695, %v1688_v5 }
 0x4ea   : >> { %v1689_v3 = vsub.f32 %v4062_v1, %v4714_v4  ;;  %v1701_v17 = vsub.f32 %v1663_v24, %v4714_v4  ;;  %3622 = vpow2.f32 %v1706_v19 }
 0x4ec   : >> { %v1708_v20 = vmul.f32 1.442695, %v1701_v17 }
 0x4ee   : >> { %3624 = vpow2.f32 %v1708_v20 }
 0x4ef   : >> { %3626 = vpow2.f32 %v1690_v29 }
 0x4f0   : >> { %v3619_v48 = vpop.eup %3618  ;;  %3628 = vpow2.f32 %v1692_v9 }
 0x4f1   : >> { %v1714_v36 = vsel %vm1669_vm5, %v3619_v48, 0.0  ;;  %v1734_v2 = vpack.c.bf16 %v3619_v48, %v3619_v48  ;;  %3630 = vpow2.f32 %v1694_v31 }
 0x4f2   : >> { %1715 = vadd.xlane.f32.xlu0 %v1714_v36 }
 0x4f3   : >> { %3141 = vmatmul.mubr.msk.bf16.vlgmr.msra.gmra.mxu0 %vm1669_vm5, %v1734_v2  ;;  %v3621_v22 = vpop.eup %3620 }
 0x4f4   : >> { %3151 = vmatpush3.bf16.msra.mxu0 %v1835_v46  ;;  %3152 = vmatprep.mubr.msk.bf16.mxu0 %vm4152_vm3, %v4151_v6  ;;  %v1717_v23 = vsel %vm1669_vm5, %v3621_v22, 0.0  ;;  %v1735_v1 = vpack.c.bf16 %v3621_v22, %v3621_v22 }
 0x4f5   : >> { %1718 = vadd.xlane.f32.xlu1 %v1717_v23 }
 0x4f6   : >> { %3147 = vmatmul.mubr.msk.bf16.vlgmr.msra.gmra.mxu1 %vm1669_vm5, %v1735_v1 }
 0x4f7   : >> { %v3623_v15 = vpop.eup %3622  ;;  %3157 = vmatpush3.bf16.msra.mxu1 %v1881_v49  ;;  %3158 = vmatprep.mubr.msk.bf16.mxu1 %vm4152_vm3, %v4151_v6  ;;  %v1696_v6 = vmul.f32 1.442695, %v1689_v3 }
 0x4f8   : >> { %v1720_v24 = vsel %vm1669_vm5, %v3623_v15, 0.0  ;;  %v1736_v25 = vpack.c.bf16 %v3623_v15, %v3623_v15 }
 0x4f9   : >> { %1721 = vadd.xlane.f32.xlu0 %v1720_v24  ;;  %3632 = vpow2.f32 %v1696_v6 }
 0x4fb   : >> { %3153 = vmatmul.mubr.msk.bf16.vlgmr.msra.gmra.mxu0 %vm1669_vm5, %v1736_v25  ;;  %v3625_v26 = vpop.eup %3624 }
 0x4fc   : >> { %v1723_v27 = vsel %vm1669_vm5, %v3625_v26, 0.0  ;;  %v1737_v28 = vpack.c.bf16 %v3625_v26, %v3625_v26  ;;  %v3627_v34 = vpop.eup %3626 }
 0x4fd   : >> { %1724 = vadd.xlane.f32.xlu1 %v1723_v27  ;;  %v1710_v35 = vmul.f32 %v4058_v0, %v3627_v34  ;;  %v3629_v39 = vpop.eup %3628  ;;  %v1730_v10 = vmul.f32 %v4042_v59, %v3627_v34 }
 0x4fe   : >> { %3159 = vmatmul.mubr.msk.bf16.vlgmr.msra.gmra.mxu1 %vm1669_vm5, %v1737_v28  ;;  %v1711_v43 = vmul.f32 %v4054_v63, %v3629_v39  ;;  %v3631_v44 = vpop.eup %3630  ;;  %v1731_v5 = vmul.f32 %v4038_v58, %v3629_v39 }
 0x4ff   : >> { %v1712_v47 = vmul.f32 %v4050_v62, %v3631_v44  ;;  %v1732_v62 = vmul.f32 %v4034_v56, %v3631_v44 }
 0x506   : >> { %v3633_v51 = vpop.eup %3632 }
 0x507   : >> { %v1713_v61 = vmul.f32 %v4046_v60, %v3633_v51  ;;  %v1733_v2 = vmul.f32 %v4030_v55, %v3633_v51  ;;  %v5092_v51 = vmov (%p4741_p11), %v4714_v4 }
 0x57b   : >> { %v1716_v42 = vpop.xlane.xlu0 %1715 }
 0x57c   : >> { %v1726_v50 = vadd.f32 %v1716_v42, %v1710_v35  }
 0x57e   : >> { %v1719_v46 = vpop.xlane.xlu1 %1718 }
 0x57f   : >> { %v1727_v49 = vadd.f32 %v1719_v46, %v1711_v43  }
 0x582   : >> { %v1722_v52 = vpop.xlane.xlu0 %1721 }
 0x583   : >> { %v1728_v53 = vadd.f32 %v1722_v52, %v1712_v47   ;;  %v5093_v52 = vmov (%p4741_p11), %v4708_v13 }
 0x585   : > { %v5091_v47 = vmov (%p4741_p11), %v1728_v53 }
 0x586   : >> { %v1725_v7 = vpop.xlane.xlu1 %1724 }
 0x587   : >> { %v1729_v40 = vadd.f32 %v1725_v7, %v1713_v61  }
 0x589   : > { %v5090_v46 = vmov (%p4741_p11), %v1729_v40 }
 0x5b3   : >> { %v1779_v0 = vpop.f32.mrf.mxu0 }
 0x5b4   : >> { %v1923_v11 = vadd.f32 %v1779_v0, %v1730_v10   ;;  %v5081_v0 = vmov %v1726_v50 }
 0x5b5   : >> { %v3142_v12 = vpop.f32.mrf.mxu0 }
 0x5b6   : >> { %v1825_v14 = vpop.f32.mrf.mxu1  ;;  %v5089_v44 = vmov (%p4741_p11), %v1923_v11 }
 0x5b7   : >> { %v1782_v63 = vpop.f32.mrf.mxu0  ;;  %v1924_v18 = vadd.f32 %v1825_v14, %v1731_v5   ;;  %v5085_v5 = vmov %v5072_v54 }
 0x5b8   : >> { %v3148_v3 = vpop.f32.mrf.mxu1  ;;  %v5080_v63 = vmov %v1727_v49 }
 0x5b9   : >> { %v3143_v19 = vpop.f32.mrf.mxu0  ;;  %v5084_v3 = vmov %v4702_v8  ;;  %v5088_v43 = vmov (%p4741_p11), %v1924_v18 }
 0x5ba   : >> { %v1828_v17 = vpop.f32.mrf.mxu1 }
 0x5bb   : >> { %v1871_v20 = vpop.f32.mrf.mxu0 }
 0x5bc   : >> { %v1925_v48 = vadd.f32 %v1871_v20, %v1732_v62   ;;  %v3149_v60 = vpop.f32.mrf.mxu1  ;;  %v5079_v62 = vmov %v1728_v53  ;;  %v5094_v53 = vmov (%p4741_p11), %v4702_v8 }
 0x5bd   : >> { %v3154_v36 = vpop.f32.mrf.mxu0  ;;  %v5078_v60 = vmov %v1729_v40 }
 0x5be   : >> { %v1917_v22 = vpop.f32.mrf.mxu1  ;;  %v5075_v56 = vmov %v1925_v48  ;;  %v5087_v42 = vmov (%p4741_p11), %v1925_v48 }
 0x5bf   : >> { %v1874_v59 = vpop.f32.mrf.mxu0  ;;  %v1926_v23 = vadd.f32 %v1917_v22, %v1733_v2   ;;  %v5083_v2 = vmov %v4708_v13 }
 0x5c0   : >> { %v3160_v15 = vpop.f32.mrf.mxu1  ;;  %v5077_v59 = vmov %v1923_v11  ;;  %1456 = sbr.rel (!%p4741_p11) target bundleno = 899 (0x383), region = 121 }
 0x5c1   : >> { %v3155_v1 = vpop.f32.mrf.mxu0  ;;  %v5074_v55 = vmov %v1926_v23  ;;  %v5086_v39 = vmov (%p4741_p11), %v1926_v23 }
 0x5c2   : >> { %v1920_v58 = vpop.f32.mrf.mxu1  ;;  %v5082_v1 = vmov %v4714_v4 }
 0x5c3   : >> { %v5076_v58 = vmov %v1924_v18 }
 0x5c4   : >> { %v3161_v24 = vpop.f32.mrf.mxu1 }
 0x5c5 PF: > { %3162 = vmatprep.subr.bf16.mxu1 %v4143_v21  ;;  %vm1939_vm7 = vcmask 261120   ;;  %3164 = vmatprep.mubr.msk.bf16.mxu1 %vm4144_vm2, %v4143_v21  ;;  %s1928_s17 = scalar_lea.vmem [#allocation2], %s4515_s9  ;;  %vm2135_vm9 = vcmask 64512   ;;  %s1934_s20 = scalar_lea.vmem [#allocation3], %s4515_s9  ;;  %vm2207_vm10 = vcmask 1043456   ;;  %vm2572_vm11 = vcmask 523264   ;;  %v4126_v54 = vphi %v4584_v54, %v5072_v54   ;;  %v4122_v53 = vphi %v4582_v53, %v5094_v53   ;;  %v4118_v52 = vphi %v4580_v52, %v5093_v52   ;;  %v4114_v51 = vphi %v4578_v51, %v5092_v51   ;;  %v4110_v50 = vphi %v4576_v50, %v1726_v50   ;;  %v4106_v49 = vphi %v4574_v49, %v1727_v49   ;;  %v4102_v47 = vphi %v4572_v47, %v5091_v47   ;;  %v4098_v46 = vphi %v4570_v46, %v5090_v46   ;;  %v4094_v44 = vphi %v4568_v44, %v5089_v44   ;;  %v4090_v43 = vphi %v4566_v43, %v5088_v43   ;;  %v4086_v42 = vphi %v4564_v42, %v5087_v42   ;;  %v4082_v39 = vphi %v4562_v39, %v5086_v39  }
 0x5c6   : > { %v1929_v55 = vld [vmem:[%s1928_s17] sm:$0xf]  ;;  %3186 = vmatprep.subr.bf16.mxu0 %v4143_v21  ;;  %3188 = vmatprep.mubr.msk.bf16.mxu0 %vm4144_vm2, %v4143_v21  ;;  %v1930_v8 = vld [vmem:[%s1928_s17 + $0x8] sm:$0xf]  ;;  %v1931_v4 = vld [vmem:[%s1928_s17 + $0x10] sm:$0xf] }
 0x5c7   : > { %v1944_v56 = vsel %vm1939_vm7, %v1929_v55, 0  ;;  %v1990_v13 = vsel %vm1939_vm7, %v1930_v8, 0  ;;  %v2036_v25 = vsel %vm1939_vm7, %v1931_v4, 0  ;;  %v1932_v26 = vld [vmem:[%s1928_s17 + $0x18] sm:$0xf]  ;;  %vm2575_vm12 = vcmask 785408  }
 0x5c8   : > { %3163 = vmatpush3.bf16.xpose.msra.mxu1 %v1944_v56  ;;  %v1935_v62 = vld [vmem:[%s1934_s20] sm:$0xf]  ;;  %v1936_v20 = vld [vmem:[%s1934_s20 + $0x8] sm:$0xf]  ;;  %v1938_v36 = vld [vmem:[%s1934_s20 + $0x18] sm:$0xf] }
 0x5c9   : > { %3168 = vmatprep.subr.bf16.mxu1 %v4143_v21  ;;  %v2209_v17 = vsel %vm2207_vm10, %v1935_v62, 0  ;;  %v2255_v48 = vsel %vm2207_vm10, %v1936_v20, 0  ;;  %v2347_v2 = vsel %vm2207_vm10, %v1938_v36, 0  ;;  %s2981_s15 = sshll.u32 %s4014_s28, 1  ;;  %s2707_s24 = sshll.u32 %s341_s14, 4  ;;  %s4971_s24 = int_to_ptr.vmem [resolvable:$true] %s2707_s24 }
 0x5ca   : > { %3187 = vmatpush3.bf16.msra.mxu0 %v2209_v17  ;;  %s2703_s9 = sadd.s32 %s4010_s27, %s2981_s15  ;;  %s5096_s18 = sld [smem:[#allocation27_spill]] }
 0x5cb   : > { %3198 = vmatprep.subr.bf16.mxu0 %v4143_v21  ;;  %s2692_s27 = scalar_lea.sflag [#allocation6], %s339_s5  ;;  %s3798_s28 = scalar_lea.vmem %s4971_s24, 128 }
 0x5cc   : > { %p3799_p13 = scmp.ne.s32.totalorder %s4971_s24, %s3798_s28  ;;  %s4153_s6 = smov [#allocation13]  }
 0x5cd   : > { %s3802_s10 = sshll.u32 %s4153_s6, 4  ;;  %s3803_s10 = int_to_ptr.vmem [resolvable:$false] %s3802_s10 }
 0x5ce   : > { %p3800_p8 = pnand %p3799_p13, %p4259_p6  ;;  %s3804_s17 = scalar_lea.vmem %s3803_s10, 256 }
 0x5cf   : > { %3165 = vmatmul.mubr.msk.bf16.vlgmr.msra.gmra.mxu1 %vm1939_vm7, %v4553_v30  ;;  %v2082_v30 = vsel %vm1939_vm7, %v1932_v26, 0  ;;  %p3805_p10 = scmp.lt.s32.totalorder %s4971_s24, %s3803_s10  ;;  %p3806_p0 = scmp.lt.s32.totalorder %s3804_s17, %s3798_s28 }
 0x5d0   : > { %3169 = vmatpush3.bf16.xpose.msra.mxu1 %v1990_v13  ;;  %3170 = vmatprep.mubr.msk.bf16.mxu1 %vm4144_vm2, %v4143_v21  ;;  %p3801_p9 = pneg %p3800_p8 }
 0x5d1   : > { %3174 = vmatprep.subr.bf16.mxu1 %v4143_v21  ;;  %p3807_p12 = por %p3806_p0, %p3805_p10 }
 0x5d3   : > { %p3808_p2 = pnand %p3807_p12, %p3801_p9 }
 0x5d7   : > { %3171 = vmatmul.mubr.msk.bf16.vlgmr.msra.gmra.mxu1 %vm1939_vm7, %v4555_v32  ;;  %v2127_v32 = vand.u32 127, %v1293_v16 }
 0x5d8   : > { %3175 = vmatpush3.bf16.xpose.msra.mxu1 %v2036_v25  ;;  %3176 = vmatprep.mubr.msk.bf16.mxu1 %vm4144_vm2, %v4143_v21 }
 0x5d9   : > { %3180 = vmatprep.subr.bf16.mxu1 %v4143_v21  ;;  %vm2128_vm8 = vcmp.ge.s32.totalorder %v4525_v38, %v2127_v32  ;;  %v1937_v38 = vld [vmem:[%s1934_s20 + $0x10] sm:$0xf] }
 0x5da   : > { %v2301_v60 = vsel %vm2207_vm10, %v1937_v38, 0 }
 0x5df   : > { %3177 = vmatmul.mubr.msk.bf16.vlgmr.msra.gmra.mxu1 %vm1939_vm7, %v4557_v33 }
 0x5e0   : > { %3181 = vmatpush3.bf16.xpose.msra.mxu1 %v2082_v30  ;;  %3182 = vmatprep.mubr.msk.bf16.mxu1 %vm4144_vm2, %v4143_v21 }
 0x5e1   : > { %3192 = vmatprep.subr.bf16.mxu1 %v4143_v21 }
 0x5e7   : > { %3183 = vmatmul.mubr.msk.bf16.vlgmr.msra.gmra.mxu1 %vm1939_vm7, %v4559_v37 }
 0x5e8   : > { %3194 = vmatprep.mubr.msk.bf16.mxu1 %vm4144_vm2, %v4143_v21  ;;  %3193 = vmatpush3.bf16.msra.mxu1 %v2255_v48 }
 0x5e9   : > { %3204 = vmatprep.subr.bf16.mxu1 %v4143_v21 }
 0x68f   : > { %v1980_v27 = vpop.f32.mrf.mxu1 }
 0x690   : > { %v2131_v33 = vsel %vm2128_vm8, %v1980_v27, -inf }
 0x691   : > { %v3166_v28 = vpop.f32.mrf.mxu1  ;;  %v2136_v29 = vsel %vm2135_vm9, %v2131_v33, -inf }
 0x692   : > { %2137 = vmax.xlane.f32.xlu0 %v2136_v29 }
 0x693   : > { %v1983_v9 = vpop.f32.mrf.mxu1 }
 0x695   : > { %v3167_v31 = vpop.f32.mrf.mxu1 }
 0x697   : > { %v2026_v6 = vpop.f32.mrf.mxu1 }
 0x698   : > { %v2132_v37 = vsel %vm2128_vm8, %v2026_v6, -inf }
 0x699   : > { %v3172_v34 = vpop.f32.mrf.mxu1  ;;  %v2139_v16 = vsel %vm2135_vm9, %v2132_v37, -inf }
 0x69a   : > { %2140 = vmax.xlane.f32.xlu0 %v2139_v16 }
 0x69b   : > { %v2029_v35 = vpop.f32.mrf.mxu1 }
 0x69d   : > { %v3173_v61 = vpop.f32.mrf.mxu1 }
 0x69f   : > { %v2072_v7 = vpop.f32.mrf.mxu1 }
 0x6a0   : > { %v2133_v40 = vsel %vm2128_vm8, %v2072_v7, -inf  ;;  %v3634_v7 = vld [vmem:[#allocation12 + $0x38] sm:$0xff]  }
 0x6a1   : > { %v3178_v10 = vpop.f32.mrf.mxu1  ;;  %v2142_v0 = vsel %vm2135_vm9, %v2133_v40, -inf }
 0x6a2   : > { %2143 = vmax.xlane.f32.xlu1 %v2142_v0  ;;  %v3636_v10 = vld [vmem:[#allocation12 + $0x28] sm:$0xff]   ;;  %v3637_v0 = vld [vmem:[#allocation12 + $0x20] sm:$0xff]  }
 0x6a3   : > { %v2075_v11 = vpop.f32.mrf.mxu1 }
 0x6a4   : > { %v3638_v11 = vld [vmem:[#allocation12 + $0x18] sm:$0xff]  }
 0x6a5   : > { %v3179_v12 = vpop.f32.mrf.mxu1 }
 0x6a6   : > { %v3639_v12 = vld [vmem:[#allocation12 + $0x10] sm:$0xff]  }
 0x6a7   : > { %v2118_v5 = vpop.f32.mrf.mxu1 }
 0x6a8   : > { %v2134_v63 = vsel %vm2128_vm8, %v2118_v5, -inf  ;;  %v3640_v5 = vld [vmem:[#allocation12 + $0x8] sm:$0xff]  }
 0x6a9   : > { %v3184_v14 = vpop.f32.mrf.mxu1  ;;  %v2145_v18 = vsel %vm2135_vm9, %v2134_v63, -inf }
 0x6aa   : > { %2146 = vmax.xlane.f32.xlu1 %v2145_v18 }
 0x6ab   : > { %v2121_v19 = vpop.f32.mrf.mxu1 }
 0x6ad   : > { %v3185_v3 = vpop.f32.mrf.mxu1 }
 0x71b   : > { %v2138_v59 = vpop.xlane.xlu0 %2137 }
 0x71c   : > { %v4890_v22 = vmax.f32 %v4126_v54, %v2138_v59 }
 0x71e   : > { %v2164_v23 = vsub.f32 %v2131_v33, %v4890_v22 }
 0x720   : > { %v2168_v1 = vmul.f32 1.442695, %v2164_v23 }
 0x722   : > { %3642 = vpow2.f32 %v2168_v1 }
 0x723   : > { %v2141_v15 = vpop.xlane.xlu0 %2140 }
 0x724   : > { %v4894_v58 = vmax.f32 %v4122_v53, %v2141_v15 }
 0x726   : > { %v2165_v24 = vsub.f32 %v2132_v37, %v4894_v58  ;;  %v2153_v3 = vsub.f32 %v4122_v53, %v4894_v58 }
 0x728   : > { %v2170_v55 = vmul.f32 1.442695, %v2165_v24  ;;  %v2158_v17 = vmul.f32 1.442695, %v2153_v3 }
 0x72a   : > { %3644 = vpow2.f32 %v2170_v55 }
 0x72b   : > { %v2144_v56 = vpop.xlane.xlu1 %2143 }
 0x72c   : > { %v2150_v8 = vmax.f32 %v4118_v52, %v2144_v56 }
 0x72e   : > { %v2166_v13 = vsub.f32 %v2133_v40, %v2150_v8  ;;  %v3635_v40 = vld [vmem:[#allocation12 + $0x30] sm:$0xff]   ;;  %v2154_v18 = vsub.f32 %v4118_v52, %v2150_v8 }
 0x72f   : > { %v3643_v4 = vpop.eup %3642 }
 0x730   : > { %v2172_v25 = vmul.f32 1.442695, %v2166_v13  ;;  %v2180_v26 = vsel %vm2135_vm9, %v3643_v4, 0.0  ;;  %v2200_v30 = vpack.c.bf16 %v3643_v4, %v3643_v4  ;;  %v2160_v19 = vmul.f32 1.442695, %v2154_v18 }
 0x731   : > { %2181 = vadd.xlane.f32.xlu0 %v2180_v26 }
 0x732   : > { %3646 = vpow2.f32 %v2172_v25  ;;  %3189 = vmatmul.mubr.msk.bf16.vlgmr.msra.gmra.mxu0 %vm2135_vm9, %v2200_v30 }
 0x733   : > { %v2147_v32 = vpop.xlane.xlu1 %2146  ;;  %3199 = vmatpush3.bf16.msra.mxu0 %v2301_v60  ;;  %3200 = vmatprep.mubr.msk.bf16.mxu0 %vm4144_vm2, %v4143_v21 }
 0x734   : > { %v2151_v27 = vmax.f32 %v4114_v51, %v2147_v32  ;;  %3210 = vmatprep.subr.bf16.mxu0 %v4143_v21 }
 0x736   : > { %v2167_v33 = vsub.f32 %v2134_v63, %v2151_v27  ;;  %v2152_v63 = vsub.f32 %v4126_v54, %v4890_v22  ;;  %v2155_v62 = vsub.f32 %v4114_v51, %v2151_v27 }
 0x737   : > { %v3645_v28 = vpop.eup %3644 }
 0x738   : > { %v2174_v29 = vmul.f32 1.442695, %v2167_v33  ;;  %v2183_v9 = vsel %vm2135_vm9, %v3645_v28, 0.0  ;;  %v2201_v31 = vpack.c.bf16 %v3645_v28, %v3645_v28  ;;  %v2156_v14 = vmul.f32 1.442695, %v2152_v63 }
 0x739   : > { %2184 = vadd.xlane.f32.xlu1 %v2183_v9  ;;  %v2162_v20 = vmul.f32 1.442695, %v2155_v62 }
 0x73a   : > { %3648 = vpow2.f32 %v2174_v29  ;;  %3195 = vmatmul.mubr.msk.bf16.vlgmr.msra.gmra.mxu1 %vm2135_vm9, %v2201_v31 }
 0x73b   : > { %3205 = vmatpush3.bf16.msra.mxu1 %v2347_v2  ;;  %3206 = vmatprep.mubr.msk.bf16.mxu1 %vm4144_vm2, %v4143_v21  ;;  %3650 = vpow2.f32 %v2156_v14 }
 0x73c   : > { %3652 = vpow2.f32 %v2160_v19 }
 0x73d   : > { %3654 = vpow2.f32 %v2158_v17 }
 0x73e   : > { %3656 = vpow2.f32 %v2162_v20 }
 0x73f   : > { %v3647_v6 = vpop.eup %3646 }
 0x740   : > { %v2186_v37 = vsel %vm2135_vm9, %v3647_v6, 0.0  ;;  %v2202_v34 = vpack.c.bf16 %v3647_v6, %v3647_v6 }
 0x741   : > { %2187 = vadd.xlane.f32.xlu0 %v2186_v37 }
 0x742   : > { %3201 = vmatmul.mubr.msk.bf16.vlgmr.msra.gmra.mxu0 %vm2135_vm9, %v2202_v34 }
 0x743   : > { %3226 = vmatprep.mubr.msk.bf16.mxu0 %vm4144_vm2, %v4143_v21  ;;  %3211 = vmatpush3.bf16.msra.mxu0 %v3634_v7 }
 0x744   : > { %3212 = vmatprep.subr.bf16.mxu0 %v4143_v21 }
 0x747   : > { %v3649_v16 = vpop.eup %3648  ;;  %3213 = vmatpush3.bf16.msra.mxu0 %v3635_v40 }
 0x748   : > { %v2189_v35 = vsel %vm2135_vm9, %v3649_v16, 0.0  ;;  %v2203_v61 = vpack.c.bf16 %v3649_v16, %v3649_v16  ;;  %3214 = vmatprep.subr.bf16.mxu0 %v4143_v21  ;;  %v3651_v48 = vpop.eup %3650 }
 0x749   : > { %2190 = vadd.xlane.f32.xlu1 %v2189_v35  ;;  %v2176_v38 = vmul.f32 %v4110_v50, %v3651_v48  ;;  %v3653_v54 = vpop.eup %3652 }
 0x74a   : > { %3207 = vmatmul.mubr.msk.bf16.vlgmr.msra.gmra.mxu1 %vm2135_vm9, %v2203_v61  ;;  %v2178_v52 = vmul.f32 %v4102_v47, %v3653_v54  ;;  %v3655_v59 = vpop.eup %3654  ;;  %v2196_v47 = vmul.f32 %v4094_v44, %v3651_v48 }
 0x74b   : > { %3215 = vmatpush3.bf16.msra.mxu0 %v3636_v10  ;;  %v3657_v51 = vpop.eup %3656  ;;  %v2177_v1 = vmul.f32 %v4106_v49, %v3655_v59  ;;  %v2198_v49 = vmul.f32 %v4086_v42, %v3653_v54  ;;  %v2197_v29 = vmul.f32 %v4090_v43, %v3655_v59 }
 0x74c   : > { %3216 = vmatprep.subr.bf16.mxu0 %v4143_v21  ;;  %v2179_v50 = vmul.f32 %v4098_v46, %v3657_v51  ;;  %v2199_v7 = vmul.f32 %v4082_v39, %v3657_v51 }
 0x74f   : > { %3217 = vmatpush3.bf16.msra.mxu0 %v3637_v0 }
 0x750   : > { %3218 = vmatprep.subr.bf16.mxu0 %v4143_v21 }
 0x753   : > { %3219 = vmatpush3.bf16.msra.mxu0 %v3638_v11 }
 0x754   : > { %3220 = vmatprep.subr.bf16.mxu0 %v4143_v21 }
 0x757   : > { %3221 = vmatpush3.bf16.msra.mxu0 %v3639_v12 }
 0x758   : > { %3222 = vmatprep.subr.bf16.mxu0 %v4143_v21 }
 0x75b   : > { %3223 = vmatpush3.bf16.msra.mxu0 %v3640_v5 }
 0x75c   : > { %3224 = vmatprep.subr.bf16.mxu0 %v4143_v21 }
 0x7ba   : > { %v2182_v21 = vpop.xlane.xlu0 %2181 }
 0x7bb   : > { %v2192_v60 = vadd.f32 %v2182_v21, %v2176_v38 }
 0x7bd   : > { %3658 = vrcp.f32 %v2192_v60 }
 0x7c2   : > { %v2185_v22 = vpop.xlane.xlu1 %2184 }
 0x7c3   : > { %v2193_v58 = vadd.f32 %v2185_v22, %v2177_v1 }
 0x7ca   : > { %v2188_v36 = vpop.xlane.xlu0 %2187  ;;  %v3659_v26 = vpop.eup %3658 }
 0x7cb   : > { %v2194_v53 = vadd.f32 %v2188_v36, %v2178_v52 }
 0x7cd   : > { %3660 = vrcp.f32 %v2194_v53 }
 0x7ce   : > { %3662 = vrcp.f32 %v2193_v58 }
 0x7d2   : > { %v2191_v24 = vpop.xlane.xlu1 %2190 }
 0x7d3   : > { %v2195_v8 = vadd.f32 %v2191_v24, %v2179_v50 }
 0x7d5   : > { %3664 = vrcp.f32 %v2195_v8 }
 0x7da   : > { %v3661_v28 = vpop.eup %3660 }
 0x7db   : > { %v3663_v16 = vpop.eup %3662 }
 0x7e2   : > { %v3665_v43 = vpop.eup %3664 }
 0x7f2   : > { %v2245_v2 = vpop.f32.mrf.mxu0 }
 0x7f3   : > { %v2389_v4 = vadd.f32 %v2245_v2, %v2196_v47 }
 0x7f4   : > { %v3190_v23 = vpop.f32.mrf.mxu0 }
 0x7f5   : > { %v2397_v32 = vmul.f32 %v3659_v26, %v2389_v4 }
 0x7f6   : > { %v2248_v15 = vpop.f32.mrf.mxu0 }
 0x7f7   : > { %v2401_v9 = vpack.c.bf16 %v2397_v32, %v2397_v32 }
 0x7f8   : > { %v3191_v55 = vpop.f32.mrf.mxu0 }
 0x7f9   : > { %v2408_v35 = vrot.slane %v2401_v9, %v4528_v41 }
 0x7fa   : > { %v2291_v56 = vpop.f32.mrf.mxu1 }
 0x7fb   : > { %v2390_v6 = vadd.f32 %v2291_v56, %v2197_v29 }
 0x7fc   : > { %v3196_v13 = vpop.f32.mrf.mxu1 }
 0x7fd   : > { %v2398_v42 = vmul.f32 %v3663_v16, %v2390_v6 }
 0x7fe   : > { %v2294_v25 = vpop.f32.mrf.mxu1 }
 0x7ff   : > { %v2435_v63 = vpack.c.bf16 %v2398_v42, %v2398_v42 }
 0x800   : > { %v3197_v30 = vpop.f32.mrf.mxu1 }
 0x801   : > { %v2442_v62 = vrot.slane %v2435_v63, %v4528_v41 }
 0x802   : > { %v2337_v27 = vpop.f32.mrf.mxu0 }
 0x803   : > { %v2391_v33 = vadd.f32 %v2337_v27, %v2198_v49  ;;  %v3641_v49 = vld [vmem:[#allocation12] sm:$0xff]  }
 0x804   : > { %v3202_v46 = vpop.f32.mrf.mxu0  ;;  %3225 = vmatpush3.bf16.msra.mxu0 %v3641_v49 }
 0x805   : > { %v2399_v31 = vmul.f32 %v3661_v28, %v2391_v33 }
 0x806   : > { %v2340_v44 = vpop.f32.mrf.mxu0 }
 0x807   : > { %v2409_v37 = vpack.c.bf16 %v2399_v31, %v2399_v31 }
 0x808   : > { %v3203_v34 = vpop.f32.mrf.mxu0 }
 0x809   : > { %v2416_v61 = vrot.slane %v2409_v37, %v4528_v41 }
 0x80a   : > { %v2383_v40 = vpop.f32.mrf.mxu1 }
 0x80b   : > { %v2417_v10 = vcombine.low %v2408_v35, %v2416_v61  ;;  %v2418_v0 = vcombine.high %v2408_v35, %v2416_v61  ;;  %v2392_v11 = vadd.f32 %v2383_v40, %v2199_v7 }
 0x80c   : > { %v3208_v12 = vpop.f32.mrf.mxu1 }
 0x80d   : > { %v2400_v5 = vmul.f32 %v3665_v43, %v2392_v11  ;;  %v2425_v3 = vrot.slane %v2417_v10, %v4532_v45  ;;  %v2432_v39 = vrot.slane %v2418_v0, %v4532_v45 }
 0x80e   : > { %v2386_v14 = vpop.f32.mrf.mxu1 }
 0x80f   : > { %v2443_v18 = vpack.c.bf16 %v2400_v5, %v2400_v5  ;;  %v2433_v21 = vcombine.high %v2425_v3, %v4150_v57  ;;  %v2434_v60 = vcombine.high %v2432_v39, %v4150_v57  ;;  %v2473_v36 = vshrl.u32 %v2425_v3, 16 }
 0x810   : > { %v3209_v19 = vpop.f32.mrf.mxu1  ;;  %v2489_v23 = vshrl.u32 %v2432_v39, 16 }
 0x811   : > { %v2450_v17 = vrot.slane %v2443_v18, %v4528_v41  ;;  %v2481_v22 = vshrl.u32 %v2433_v21, 16  ;;  %v2497_v50 = vshrl.u32 %v2434_v60, 16 }
 0x813   : > { %v2451_v20 = vcombine.low %v2442_v62, %v2450_v17  ;;  %v2452_v48 = vcombine.high %v2442_v62, %v2450_v17 }
 0x815   : > { %v2459_v38 = vrot.slane %v2451_v20, %v4532_v45  ;;  %v2466_v54 = vrot.slane %v2452_v48, %v4532_v45 }
 0x817   : > { %v2467_v52 = vcombine.high %v2459_v38, %v4150_v57  ;;  %v2468_v2 = vcombine.high %v2466_v54, %v4150_v57  ;;  %v2471_v59 = vpack.i.b16 %v2459_v38, %v2425_v3  ;;  %v2474_v53 = vshrl.u32 %v2459_v38, 16 }
 0x818   : > { %v2487_v51 = vpack.i.b16 %v2466_v54, %v2432_v39  ;;  %v2490_v1 = vshrl.u32 %v2466_v54, 16 }
 0x819   : > { %v2475_v15 = vpack.i.b16 %v2474_v53, %v2473_v36  ;;  %v2479_v58 = vpack.i.b16 %v2467_v52, %v2433_v21  ;;  %v2482_v24 = vshrl.u32 %v2467_v52, 16  ;;  %v2495_v55 = vpack.i.b16 %v2468_v2, %v2434_v60 }
 0x81a   : > { %v2491_v56 = vpack.i.b16 %v2490_v1, %v2489_v23  ;;  %v2498_v8 = vshrl.u32 %v2468_v2, 16  ;;  %v2501_v47 = vcombine.low %v2471_v59, %v2487_v51 }
 0x81b   : > { %v2483_v13 = vpack.i.b16 %v2482_v24, %v2481_v22  ;;  %v2509_v4 = vcombine.low %v2479_v58, %v2495_v55 }
 0x81c   : > { %v2499_v25 = vpack.i.b16 %v2498_v8, %v2497_v50  ;;  %v2526_v26 = vcombine.low %v2475_v15, %v2491_v56  ;;  %v2508_v30 = vrot.slane %v2501_v47, %v4528_v41 }
 0x81d   : > { %v2516_v32 = vrot.slane %v2509_v4, %v4528_v41 }
 0x81e   : > { %v2534_v27 = vcombine.low %v2483_v13, %v2499_v25  ;;  %v2533_v28 = vrot.slane %v2526_v26, %v4528_v41 }
 0x81f   : > { %v2517_v33 = vcombine.low %v2508_v30, %v2516_v32 }
 0x820   : > { %v2541_v29 = vrot.slane %v2534_v27, %v4528_v41 }
 0x821   : > { %v2524_v46 = vrot.slane %v2517_v33, %v4532_v45 }
 0x822   : > { %v2542_v9 = vcombine.low %v2533_v28, %v2541_v29 }
 0x823   : > { %v2525_v6 = vcombine.high %v2524_v46, %v4150_v57  ;;  %v2554_v44 = vshrl.u32 %v2524_v46, 16 }
 0x824   : > { %v2549_v31 = vrot.slane %v2542_v9, %v4532_v45 }
 0x825   : > { %v2560_v7 = vshrl.u32 %v2525_v6, 16 }
 0x826   : > { %v2555_v37 = vshrl.u32 %v2549_v31, 16  ;;  %v2550_v34 = vcombine.high %v2549_v31, %v4150_v57  ;;  %v2553_v16 = vpack.i.b16 %v2549_v31, %v2524_v46 }
 0x828   : > { %v2556_v35 = vpack.i.b16 %v2555_v37, %v2554_v44  ;;  %v2559_v61 = vpack.i.b16 %v2550_v34, %v2525_v6  ;;  %v2561_v42 = vshrl.u32 %v2550_v34, 16 }
 0x82a   : > { %2563 = vrot.lane.b32.xlu0 %v2556_v35, %s4145_s3  ;;  %2565 = vrot.lane.b32.xlu1 %v2559_v61, %s4147_s29  ;;  %v2562_v41 = vpack.i.b16 %v2561_v42, %v2560_v7  ;;  %s5095_s29 = sld [smem:[#allocation26_spill]] }
 0x82e   : > { %2567 = vrot.lane.b32.xlu1 %v2562_v41, %s4146_s4  ;;  %s2982_s4 = sshll.u32 %s2703_s9, 7 }
 0x82f   : > { %s4969_s21 = scalar_lea.hbm %s5096_s18, %s2982_s4 }
 0x830   : > { %v2971_v43 = vld [vmem:[%s5095_s29] ss:$0 sm:$0xff] }
 0x89c   : > { %v2564_v45 = vpop.permute.xlu0 %2563  ;;  %v2566_v40 = vpop.permute.xlu1 %2565 }
 0x89d   : > { %v2571_v10 = vsel %vm1939_vm7, %v2553_v16, %v2564_v45 }
 0x89e   : > { %v2574_v57 = vsel %vm2572_vm11, %v2571_v10, %v2566_v40 }
 0x8a0   : > { %v2568_v0 = vpop.permute.xlu1 %2567 }
 0x8a1   : > { %v2577_v11 = vsel %vm2575_vm12, %v2574_v57, %v2568_v0 }
 0x8a2   : > { %3227 = vmatmul.mubr.bf16.vlgmr.msra.gmra.mxu0 %v2577_v11 }
 0x962   : > { %v2684_v12 = vpop.f32.mrf.mxu0 }
 0x963   : > { %v2685_v5 = vadd.f32 %v2971_v43, %v2684_v12 }
 0x964   : > { %v3228_v63 = vpop.f32.mrf.mxu0 }
 0x965   : > { %2690 = vst [vmem:[%s341_s14] sm:$0xff] %v2685_v5 }
 0x966   : > { %v2687_v14 = vpop.f32.mrf.mxu0 }
 0x967   : > { %3811 = shalt.err (!%p3808_p2)
}
 0x968   : > { %s3812_s11 = scalar_lea.hbm %s4969_s21, 128  ;;  %s3816_s20 = scalar_lea.hbm %s5096_s18, 512 }
 0x969   : > { %p3813_p5 = scmp.ne.s32.totalorder %s4969_s21, %s3812_s11  ;;  %p3817_p4 = scmp.lt.s32.totalorder %s4969_s21, %s5096_s18 }
 0x96a   : > { %p3818_p1 = scmp.lt.s32.totalorder %s3816_s20, %s3812_s11 }
 0x96b   : > { %p3814_p7 = pnand %p3813_p5, %p4259_p6 }
 0x96c   : > { %p3819_p11 = por %p3818_p1, %p3817_p4 }
 0x96d   : > { %p3815_p3 = pneg %p3814_p7 }
 0x96f   : > { %p3820_p13 = pnand %p3819_p11, %p3815_p3 }
 0x971   : > { %3823 = shalt.err (!%p3820_p13)
}
 0x972   : > { %3248 = dma.vmem_to_hbm [thread:$0]  (%p4259_p6), %s4971_s24, 128, %s4969_s21, %s2692_s27   ;;  %v3229_v18 = vpop.f32.mrf.mxu0 }
 0x973 PF: > { %s5097_s13 = sld [smem:[#allocation18_spill]]  ;;  %p3280_p8 = scmp.ge.s32.totalorder %s4026_s7, 2 }
 0x974   : > { %s5098_s3 = sld [smem:[#allocation20_spill]] }
 0x979   : > { %s2719_s29 = sand.u32 1, %s5097_s13  }
 0x97a   : > { %p5099_p9 = scmp.ne.s32.totalorder %s5098_s3, 0  ;;  %s2720_s4 = scalar_lea.sflag [#allocation6], %s2719_s29 }
 0x97c   : > { %p3268_p10 = pnand %p3280_p8, %p5099_p9 }
 0x97e   : > { %p3269_p0 = pneg %p3268_p10 }
 0x980   : > { %3981 = dma.done.wait (%p3269_p0), %s2720_s4, 128  }
 0x981   : > { %3983 = vsyncadd (%p3269_p0), %s2720_s4, 4294967168  ;;  %s24_s7 = sadd.s32 1, %s4026_s7   ;;  %s5100_s27 = sld [smem:[#allocation19_spill]] }
 0x982   : > { %p21_p12 = scmp.ge.s32.totalorder %s24_s7, 6   ;;  %s5101_s29 = sld [smem:[#allocation21_spill]] }
 0x983   : > { %s5102_s21 = smov %s3990_s22  ;;  %s5103_s22 = smov %s3994_s23 }
 0x984   : > { %s5104_s23 = smov %s4354_s2  ;;  %s5105_s24 = smov %s4002_s25 }
 0x985   : > { %s5106_s25 = smov %s4006_s26  ;;  %s5107_s26 = smov %s4351_s8 }
 0x986   : > { %s5108_s28 = smov %s4022_s30  ;;  %s5109_s30 = smov %s5115_s16 }
 0x987   :  { %23 = sbr.rel (!%p21_p12) target bundleno = 18 (0x12), region = 132 }
 0x98c   :  { %2725 = vsyncpa [#allocation5], 1 }
 0x98d   :  { %2727 = vsyncpa [#allocation5 + $0x1], 1 }
 0x98e   :  { %2728 = vsyncpa [#allocation8], 1 }
 0x98f   :  { %2729 = vsyncpa [#allocation11], 1 }
 0x990   :  { %2730 = vsyncpa [#allocation6], 1 }
 0x991   :  { %2732 = vsyncpa [#allocation6 + $0x1], 1 }

// kernel: tpu_custom_call.1
= control target key start
LH: loop header
LB: loop body
LE: loop exit
PB: predicated region body
PF: predicated region fallthrough
CT: control target
= control target key end

     0   :  { %s5034_s0 = inlined_call_operand.hbm [shape: bf16[2,16,128], index: 0, kind: input, shape index: {}]   ;;  %s5035_s1 = inlined_call_operand.hbm [shape: bf16[128,128], index: 1, kind: input, shape index: {}]   ;;  %s5036_s2 = inlined_call_operand.hbm [shape: bf16[128,128], index: 2, kind: input, shape index: {}]   ;;  %s5037_s3 = inlined_call_operand.hbm [shape: bf16[128,128], index: 3, kind: input, shape index: {}]   ;;  %s5038_s4 = inlined_call_operand.hbm [shape: bf16[128,128], index: 4, kind: input, shape index: {}]   ;;  %s5039_s5 = inlined_call_operand.vmem [shape: f32[1,128], index: 5, kind: input, shape index: {}]   ;;  %s5040_s6 = inlined_call_operand.hbm [shape: f32[2,16,128], index: 6, kind: output, shape index: {}]  }
   0x1   :  { %5048 = sst [smem:[#allocation22_spill]] %s5035_s1 }
   0x2   :  { %5049 = sst [smem:[#allocation23_spill]] %s5036_s2 }
   0x3   :  { %5050 = sst [smem:[#allocation24_spill]] %s5037_s3 }
   0x4   :  { %5051 = sst [smem:[#allocation25_spill]] %s5038_s4 }
   0x5   :  { %5052 = sst [smem:[#allocation26_spill]] %s5039_s5 }
   0x6   :  { %5053 = sst [smem:[#allocation27_spill]] %s5040_s6 }
   0x7   :  { %11 = vsyncpa [#allocation5], 0 }
   0x8   :  { %13 = vsyncpa [#allocation5 + $0x1], 0 }
   0x9   :  { %14 = vsyncpa [#allocation8], 0 }
   0xa   :  { %15 = vsyncpa [#allocation11], 0 }
   0xb   :  { %16 = vsyncpa [#allocation6], 0 }
   0xc   :  { %18 = vsyncpa [#allocation6 + $0x1], 0  ;;  %s4189_s21 = smov 0   ;;  %s4191_s22 = smov 0  }
   0xd   :  { %s4193_s23 = smov 0   ;;  %s4195_s24 = smov 0  }
   0xe   :  { %s4197_s25 = smov 0   ;;  %s4199_s26 = smov 0  }
   0xf   :  { %s4201_s27 = smov 0   ;;  %s4203_s28 = smov 0  }
  0x10   :  { %s4205_s29 = smov 0   ;;  %s4207_s30 = smov 0  }
  0x11   :  { %s4209_s7 = smov 0  }
  0x12 LB: > { %5054 = sst [smem:[#allocation18_spill]] %s3986_s21  ;;  %s2879_s8 = sadd.s32 4294967295, %s4026_s7   ;;  %s4026_s7 = sphi %s4209_s7, %s24_s7   ;;  %s4022_s30 = sphi %s4207_s30, %s5109_s30   ;;  %s4018_s29 = sphi %s4205_s29, %s5101_s29   ;;  %s4014_s28 = sphi %s4203_s28, %s5108_s28   ;;  %s4010_s27 = sphi %s4201_s27, %s5100_s27   ;;  %s4006_s26 = sphi %s4199_s26, %s5107_s26   ;;  %s4002_s25 = sphi %s4197_s25, %s5106_s25   ;;  %s3998_s24 = sphi %s4195_s24, %s5105_s24   ;;  %s3994_s23 = sphi %s4193_s23, %s5104_s23   ;;  %s3990_s22 = sphi %s4191_s22, %s5103_s22   ;;  %s3986_s21 = sphi %s4189_s21, %s5102_s21  }
  0x13   : > { %5055 = sst [smem:[#allocation19_spill]] %s4018_s29  ;;  %s2880_s9 = sadd.s32 4294967294, %s4026_s7  }
  0x14   : > { %p56_p0 = scmp.ne.s32.totalorder %s4002_s25, %s3998_s24  ;;  %p4245_p1 = scmp.eq.s32.totalorder %s2879_s8, 0 }
  0x15   : > { %p186_p2 = scmp.ne.s32.totalorder %s3994_s23, %s3990_s22  ;;  %p187_p3 = scmp.eq.s32.totalorder %s2879_s8, 3 }
  0x16   : > { %p4253_p4 = por %p4245_p1, %p56_p0  ;;  %p192_p5 = scmp.ne.s32.totalorder %s3990_s22, %s3986_s21 }
  0x17   : > { %p4259_p6 = por %p187_p3, %p186_p2  ;;  %p193_p7 = scmp.eq.s32.totalorder %s2880_s9, 3 }
  0x18   : > { %p2881_p8 = scmp.ge.s32.totalorder %s4026_s7, 1  ;;  %p200_p9 = scmp.lt.s32.totalorder %s4026_s7, 5 }
  0x19   : > { %p4265_p10 = por %p193_p7, %p192_p5  ;;  %s4128_s15 = smov [#allocation7]  }
  0x1a   : > { %p4269_p11 = pnand %p2881_p8, %p200_p9  ;;  %s212_s16 = sshll.u32 %s4128_s15, 4  ;;  %s213_s16 = int_to_ptr.vmem [resolvable:$true] %s212_s16 }
  0x1b   : > { %s5059_s13 = scalar_select %p4265_p10, 1, 0 }
  0x1c   : > { %p3250_p12 = pneg %p4269_p11  ;;  %s4129_s18 = smov [#allocation10]  }
  0x1d   : > { %5060 = sst [smem:[#allocation20_spill]] %s5059_s13  ;;  %s238_s19 = sshll.u32 %s4129_s18, 4  ;;  %s239_s19 = int_to_ptr.vmem [resolvable:$true] %s238_s19 }
  0x1e   : > { %p4277_p13 = pnand %p3250_p12, %p4245_p1  ;;  %s3677_s20 = scalar_lea.vmem %s213_s16, 1024 }
  0x1f   : > { %p3678_p2 = scmp.ne.s32.totalorder %s213_s16, %s3677_s20  ;;  %p3685_p7 = scmp.lt.s32.totalorder %s213_s16, %s213_s16 }
  0x20   : > { %p3668_p0 = pneg %p4277_p13  ;;  %p3686_p8 = scmp.lt.s32.totalorder %s3677_s20, %s3677_s20 }
  0x22   : > { %p3680_p3 = pnand %p3678_p2, %p3668_p0  ;;  %p3687_p9 = por %p3686_p8, %p3685_p7 }
  0x24   : > { %p3681_p5 = pneg %p3680_p3 }
  0x26   : > { %p3688_p12 = pnand %p3687_p9, %p3681_p5 }
  0x28   : > { %3691 = shalt.err (!%p3688_p12)
}
  0x29   : > { %s5043_s24 = smov 64   ;;  %s5044_s8 = smov 4  }
  0x2a   : > { %s5063_s1 = sld [smem:[#allocation22_spill]]  ;;  %s3703_s18 = scalar_lea.vmem %s239_s19, 1024 }
  0x2b   : > { %p3704_p2 = scmp.ne.s32.totalorder %s239_s19, %s3703_s18  ;;  %p3711_p5 = scmp.lt.s32.totalorder %s239_s19, %s239_s19 }
  0x2c   : > { %p3712_p8 = scmp.lt.s32.totalorder %s3703_s18, %s3703_s18 }
  0x2d   : > { %p3706_p3 = pnand %p3704_p2, %p3668_p0 }
  0x2e   : > { %p3713_p9 = por %p3712_p8, %p3711_p5 }
  0x2f   : > { %p3707_p7 = pneg %p3706_p3 }
  0x30   : > { %3253 = dma.hbm_to_vmem [thread:$0]  (!%p4277_p13), %s5063_s1, 1024, %s213_s16, [#allocation8], %s5043_s24, %s5043_s24, %s5044_s8  }
  0x31   : > { %p3714_p12 = pnand %p3713_p9, %p3707_p7 }
  0x33   : > { %3717 = shalt.err (!%p3714_p12)
}
  0x34   : > { %s5064_s3 = sld [smem:[#allocation24_spill]]  ;;  %s4132_s16 = smov [#allocation9]  }
  0x35   : > { %s225_s9 = sshll.u32 %s4132_s16, 4  ;;  %s4133_s15 = smov [#allocation12]   ;;  %s226_s9 = int_to_ptr.vmem [resolvable:$true] %s225_s9 }
  0x36   : > { %s251_s1 = sshll.u32 %s4133_s15, 4  ;;  %s3729_s21 = scalar_lea.vmem %s226_s9, 1024  ;;  %s252_s1 = int_to_ptr.vmem [resolvable:$true] %s251_s1 }
  0x37   : > { %p3730_p2 = scmp.ne.s32.totalorder %s226_s9, %s3729_s21  ;;  %p3737_p5 = scmp.lt.s32.totalorder %s226_s9, %s226_s9 }
  0x38   : > { %p3738_p8 = scmp.lt.s32.totalorder %s3729_s21, %s3729_s21 }
  0x39   : > { %p3732_p3 = pnand %p3730_p2, %p3668_p0 }
  0x3a   : > { %3259 = dma.hbm_to_vmem [thread:$0]  (!%p4277_p13), %s5064_s3, 1024, %s239_s19, [#allocation11], %s5043_s24, %s5043_s24, %s5044_s8  }
  0x3b   : > { %p3733_p7 = pneg %p3732_p3  ;;  %p3739_p9 = por %p3738_p8, %p3737_p5 }
  0x3d   : > { %p3740_p12 = pnand %p3739_p9, %p3733_p7 }
  0x3f   : > { %3743 = shalt.err (!%p3740_p12)
}
  0x40   : > { %s5065_s2 = sld [smem:[#allocation23_spill]]  ;;  %s3755_s18 = scalar_lea.vmem %s252_s1, 1024 }
  0x41   : > { %p3756_p10 = scmp.ne.s32.totalorder %s252_s1, %s3755_s18  ;;  %p3763_p5 = scmp.lt.s32.totalorder %s252_s1, %s252_s1 }
  0x42   : > { %p3764_p7 = scmp.lt.s32.totalorder %s3755_s18, %s3755_s18 }
  0x43   : > { %p3758_p2 = pnand %p3756_p10, %p3668_p0 }
  0x44   : > { %p3765_p8 = por %p3764_p7, %p3763_p5 }
  0x45   : > { %p3759_p3 = pneg %p3758_p2 }
  0x46   : > { %3256 = dma.hbm_to_vmem [thread:$0]  (!%p4277_p13), %s5065_s2, 1024, %s226_s9, [#allocation8], %s5043_s24, %s5043_s24, %s5044_s8  }
  0x47   : > { %p3766_p9 = pnand %p3765_p8, %p3759_p3 }
  0x49   : > { %3769 = shalt.err (!%p3766_p9)
}
  0x4a   : > { %s5066_s4 = sld [smem:[#allocation25_spill]]  ;;  %s33_s17 = sadd.s32 1, %s4018_s29 }
  0x4b   : > { %p34_p10 = scmp.ge.s32.totalorder %s33_s17, 2  ;;  %s36_s16 = sadd.s32 1, %s4022_s30 }
  0x4c   : > { %s43_s9 = sadd.s32 1, %s4006_s26  ;;  %p50_p0 = scmp.ne.s32.totalorder %s4006_s26, %s4002_s25 }
  0x4d   : > { %s5111_s17 = smov (%p34_p10, %s33_s17), 0  ;;  %s5113_s16 = smov (!%p34_p10, %s36_s16), %s4022_s30 }
  0x4e   : > { %5067 = sst [smem:[#allocation21_spill]] %s5111_s17  ;;  %p51_p12 = scmp.eq.s32.totalorder %s4026_s7, 0 }
  0x4f   : > { %s172_s15 = ssub.s32 %s4018_s29, %s5111_s17  ;;  %p38_p2 = scmp.ge.s32.totalorder %s5113_s16, 2 }
  0x50   : > { %3262 = dma.hbm_to_vmem [thread:$0]  (!%p4277_p13), %s5066_s4, 1024, %s252_s1, [#allocation11], %s5043_s24, %s5043_s24, %s5044_s8  }
  0x51   : > { %s176_s13 = sadd.s32 1, %s3994_s23  ;;  %p4339_p3 = por %p51_p12, %p50_p0 }
  0x52   : > { %p3275_p13 = scmp.lt.s32.totalorder %s4026_s7, 4  ;;  %s5115_s16 = smov (%p38_p2, %s5113_s16), 0 }
  0x53   : > { %s268_s19 = sand.u32 1, %s4006_s26   ;;  %s2985_s18 = sshll.u32 %s4022_s30, 7 }
  0x54   : > { %s40_s21 = ssub.s32 %s4022_s30, %s5115_s16  ;;  %s2887_s24 = sshll.u32 %s268_s19, 3 }
  0x55   : > { %p41_p5 = scmp.eq.s32.totalorder %s40_s21, 0  ;;  %s173_s20 = sor.u32 %s172_s15, %s40_s21 }
  0x56   : > { %p174_p7 = scmp.eq.s32.totalorder %s173_s20, 0  ;;  %s278_s17 = scalar_lea.hbm %s5034_s0, %s2985_s18 }
  0x57   : > { %s4351_s8 = scalar_select %p41_p5, %s4006_s26, %s43_s9  }
  0x58   : > { %s4354_s2 = scalar_select %p174_p7, %s3994_s23, %s176_s13  }
  0x59   : > { %s272_s29 = scalar_lea.vmem [#allocation4], %s2887_s24  ;;  %p4363_p8 = pnand %p3275_p13, %p4339_p3 }
  0x5a   : > { %s279_s6 = sshll.u32 %s272_s29, 4  ;;  %s269_s15 = scalar_lea.sflag [#allocation5], %s268_s19  ;;  %s280_s6 = int_to_ptr.vmem [resolvable:$true] %s279_s6 }
  0x5b   : > { %p3772_p9 = pneg %p4363_p8  ;;  %s3783_s9 = scalar_lea.vmem %s280_s6, 128 }
  0x5c   : > { %p3784_p10 = scmp.ne.s32.totalorder %s280_s6, %s3783_s9  ;;  %s4134_s13 = smov [#allocation4]  }
  0x5d   : > { %s3788_s3 = sshll.u32 %s4134_s13, 4  ;;  %s3789_s3 = int_to_ptr.vmem [resolvable:$false] %s3788_s3 }
  0x5e   : > { %p3786_p0 = pnand %p3784_p10, %p3772_p9  ;;  %s3790_s4 = scalar_lea.vmem %s3789_s3, 256 }
  0x5f   : > { %p3791_p2 = scmp.lt.s32.totalorder %s280_s6, %s3789_s3  ;;  %p3792_p5 = scmp.lt.s32.totalorder %s3790_s4, %s3783_s9 }
  0x60   : > { %p3787_p12 = pneg %p3786_p0 }
  0x61   : > { %p3793_p7 = por %p3792_p5, %p3791_p2 }
  0x63   : > { %p3794_p3 = pnand %p3793_p7, %p3787_p12 }
  0x65   : > { %3797 = shalt.err (!%p3794_p3)
}
  0x66   : > { %s5070_s29 = smov 4   ;;  %s5071_s24 = smov 64  }
  0x67   : > { %3266 = dma.hbm_to_vmem [thread:$0]  (!%p4363_p8), %s278_s17, 128, %s280_s6, %s269_s15, %s5071_s24, %s5071_s24, %s5070_s29  }
  0x68   : > { %291 = sbr.rel (%p4269_p11) target bundleno = 2419 (0x973), region = 44  ;;  %s293_s1 = sand.u32 (!%p4269_p11), 1, %s4002_s25  }
  0x69   : > { %s4377_s19 = sshll.u32 (!%p4269_p11), %s293_s1, 3  ;;  %s294_s18 = scalar_lea.sflag (!%p4269_p11), [#allocation5], %s293_s1 }
  0x6a   : > { %s297_s21 = scalar_lea.vmem (!%p4269_p11), [#allocation4], %s4377_s19 }
  0x6d   : > { %3969 = dma.done.wait (%p4253_p4), %s294_s18, 128  }
  0x6e   : > { %3971 = vsyncadd (%p4253_p4), %s294_s18, 4294967168 }
  0x6f   : > { %3973 = dma.done.wait (%p4245_p1), [#allocation8], 2048  }
  0x70   : > { %3975 = vsyncadd (%p4245_p1), [#allocation8], 4294965248 }
  0x71   : > { %3977 = dma.done.wait (%p4245_p1), [#allocation11], 2048  }
  0x72   : > { %3979 = vsyncadd (%p4245_p1), [#allocation11], 4294965248  ;;  %s339_s5 = sand.u32 1, %s3990_s22   ;;  %s2897_s6 = sshll.u32 %s4010_s27, 3 }
  0x73   : > { %s4396_s11 = sshll.u32 %s339_s5, 3  ;;  %p2898_p4 = scmp.ne.s32.totalorder %s4010_s27, 0 }
  0x74   : > { %s341_s14 = scalar_lea.vmem [#allocation13], %s4396_s11  ;;  %s4137_s10 = smov (!%p2898_p4), 32  }
  0x75   : > { %347 = sbr.rel (%p2898_p4) target bundleno = 523 (0x20b), region = 68  ;;  %s4138_s17 = smov (!%p2898_p4), 96  }
  0x76   : > { %s4139_s20 = smov (!%p2898_p4), 64  }
  0x7a   : > { %v3593_v0 = vld [vmem:[#allocation9 + $0x38] sm:$0xff]   ;;  %v4135_v1 = vmov 0.0   ;;  %v3595_v3 = vld [vmem:[#allocation9 + $0x30] sm:$0xff]   ;;  %vm4136_vm0 = vmmov 0   ;;  %v3597_v5 = vld [vmem:[#allocation9 + $0x28] sm:$0xff]   ;;  %v600_v30 = vlaneseq  ;;  %v4142_v35 = vmov 0  }
  0x7b   : > { %3054 = vmatprep.subr.bf16.mxu0 %v4135_v1  ;;  %3074 = vmatprep.subr.bf16.mxu1 %v4135_v1  ;;  %v3594_v2 = vld [vmem:[#allocation10 + $0x38] sm:$0xff]   ;;  %v3596_v4 = vld [vmem:[#allocation10 + $0x30] sm:$0xff]   ;;  %v3598_v6 = vld [vmem:[#allocation10 + $0x28] sm:$0xff]   ;;  %v4140_v28 = vmov 1983009808   ;;  %v4402_v36 = vpack.i.b16 %v4142_v35, %v4142_v35  ;;  %vm864_vm1 = vcmask 257024  }
  0x7c   : > { %3055 = vmatpush3.bf16.msra.mxu0 %v3593_v0  ;;  %3070 = vmatprep.mubr.msk.bf16.mxu0 %vm4136_vm0, %v4135_v1  ;;  %v3599_v7 = vld [vmem:[#allocation9 + $0x20] sm:$0xff]   ;;  %v3601_v9 = vld [vmem:[#allocation9 + $0x18] sm:$0xff]   ;;  %v3603_v11 = vld [vmem:[#allocation9 + $0x10] sm:$0xff]   ;;  %v598_v29 = vunpack.c.l.s4 %v4140_v28  ;;  %v4141_v31 = vmov 1934713408   ;;  %v601_v34 = vshrl.u32 %v600_v30, 7 }
  0x7d   : > { %3075 = vmatpush3.bf16.msra.mxu1 %v3594_v2  ;;  %3056 = vmatprep.subr.bf16.mxu0 %v4135_v1  ;;  %v3600_v8 = vld [vmem:[#allocation10 + $0x20] sm:$0xff]   ;;  %v3602_v10 = vld [vmem:[#allocation10 + $0x18] sm:$0xff]   ;;  %v3604_v12 = vld [vmem:[#allocation10 + $0x10] sm:$0xff]   ;;  %v629_v32 = vunpack.c.l.s4 %v4141_v31 }
  0x7e   : > { %3076 = vmatprep.subr.bf16.mxu1 %v4135_v1  ;;  %3090 = vmatprep.mubr.msk.bf16.mxu1 %vm4136_vm0, %v4135_v1  ;;  %v3605_v13 = vld [vmem:[#allocation9 + $0x8] sm:$0xff]   ;;  %v3607_v15 = vld [vmem:[#allocation9] sm:$0xff]   ;;  %v3609_v17 = vld [vmem:[%s297_s21] sm:$0xff]   ;;  %v599_v33 = vunpack.c.0.s8 %v598_v29 }
  0x7f   : > { %v3606_v14 = vld [vmem:[#allocation10 + $0x8] sm:$0xff]   ;;  %v3608_v16 = vld [vmem:[#allocation10] sm:$0xff]   ;;  %v630_v39 = vunpack.c.0.s8 %v629_v32 }
  0x80   : > { %3057 = vmatpush3.bf16.msra.mxu0 %v3595_v3  ;;  %v4404_v40 = vsub.s32 %v599_v33, %v601_v34 }
  0x81   : > { %3077 = vmatpush3.bf16.msra.mxu1 %v3596_v4  ;;  %3058 = vmatprep.subr.bf16.mxu0 %v4135_v1  ;;  %v4407_v48 = vsub.s32 %v630_v39, %v601_v34 }
  0x82   : > { %3078 = vmatprep.subr.bf16.mxu1 %v4135_v1 }
  0x84   : > { %3059 = vmatpush3.bf16.msra.mxu0 %v3597_v5 }
  0x85   : > { %3079 = vmatpush3.bf16.msra.mxu1 %v3598_v6  ;;  %3060 = vmatprep.subr.bf16.mxu0 %v4135_v1 }
  0x86   : > { %3080 = vmatprep.subr.bf16.mxu1 %v4135_v1 }
  0x88   : > { %3061 = vmatpush3.bf16.msra.mxu0 %v3599_v7 }
  0x89   : > { %3081 = vmatpush3.bf16.msra.mxu1 %v3600_v8  ;;  %3062 = vmatprep.subr.bf16.mxu0 %v4135_v1 }
  0x8a   : > { %3082 = vmatprep.subr.bf16.mxu1 %v4135_v1 }
  0x8c   : > { %3063 = vmatpush3.bf16.msra.mxu0 %v3601_v9 }
  0x8d   : > { %3083 = vmatpush3.bf16.msra.mxu1 %v3602_v10  ;;  %3064 = vmatprep.subr.bf16.mxu0 %v4135_v1 }
  0x8e   : > { %3084 = vmatprep.subr.bf16.mxu1 %v4135_v1 }
  0x90   : > { %3065 = vmatpush3.bf16.msra.mxu0 %v3603_v11 }
  0x91   : > { %3085 = vmatpush3.bf16.msra.mxu1 %v3604_v12  ;;  %3066 = vmatprep.subr.bf16.mxu0 %v4135_v1 }
  0x92   : > { %3086 = vmatprep.subr.bf16.mxu1 %v4135_v1 }
  0x94   : > { %3067 = vmatpush3.bf16.msra.mxu0 %v3605_v13 }
  0x95   : > { %3087 = vmatpush3.bf16.msra.mxu1 %v3606_v14  ;;  %3068 = vmatprep.subr.bf16.mxu0 %v4135_v1 }
  0x96   : > { %3088 = vmatprep.subr.bf16.mxu1 %v4135_v1 }
  0x98   : > { %3069 = vmatpush3.bf16.msra.mxu0 %v3607_v15 }
  0x99   : > { %3089 = vmatpush3.bf16.msra.mxu1 %v3608_v16 }
  0x9b   : > { %3071 = vmatmul.mubr.bf16.vlgmr.msra.gmra.mxu0 %v3609_v17 }
  0x9c   : > { %3091 = vmatmul.mubr.bf16.vlgmr.msra.gmra.mxu1 %v3609_v17 }
 0x15b   : > { %v454_v18 = vpop.f32.mrf.mxu0 }
 0x15c   : > { %v559_v19 = vpop.f32.mrf.mxu1 }
 0x15d   : > { %v3072_v20 = vpop.f32.mrf.mxu0 }
 0x15e   : > { %v3092_v21 = vpop.f32.mrf.mxu1 }
 0x15f   : > { %v457_v22 = vpop.f32.mrf.mxu0 }
 0x160   : > { %v566_v23 = vpack.c.bf16 %v457_v22, %v454_v18  ;;  %v562_v24 = vpop.f32.mrf.mxu1 }
 0x161   : > { %v3073_v25 = vpop.f32.mrf.mxu0  ;;  %v873_v27 = vpack.c.bf16 %v562_v24, %v559_v19 }
 0x162   : > { %v3093_v26 = vpop.f32.mrf.mxu1  ;;  %572 = vrot.lane.b32.xlu1 %v566_v23, %s4137_s10  ;;  %568 = vrot.lane.b32.xlu0 %v566_v23, %s4138_s17  ;;  %v578_v42 = vshrl.u32 %v566_v23, 16 }
 0x163   : > { %v885_v46 = vshrl.u32 %v873_v27, 16 }
 0x166   : > { %875 = vrot.lane.b32.xlu1 %v873_v27, %s4138_s17  ;;  %570 = vrot.lane.b32.xlu0 %v566_v23, %s4139_s20 }
 0x16a   : > { %879 = vrot.lane.b32.xlu1 %v873_v27, %s4137_s10  ;;  %877 = vrot.lane.b32.xlu0 %v873_v27, %s4139_s20 }
 0x1d4   : > { %v573_v37 = vpop.permute.xlu1 %572  ;;  %v569_v38 = vpop.permute.xlu0 %568 }
 0x1d5   : > { %v576_v41 = vpack.i.b16 %v569_v38, %v566_v23  ;;  %v579_v43 = vshrl.u32 %v569_v38, 16  ;;  %v587_v50 = vshrl.u32 %v573_v37, 16 }
 0x1d7   : > { %v580_v44 = vpack.i.b16 %v579_v43, %v578_v42  ;;  %v596_v45 = vcombine.high %v576_v41, %v4402_v36  ;;  %v603_v51 = vrot.slane %v576_v41, %v4404_v40 }
 0x1d8   : > { %v876_v47 = vpop.permute.xlu1 %875  ;;  %v571_v49 = vpop.permute.xlu0 %570 }
 0x1d9   : > { %v662_v52 = vcombine.high %v580_v44, %v4402_v36  ;;  %v883_v53 = vpack.i.b16 %v876_v47, %v873_v27  ;;  %v610_v54 = vrot.slane %v596_v45, %v4404_v40  ;;  %v886_v55 = vshrl.u32 %v876_v47, 16 }
 0x1da   : > { %v584_v56 = vpack.i.b16 %v573_v37, %v571_v49  ;;  %v586_v57 = vshrl.u32 %v571_v49, 16  ;;  %v669_v58 = vrot.slane %v580_v44, %v4404_v40 }
 0x1db   : > { %v676_v59 = vrot.slane %v662_v52, %v4404_v40  ;;  %v897_v60 = vcombine.high %v883_v53, %v4402_v36  ;;  %v4416_v61 = vrot.slane %v883_v53, %v4404_v40  ;;  %v887_v62 = vpack.i.b16 %v886_v55, %v885_v46 }
 0x1dc   : > { %v588_v63 = vpack.i.b16 %v587_v50, %v586_v57  ;;  %v611_v0 = vcombine.high %v584_v56, %v4402_v36  ;;  %v618_v1 = vrot.slane %v584_v56, %v4404_v40  ;;  %v880_v2 = vpop.permute.xlu1 %879  ;;  %v878_v3 = vpop.permute.xlu0 %877 }
 0x1dd   : > { %v4421_v4 = vrot.slane %v897_v60, %v4404_v40  ;;  %v894_v5 = vshrl.u32 %v880_v2, 16  ;;  %v891_v6 = vpack.i.b16 %v880_v2, %v878_v3  ;;  %v893_v7 = vshrl.u32 %v878_v3, 16 }
 0x1de   : > { %v963_v8 = vcombine.high %v887_v62, %v4402_v36  ;;  %v4425_v9 = vrot.slane %v887_v62, %v4404_v40  ;;  %v625_v10 = vrot.slane %v611_v0, %v4404_v40  ;;  %v626_v11 = vcombine.low %v603_v51, %v618_v1 }
 0x1df   : > { %v627_v12 = vcombine.high %v603_v51, %v618_v1  ;;  %v677_v13 = vcombine.high %v588_v63, %v4402_v36  ;;  %v684_v14 = vrot.slane %v588_v63, %v4404_v40  ;;  %v895_v15 = vpack.i.b16 %v894_v5, %v893_v7 }
 0x1e0   : > { %v4431_v16 = vrot.slane %v963_v8, %v4404_v40  ;;  %v634_v17 = vrot.slane %v626_v11, %v4407_v48  ;;  %v642_v18 = vcombine.low %v610_v54, %v625_v10  ;;  %v643_v19 = vcombine.high %v610_v54, %v625_v10 }
 0x1e1   : > { %v641_v20 = vrot.slane %v627_v12, %v4407_v48  ;;  %v691_v21 = vrot.slane %v677_v13, %v4404_v40  ;;  %v692_v22 = vcombine.low %v669_v58, %v684_v14  ;;  %v693_v23 = vcombine.high %v669_v58, %v684_v14 }
 0x1e2   : > { %v650_v24 = vrot.slane %v642_v18, %v4407_v48  ;;  %v657_v25 = vrot.slane %v643_v19, %v4407_v48  ;;  %v912_v26 = vcombine.high %v891_v6, %v4402_v36  ;;  %v919_v27 = vrot.slane %v891_v6, %v4404_v40 }
 0x1e3   : > { %v700_v28 = vrot.slane %v692_v22, %v4407_v48  ;;  %v707_v29 = vrot.slane %v693_v23, %v4407_v48  ;;  %v708_v30 = vcombine.low %v676_v59, %v691_v21  ;;  %v709_v31 = vcombine.high %v676_v59, %v691_v21 }
 0x1e4   : > { %v728_v32 = vcombine.low %v634_v17, %v641_v20  ;;  %v2916_v33 = vcombine.high %v634_v17, %v641_v20  ;;  %v744_v34 = vcombine.low %v650_v24, %v657_v25  ;;  %v2917_v35 = vcombine.high %v650_v24, %v657_v25 }
 0x1e5   : > { %v716_v37 = vrot.slane %v708_v30, %v4407_v48  ;;  %v723_v38 = vrot.slane %v709_v31, %v4407_v48  ;;  %v778_v39 = vcombine.low %v700_v28, %v707_v29  ;;  %v2918_v41 = vcombine.high %v700_v28, %v707_v29 }
 0x1e6   : > { %v735_v42 = vrot.slane %v728_v32, %v4404_v40  ;;  %v743_v43 = vrot.slane %v2916_v33, %v4404_v40  ;;  %v751_v44 = vrot.slane %v744_v34, %v4404_v40  ;;  %v759_v45 = vrot.slane %v2917_v35, %v4404_v40 }
 0x1e7   : > { %v785_v46 = vrot.slane %v778_v39, %v4404_v40  ;;  %v793_v47 = vrot.slane %v2918_v41, %v4404_v40  ;;  %v794_v49 = vcombine.low %v716_v37, %v723_v38  ;;  %v2919_v50 = vcombine.high %v716_v37, %v723_v38 }
 0x1e8   : > { %v760_v51 = vcombine.low %v735_v42, %v743_v43  ;;  %v768_v52 = vcombine.low %v751_v44, %v759_v45  ;;  %v926_v53 = vrot.slane %v912_v26, %v4404_v40  ;;  %v927_v54 = vcombine.low %v4416_v61, %v919_v27 }
 0x1e9   : > { %v801_v55 = vrot.slane %v794_v49, %v4404_v40  ;;  %v809_v56 = vrot.slane %v2919_v50, %v4404_v40  ;;  %v810_v57 = vcombine.low %v785_v46, %v793_v47  ;;  %v928_v58 = vcombine.high %v4416_v61, %v919_v27 }
 0x1ea   : > { %v767_v59 = vrot.slane %v760_v51, %v4407_v48  ;;  %v775_v60 = vrot.slane %v768_v52, %v4407_v48  ;;  %v935_v62 = vrot.slane %v927_v54, %v4407_v48  ;;  %v943_v63 = vcombine.low %v4421_v4, %v926_v53 }
 0x1eb   : > { %v817_v0 = vrot.slane %v810_v57, %v4407_v48  ;;  %v818_v1 = vcombine.low %v801_v55, %v809_v56  ;;  %v942_v2 = vrot.slane %v928_v58, %v4407_v48  ;;  %v944_v3 = vcombine.high %v4421_v4, %v926_v53 }
 0x1ec   : > { %v776_v5 = vcombine.low %v767_v59, %v775_v60  ;;  %v777_v6 = vcombine.high %v767_v59, %v775_v60  ;;  %v951_v61 = vrot.slane %v943_v63, %v4407_v48  ;;  %v978_v7 = vcombine.high %v895_v15, %v4402_v36 }
 0x1ed   : > { %v825_v8 = vrot.slane %v818_v1, %v4407_v48  ;;  %v958_v10 = vrot.slane %v944_v3, %v4407_v48  ;;  %v985_v11 = vrot.slane %v895_v15, %v4404_v40  ;;  %v1029_v12 = vcombine.low %v935_v62, %v942_v2 }
 0x1ee   : > { %v831_v13 = vshrl.u32 %v776_v5, 16  ;;  %v837_v14 = vshrl.u32 %v777_v6, 16  ;;  %v992_v17 = vrot.slane %v978_v7, %v4404_v40  ;;  %v2928_v18 = vcombine.high %v935_v62, %v942_v2 }
 0x1ef   : > { %v826_v19 = vcombine.low %v817_v0, %v825_v8  ;;  %v827_v4 = vcombine.high %v817_v0, %v825_v8  ;;  %v993_v20 = vcombine.low %v4425_v9, %v985_v11  ;;  %v994_v21 = vcombine.high %v4425_v9, %v985_v11 }
 0x1f0   : > { %v1009_v36 = vcombine.low %v4431_v16, %v992_v17  ;;  %v1010_v22 = vcombine.high %v4431_v16, %v992_v17  ;;  %v1036_v23 = vrot.slane %v1029_v12, %v4404_v40  ;;  %v1044_v15 = vrot.slane %v2928_v18, %v4404_v40 }
 0x1f1   : > { %v830_v24 = vpack.i.b16 %v826_v19, %v776_v5  ;;  %v832_v25 = vshrl.u32 %v826_v19, 16  ;;  %v836_v26 = vpack.i.b16 %v827_v4, %v777_v6  ;;  %v838_v27 = vshrl.u32 %v827_v4, 16 }
 0x1f2   : > { %v1001_v28 = vrot.slane %v993_v20, %v4407_v48  ;;  %v1008_v29 = vrot.slane %v994_v21, %v4407_v48  ;;  %v1017_v30 = vrot.slane %v1009_v36, %v4407_v48  ;;  %v1024_v9 = vrot.slane %v1010_v22, %v4407_v48 }
 0x1f3   : > { %v833_v31 = vpack.i.b16 %v832_v25, %v831_v13  ;;  %v839_v32 = vpack.i.b16 %v838_v27, %v837_v14  ;;  %v2920_v33 = vcombine.low %v830_v24, %v830_v24  ;;  %v2921_v16 = vcombine.high %v830_v24, %v830_v24 }
 0x1f4   : > { %v2924_v34 = vcombine.low %v836_v26, %v836_v26  ;;  %v2925_v35 = vcombine.high %v836_v26, %v836_v26  ;;  %v1045_v37 = vcombine.low %v951_v61, %v958_v10  ;;  %v2929_v38 = vcombine.high %v951_v61, %v958_v10 }
 0x1f5   : > { %v2922_v39 = vcombine.low %v833_v31, %v833_v31  ;;  %v2923_v41 = vcombine.high %v833_v31, %v833_v31  ;;  %v2926_v42 = vcombine.low %v839_v32, %v839_v32  ;;  %v2927_v43 = vcombine.high %v839_v32, %v839_v32  ;;  %865 = vst.msk [vmem:[#allocation2] sm:$0xf] %vm864_vm1, %v2920_v33 }
 0x1f6   : > { %866 = vst.msk [vmem:[#allocation2 + $0x4] sm:$0xf] %vm864_vm1, %v2921_v16  ;;  %869 = vst.msk [vmem:[#allocation2 + $0x10] sm:$0xf] %vm864_vm1, %v2924_v34  ;;  %v1052_v44 = vrot.slane %v1045_v37, %v4404_v40  ;;  %v1060_v45 = vrot.slane %v2929_v38, %v4404_v40  ;;  %v1061_v46 = vcombine.low %v1036_v23, %v1044_v15 }
 0x1f7   : > { %870 = vst.msk [vmem:[#allocation2 + $0x14] sm:$0xf] %vm864_vm1, %v2925_v35  ;;  %v1079_v47 = vcombine.low %v1001_v28, %v1008_v29  ;;  %867 = vst.msk [vmem:[#allocation2 + $0x8] sm:$0xf] %vm864_vm1, %v2922_v39  ;;  %v2930_v49 = vcombine.high %v1001_v28, %v1008_v29  ;;  %v1095_v50 = vcombine.low %v1017_v30, %v1024_v9 }
 0x1f8   : > { %868 = vst.msk [vmem:[#allocation2 + $0xc] sm:$0xf] %vm864_vm1, %v2923_v41  ;;  %871 = vst.msk [vmem:[#allocation2 + $0x18] sm:$0xf] %vm864_vm1, %v2926_v42  ;;  %v2931_v51 = vcombine.high %v1017_v30, %v1024_v9  ;;  %v1069_v52 = vcombine.low %v1052_v44, %v1060_v45  ;;  %v1068_v57 = vrot.slane %v1061_v46, %v4407_v48 }
 0x1f9   : > { %872 = vst.msk [vmem:[#allocation2 + $0x1c] sm:$0xf] %vm864_vm1, %v2927_v43  ;;  %v1086_v53 = vrot.slane %v1079_v47, %v4404_v40  ;;  %v1094_v54 = vrot.slane %v2930_v49, %v4404_v40  ;;  %v1102_v55 = vrot.slane %v1095_v50, %v4404_v40 }
 0x1fa   : > { %v1110_v56 = vrot.slane %v2931_v51, %v4404_v40  ;;  %v1076_v58 = vrot.slane %v1069_v52, %v4407_v48 }
 0x1fb   : > { %v1111_v59 = vcombine.low %v1086_v53, %v1094_v54 }
 0x1fc   : > { %v1119_v60 = vcombine.low %v1102_v55, %v1110_v56  ;;  %v1077_v62 = vcombine.low %v1068_v57, %v1076_v58  ;;  %v1078_v63 = vcombine.high %v1068_v57, %v1076_v58 }
 0x1fd   : > { %v1118_v0 = vrot.slane %v1111_v59, %v4407_v48 }
 0x1fe   : > { %v1126_v1 = vrot.slane %v1119_v60, %v4407_v48  ;;  %v1132_v5 = vshrl.u32 %v1077_v62, 16  ;;  %v1138_v6 = vshrl.u32 %v1078_v63, 16 }
 0x200   : > { %v1127_v2 = vcombine.low %v1118_v0, %v1126_v1  ;;  %v1128_v3 = vcombine.high %v1118_v0, %v1126_v1 }
 0x202   : > { %v1131_v61 = vpack.i.b16 %v1127_v2, %v1077_v62  ;;  %v1133_v7 = vshrl.u32 %v1127_v2, 16  ;;  %v1137_v8 = vpack.i.b16 %v1128_v3, %v1078_v63  ;;  %v1139_v40 = vshrl.u32 %v1128_v3, 16 }
 0x204   : > { %v1134_v10 = vpack.i.b16 %v1133_v7, %v1132_v5  ;;  %v1140_v11 = vpack.i.b16 %v1139_v40, %v1138_v6  ;;  %v2932_v12 = vcombine.low %v1131_v61, %v1131_v61  ;;  %v2933_v13 = vcombine.high %v1131_v61, %v1131_v61 }
 0x205   : > { %v2936_v14 = vcombine.low %v1137_v8, %v1137_v8  ;;  %v2937_v17 = vcombine.high %v1137_v8, %v1137_v8 }
 0x206   : > { %v2934_v18 = vcombine.low %v1134_v10, %v1134_v10  ;;  %v2935_v19 = vcombine.high %v1134_v10, %v1134_v10  ;;  %v2938_v4 = vcombine.low %v1140_v11, %v1140_v11  ;;  %v2939_v20 = vcombine.high %v1140_v11, %v1140_v11  ;;  %1165 = vst.msk [vmem:[#allocation3] sm:$0xf] %vm864_vm1, %v2932_v12 }
 0x207   : > { %1166 = vst.msk [vmem:[#allocation3 + $0x4] sm:$0xf] %vm864_vm1, %v2933_v13  ;;  %1169 = vst.msk [vmem:[#allocation3 + $0x10] sm:$0xf] %vm864_vm1, %v2936_v14 }
 0x208   : > { %1170 = vst.msk [vmem:[#allocation3 + $0x14] sm:$0xf] %vm864_vm1, %v2937_v17  ;;  %1167 = vst.msk [vmem:[#allocation3 + $0x8] sm:$0xf] %vm864_vm1, %v2934_v18 }
 0x209   : > { %1168 = vst.msk [vmem:[#allocation3 + $0xc] sm:$0xf] %vm864_vm1, %v2935_v19  ;;  %1171 = vst.msk [vmem:[#allocation3 + $0x18] sm:$0xf] %vm864_vm1, %v2938_v4 }
 0x20a   : > { %1172 = vst.msk [vmem:[#allocation3 + $0x1c] sm:$0xf] %vm864_vm1, %v2939_v20 }
 0x20b PF: > { %v3610_v48 = vld [vmem:[#allocation7 + $0x38] sm:$0xff]   ;;  %v4143_v21 = vmov 0.0   ;;  %v3611_v36 = vld [vmem:[#allocation7 + $0x30] sm:$0xff]   ;;  %vm4144_vm2 = vmmov 0   ;;  %v3612_v22 = vld [vmem:[#allocation7 + $0x28] sm:$0xff]   ;;  %s1173_s15 = sshra.s32 %s2897_s6, 3  ;;  %v1293_v16 = vlaneseq }
 0x20c   : > { %3094 = vmatprep.subr.bf16.mxu0 %v4143_v21  ;;  %3110 = vmatprep.mubr.msk.bf16.mxu0 %vm4144_vm2, %v4143_v21  ;;  %v3613_v23 = vld [vmem:[#allocation7 + $0x20] sm:$0xff]   ;;  %v3614_v15 = vld [vmem:[#allocation7 + $0x18] sm:$0xff]   ;;  %v3615_v24 = vld [vmem:[#allocation7 + $0x10] sm:$0xff]   ;;  %s4515_s9 = sshll.u32 %s1173_s15, 2  ;;  %s4145_s3 = smov 32   ;;  %v4150_v57 = vmov 0  }
 0x20d   : > { %3095 = vmatpush3.bf16.msra.mxu0 %v3610_v48  ;;  %v3616_v25 = vld [vmem:[#allocation7 + $0x8] sm:$0xff]   ;;  %v3617_v26 = vld [vmem:[#allocation7] sm:$0xff]   ;;  %s1176_s13 = scalar_lea.vmem %s297_s21, %s4515_s9 [#allocation4]  ;;  %s4146_s4 = smov 96   ;;  %v4148_v32 = vmov 1983009808   ;;  %v4525_v38 = vshrl.u32 %v1293_v16, 7 }
 0x20e   : > { %3096 = vmatprep.subr.bf16.mxu0 %v4143_v21  ;;  %v1177_v27 = vld [vmem:[%s1176_s13] sm:$0xf]  ;;  %s4147_s29 = smov 64   ;;  %v1291_v33 = vunpack.c.l.s4 %v4148_v32  ;;  %v4149_v34 = vmov 1934713408   ;;  %p2949_p1 = scmp.le.s32.totalorder %s4010_s27, 0 }
 0x20f   : > { %v1308_v35 = vunpack.c.l.s4 %v4149_v34  ;;  %s4610_s24 = smov (!%p2949_p1), 0  }
 0x210   : > { %v1292_v37 = vunpack.c.0.s8 %v1291_v33 }
 0x211   : > { %3097 = vmatpush3.bf16.msra.mxu0 %v3611_v36  ;;  %v1309_v39 = vunpack.c.0.s8 %v1308_v35 }
 0x212   : > { %3098 = vmatprep.subr.bf16.mxu0 %v4143_v21  ;;  %v4528_v41 = vsub.s32 %v1292_v37, %v4525_v38 }
 0x213   : > { %v4532_v45 = vsub.s32 %v1309_v39, %v4525_v38  ;;  %v4562_v39 = vmov 0.0  }
 0x215   : > { %3099 = vmatpush3.bf16.msra.mxu0 %v3612_v22 }
 0x216   : > { %3100 = vmatprep.subr.bf16.mxu0 %v4143_v21 }
 0x219   : > { %3101 = vmatpush3.bf16.msra.mxu0 %v3613_v23 }
 0x21a   : > { %3102 = vmatprep.subr.bf16.mxu0 %v4143_v21 }
 0x21d   : > { %3103 = vmatpush3.bf16.msra.mxu0 %v3614_v15 }
 0x21e   : > { %3104 = vmatprep.subr.bf16.mxu0 %v4143_v21 }
 0x221   : > { %3105 = vmatpush3.bf16.msra.mxu0 %v3615_v24 }
 0x222   : > { %3106 = vmatprep.subr.bf16.mxu0 %v4143_v21 }
 0x225   : > { %3107 = vmatpush3.bf16.msra.mxu0 %v3616_v25 }
 0x226   : > { %3108 = vmatprep.subr.bf16.mxu0 %v4143_v21 }
 0x229   : > { %3109 = vmatpush3.bf16.msra.mxu0 %v3617_v26 }
 0x22c   : > { %3111 = vmatmul.mubr.bf16.vlgmr.msra.gmra.mxu0 %v1177_v27 }
 0x2ec   : > { %v1276_v28 = vpop.f32.mrf.mxu0 }
 0x2ed   : > { %v1282_v29 = vpack.c.bf16 %v1276_v28, %v1276_v28 }
 0x2ee   : > { %v3112_v30 = vpop.f32.mrf.mxu0 }
 0x2ef   : > { %1288 = vrot.lane.b32.xlu1 %v1282_v29, %s4145_s3  ;;  %1284 = vrot.lane.b32.xlu0 %v1282_v29, %s4146_s4  ;;  %v1296_v53 = vrot.slane %v1282_v29, %v4528_v41 }
 0x2f0   : > { %v1279_v9 = vpop.f32.mrf.mxu0 }
 0x2f2   : > { %v3113_v31 = vpop.f32.mrf.mxu0 }
 0x2f3   : > { %1286 = vrot.lane.b32.xlu0 %v1282_v29, %s4147_s29 }
 0x361   : > { %v1289_v42 = vpop.permute.xlu1 %1288  ;;  %v1285_v43 = vpop.permute.xlu0 %1284 }
 0x362   : > { %v1338_v44 = vrot.slane %v1289_v42, %v4528_v41  ;;  %v1330_v46 = vrot.slane %v1285_v43, %v4528_v41  ;;  %v4564_v42 = vmov 0.0   ;;  %v4566_v43 = vmov 0.0  }
 0x364   : > { %v1339_v47 = vcombine.low %v1330_v46, %v1338_v44  ;;  %v1340_v49 = vcombine.high %v1330_v46, %v1338_v44  ;;  %v4568_v44 = vmov 0.0   ;;  %v4570_v46 = vmov 0.0  }
 0x365   : > { %v1287_v50 = vpop.permute.xlu0 %1286 }
 0x366   : > { %v1347_v51 = vrot.slane %v1339_v47, %v4532_v45  ;;  %v1304_v52 = vrot.slane %v1287_v50, %v4528_v41  ;;  %v1354_v54 = vrot.slane %v1340_v49, %v4532_v45  ;;  %v4572_v47 = vmov 0.0  }
 0x367   : > { %v4574_v49 = vmov 0.0   ;;  %v4576_v50 = vmov 0.0  }
 0x368   : > { %v1305_v55 = vcombine.low %v1296_v53, %v1304_v52  ;;  %v1306_v56 = vcombine.high %v1296_v53, %v1304_v52  ;;  %v1355_v58 = vcombine.high %v1347_v51, %v4150_v57  ;;  %v1356_v62 = vcombine.high %v1354_v54, %v4150_v57 }
 0x369   : > { %v1362_v63 = vshrl.u32 %v1347_v51, 16  ;;  %v1378_v6 = vshrl.u32 %v1354_v54, 16  ;;  %v4580_v52 = vmov -inf   ;;  %v4582_v53 = vmov -inf  }
 0x36a   : > { %v1313_v59 = vrot.slane %v1305_v55, %v4532_v45  ;;  %v1320_v60 = vrot.slane %v1306_v56, %v4532_v45  ;;  %v1370_v5 = vshrl.u32 %v1355_v58, 16  ;;  %v1386_v12 = vshrl.u32 %v1356_v62, 16 }
 0x36c   : > { %v1321_v0 = vcombine.high %v1313_v59, %v4150_v57  ;;  %v1322_v1 = vcombine.high %v1320_v60, %v4150_v57  ;;  %v1359_v2 = vpack.i.b16 %v1347_v51, %v1313_v59  ;;  %v1361_v3 = vshrl.u32 %v1313_v59, 16 }
 0x36d   : > { %v1375_v61 = vpack.i.b16 %v1354_v54, %v1320_v60  ;;  %v1377_v7 = vshrl.u32 %v1320_v60, 16  ;;  %v4578_v51 = vmov -inf   ;;  %v4584_v54 = vmov -inf  }
 0x36e   : > { %v1363_v8 = vpack.i.b16 %v1362_v63, %v1361_v3  ;;  %v1367_v40 = vpack.i.b16 %v1355_v58, %v1321_v0  ;;  %v1369_v10 = vshrl.u32 %v1321_v0, 16  ;;  %v1383_v11 = vpack.i.b16 %v1356_v62, %v1322_v1 }
 0x36f   : > { %v1379_v13 = vpack.i.b16 %v1378_v6, %v1377_v7  ;;  %v1385_v14 = vshrl.u32 %v1322_v1, 16  ;;  %v1389_v17 = vcombine.low %v1359_v2, %v1375_v61 }
 0x370   : > { %v1371_v18 = vpack.i.b16 %v1370_v5, %v1369_v10  ;;  %v1397_v19 = vcombine.low %v1367_v40, %v1383_v11 }
 0x371   : > { %v1387_v4 = vpack.i.b16 %v1386_v12, %v1385_v14  ;;  %v1414_v20 = vcombine.low %v1363_v8, %v1379_v13  ;;  %v1396_v48 = vrot.slane %v1389_v17, %v4528_v41 }
 0x372   : > { %v1404_v36 = vrot.slane %v1397_v19, %v4528_v41 }
 0x373   : > { %v1422_v22 = vcombine.low %v1371_v18, %v1387_v4  ;;  %v1421_v15 = vrot.slane %v1414_v20, %v4528_v41 }
 0x374   : > { %v1405_v23 = vcombine.low %v1396_v48, %v1404_v36 }
 0x375   : > { %v1429_v24 = vrot.slane %v1422_v22, %v4528_v41 }
 0x376   : > { %v1412_v25 = vrot.slane %v1405_v23, %v4532_v45 }
 0x377   : > { %v1430_v26 = vcombine.low %v1421_v15, %v1429_v24 }
 0x378   : > { %v1413_v27 = vcombine.high %v1412_v25, %v4150_v57  ;;  %v1442_v9 = vshrl.u32 %v1412_v25, 16 }
 0x379   : > { %v1437_v28 = vrot.slane %v1430_v26, %v4532_v45 }
 0x37a   : > { %v1448_v34 = vshrl.u32 %v1413_v27, 16 }
 0x37b   : > { %v1438_v29 = vcombine.high %v1437_v28, %v4150_v57  ;;  %v4553_v30 = vpack.i.b16 %v1437_v28, %v1412_v25  ;;  %v1443_v31 = vshrl.u32 %v1437_v28, 16  ;;  %2781 = sbr.rel (%p2949_p1) target bundleno = 1477 (0x5c5), region = 115 }
 0x37d   : > { %v4555_v32 = vpack.i.b16 %v1443_v31, %v1442_v9  ;;  %v4557_v33 = vpack.i.b16 %v1438_v29, %v1413_v27  ;;  %v1449_v35 = vshrl.u32 %v1438_v29, 16 }
 0x37f   : > { %v4559_v37 = vpack.i.b16 %v1449_v35, %v1448_v34 }
 0x380   : > { %v4586_v55 = vmov 0.0   ;;  %v4588_v56 = vmov 0.0   ;;  %v4590_v58 = vmov 0.0   ;;  %v4592_v59 = vmov 0.0  }
 0x381   : > { %v4594_v60 = vmov 0.0   ;;  %v4596_v62 = vmov 0.0   ;;  %v4598_v63 = vmov 0.0   ;;  %v4600_v0 = vmov 0.0  }
 0x382   : > { %v4602_v1 = vmov -inf   ;;  %v4604_v2 = vmov -inf   ;;  %v4606_v3 = vmov -inf   ;;  %v4608_v5 = vmov -inf  }
 0x383 LB: >> { %v4151_v6 = vmov 0.0   ;;  %s2950_s1 = sshll.u32 %s4078_s24, 3  ;;  %vm4152_vm3 = vmmov 0   ;;  %vm1484_vm4 = vcmask 261120   ;;  %vm1669_vm5 = vcmask 64512   ;;  %s1454_s24 = sadd.s32 1, %s4078_s24   ;;  %s4078_s24 = sphi %s4610_s24, %s1454_s24   ;;  %v4074_v5 = vphi %v4608_v5, %v5085_v5   ;;  %v4070_v3 = vphi %v4606_v3, %v5084_v3   ;;  %v4066_v2 = vphi %v4604_v2, %v5083_v2   ;;  %v4062_v1 = vphi %v4602_v1, %v5082_v1   ;;  %v4058_v0 = vphi %v4600_v0, %v5081_v0   ;;  %v4054_v63 = vphi %v4598_v63, %v5080_v63   ;;  %v4050_v62 = vphi %v4596_v62, %v5079_v62   ;;  %v4046_v60 = vphi %v4594_v60, %v5078_v60   ;;  %v4042_v59 = vphi %v4592_v59, %v5077_v59   ;;  %v4038_v58 = vphi %v4590_v58, %v5076_v58   ;;  %v4034_v56 = vphi %v4588_v56, %v5075_v56   ;;  %v4030_v55 = vphi %v4586_v55, %v5074_v55  }
 0x384   : >> { %3114 = vmatprep.subr.bf16.mxu0 %v4151_v6  ;;  %3120 = vmatprep.subr.bf16.mxu1 %v4151_v6  ;;  %s4658_s19 = sshra.s32 %s2950_s1, 3  ;;  %vm1741_vm6 = vcmask 1043456   ;;  %p4741_p11 = scmp.ge.s32.totalorder %s1454_s24, %s4010_s27 }
 0x385   : >> { %3116 = vmatprep.mubr.msk.bf16.mxu0 %vm4152_vm3, %v4151_v6  ;;  %3122 = vmatprep.mubr.msk.bf16.mxu1 %vm4152_vm3, %v4151_v6  ;;  %s2951_s18 = sshll.u32 %s4658_s19, 2 }
 0x386   : >> { %s1473_s21 = scalar_lea.vmem [#allocation2], %s2951_s18  ;;  %s1479_s6 = scalar_lea.vmem [#allocation3], %s2951_s18 }
 0x387   : >> { %v1474_v61 = vld [vmem:[%s1473_s21] sm:$0xf]  ;;  %v1475_v7 = vld [vmem:[%s1473_s21 + $0x8] sm:$0xf]  ;;  %v1476_v10 = vld [vmem:[%s1473_s21 + $0x10] sm:$0xf] }
 0x388   : >> { %v1489_v8 = vsel %vm1484_vm4, %v1474_v61, 0  ;;  %v1535_v40 = vsel %vm1484_vm4, %v1475_v7, 0  ;;  %v1477_v11 = vld [vmem:[%s1473_s21 + $0x18] sm:$0xf]  ;;  %v1581_v12 = vsel %vm1484_vm4, %v1476_v10, 0 }
 0x389   : >> { %3115 = vmatpush3.bf16.xpose.msra.mxu0 %v1489_v8  ;;  %3121 = vmatpush3.bf16.xpose.msra.mxu1 %v1535_v40  ;;  %v1627_v13 = vsel %vm1484_vm4, %v1477_v11, 0  ;;  %v1480_v35 = vld [vmem:[%s1479_s6] sm:$0xf]  ;;  %v1481_v42 = vld [vmem:[%s1479_s6 + $0x8] sm:$0xf] }
 0x38a   : >> { %3126 = vmatprep.subr.bf16.mxu0 %v4151_v6  ;;  %3132 = vmatprep.subr.bf16.mxu1 %v4151_v6  ;;  %v1743_v39 = vsel %vm1741_vm6, %v1480_v35, 0  ;;  %v1789_v43 = vsel %vm1741_vm6, %v1481_v42, 0  ;;  %v1482_v44 = vld [vmem:[%s1479_s6 + $0x10] sm:$0xf]  ;;  %v1483_v47 = vld [vmem:[%s1479_s6 + $0x18] sm:$0xf] }
 0x38b   : >> { %v1835_v46 = vsel %vm1741_vm6, %v1482_v44, 0  ;;  %v1881_v49 = vsel %vm1741_vm6, %v1483_v47, 0 }
 0x390   : >> { %3117 = vmatmul.mubr.msk.bf16.vlgmr.msra.gmra.mxu0 %vm1484_vm4, %v4553_v30  ;;  %3123 = vmatmul.mubr.msk.bf16.vlgmr.msra.gmra.mxu1 %vm1484_vm4, %v4555_v32 }
 0x391   : >> { %3127 = vmatpush3.bf16.xpose.msra.mxu0 %v1581_v12  ;;  %3133 = vmatpush3.bf16.xpose.msra.mxu1 %v1627_v13 }
 0x392   : >> { %3128 = vmatprep.mubr.msk.bf16.mxu0 %vm4152_vm3, %v4151_v6  ;;  %3134 = vmatprep.mubr.msk.bf16.mxu1 %vm4152_vm3, %v4151_v6 }
 0x393   : >> { %3138 = vmatprep.subr.bf16.mxu0 %v4151_v6  ;;  %3144 = vmatprep.subr.bf16.mxu1 %v4151_v6 }
 0x398   : >> { %3129 = vmatmul.mubr.msk.bf16.vlgmr.msra.gmra.mxu0 %vm1484_vm4, %v4557_v33  ;;  %3135 = vmatmul.mubr.msk.bf16.vlgmr.msra.gmra.mxu1 %vm1484_vm4, %v4559_v37 }
 0x399   : >> { %3140 = vmatprep.mubr.msk.bf16.mxu0 %vm4152_vm3, %v4151_v6  ;;  %3146 = vmatprep.mubr.msk.bf16.mxu1 %vm4152_vm3, %v4151_v6 }
 0x39a   : >> { %3139 = vmatpush3.bf16.msra.mxu0 %v1743_v39  ;;  %3145 = vmatpush3.bf16.msra.mxu1 %v1789_v43 }
 0x39b   : >> { %3150 = vmatprep.subr.bf16.mxu0 %v4151_v6  ;;  %3156 = vmatprep.subr.bf16.mxu1 %v4151_v6 }
 0x450   : >> { %v1525_v14 = vpop.f32.mrf.mxu0  ;;  %v1571_v17 = vpop.f32.mrf.mxu1 }
 0x451   : >> { %v1670_v18 = vsel %vm1669_vm5, %v1525_v14, -inf  ;;  %v1673_v20 = vsel %vm1669_vm5, %v1571_v17, -inf }
 0x452   : >> { %v3124_v19 = vpop.f32.mrf.mxu1  ;;  %1671 = vmax.xlane.f32.xlu0 %v1670_v18  ;;  %v3118_v4 = vpop.f32.mrf.mxu0 }
 0x454   : >> { %v1528_v48 = vpop.f32.mrf.mxu0  ;;  %v1574_v36 = vpop.f32.mrf.mxu1 }
 0x456   : >> { %v3125_v22 = vpop.f32.mrf.mxu1  ;;  %1674 = vmax.xlane.f32.xlu0 %v1673_v20  ;;  %v3119_v23 = vpop.f32.mrf.mxu0 }
 0x458   : >> { %v1617_v15 = vpop.f32.mrf.mxu0  ;;  %v1663_v24 = vpop.f32.mrf.mxu1 }
 0x459   : >> { %v1676_v25 = vsel %vm1669_vm5, %v1617_v15, -inf  ;;  %v1679_v28 = vsel %vm1669_vm5, %v1663_v24, -inf }
 0x45a   : >> { %v3136_v26 = vpop.f32.mrf.mxu1  ;;  %1677 = vmax.xlane.f32.xlu1 %v1676_v25  ;;  %v3130_v27 = vpop.f32.mrf.mxu0 }
 0x45c   : >> { %v1620_v29 = vpop.f32.mrf.mxu0  ;;  %v1666_v9 = vpop.f32.mrf.mxu1 }
 0x45e   : >> { %v3137_v31 = vpop.f32.mrf.mxu1  ;;  %1680 = vmax.xlane.f32.xlu1 %v1679_v28  ;;  %v3131_v34 = vpop.f32.mrf.mxu0 }
 0x4db   : >> { %v1672_v50 = vpop.xlane.xlu0 %1671 }
 0x4dc   : >> { %v4696_v51 = vmax.f32 %v4074_v5, %v1672_v50  }
 0x4de   : >> { %v5072_v54 = vmov %v4696_v51 }
 0x4df   : >> { %v1686_v52 = vsub.f32 %v4074_v5, %v5072_v54  ;;  %v1698_v53 = vsub.f32 %v1525_v14, %v5072_v54  ;;  %v1675_v61 = vpop.xlane.xlu0 %1674 }
 0x4e0   : >> { %v4702_v8 = vmax.f32 %v4070_v3, %v1675_v61  }
 0x4e1   : >> { %v1702_v7 = vmul.f32 1.442695, %v1698_v53  ;;  %v1690_v29 = vmul.f32 1.442695, %v1686_v52 }
 0x4e2   : >> { %v1687_v40 = vsub.f32 %v4070_v3, %v4702_v8  ;;  %v1699_v10 = vsub.f32 %v1571_v17, %v4702_v8 }
 0x4e3   : >> { %3618 = vpow2.f32 %v1702_v7  ;;  %v1678_v11 = vpop.xlane.xlu1 %1677 }
 0x4e4   : >> { %v1704_v12 = vmul.f32 1.442695, %v1699_v10  ;;  %v4708_v13 = vmax.f32 %v4066_v2, %v1678_v11   ;;  %v1692_v9 = vmul.f32 1.442695, %v1687_v40 }
 0x4e6   : >> { %v1688_v5 = vsub.f32 %v4066_v2, %v4708_v13  ;;  %v1700_v14 = vsub.f32 %v1617_v15, %v4708_v13  ;;  %3620 = vpow2.f32 %v1704_v12 }
 0x4e7   : >> { %v1681_v18 = vpop.xlane.xlu1 %1680 }
 0x4e8   : >> { %v1706_v19 = vmul.f32 1.442695, %v1700_v14  ;;  %v4714_v4 = vmax.f32 %v4062_v1, %v1681_v18   ;;  %v1694_v31 = vmul.f32 1.442695, %v1688_v5 }
 0x4ea   : >> { %v1689_v3 = vsub.f32 %v4062_v1, %v4714_v4  ;;  %v1701_v17 = vsub.f32 %v1663_v24, %v4714_v4  ;;  %3622 = vpow2.f32 %v1706_v19 }
 0x4ec   : >> { %v1708_v20 = vmul.f32 1.442695, %v1701_v17 }
 0x4ee   : >> { %3624 = vpow2.f32 %v1708_v20 }
 0x4ef   : >> { %3626 = vpow2.f32 %v1690_v29 }
 0x4f0   : >> { %v3619_v48 = vpop.eup %3618  ;;  %3628 = vpow2.f32 %v1692_v9 }
 0x4f1   : >> { %v1714_v36 = vsel %vm1669_vm5, %v3619_v48, 0.0  ;;  %v1734_v2 = vpack.c.bf16 %v3619_v48, %v3619_v48  ;;  %3630 = vpow2.f32 %v1694_v31 }
 0x4f2   : >> { %1715 = vadd.xlane.f32.xlu0 %v1714_v36 }
 0x4f3   : >> { %3141 = vmatmul.mubr.msk.bf16.vlgmr.msra.gmra.mxu0 %vm1669_vm5, %v1734_v2  ;;  %v3621_v22 = vpop.eup %3620 }
 0x4f4   : >> { %3151 = vmatpush3.bf16.msra.mxu0 %v1835_v46  ;;  %3152 = vmatprep.mubr.msk.bf16.mxu0 %vm4152_vm3, %v4151_v6  ;;  %v1717_v23 = vsel %vm1669_vm5, %v3621_v22, 0.0  ;;  %v1735_v1 = vpack.c.bf16 %v3621_v22, %v3621_v22 }
 0x4f5   : >> { %1718 = vadd.xlane.f32.xlu1 %v1717_v23 }
 0x4f6   : >> { %3147 = vmatmul.mubr.msk.bf16.vlgmr.msra.gmra.mxu1 %vm1669_vm5, %v1735_v1 }
 0x4f7   : >> { %v3623_v15 = vpop.eup %3622  ;;  %3157 = vmatpush3.bf16.msra.mxu1 %v1881_v49  ;;  %3158 = vmatprep.mubr.msk.bf16.mxu1 %vm4152_vm3, %v4151_v6  ;;  %v1696_v6 = vmul.f32 1.442695, %v1689_v3 }
 0x4f8   : >> { %v1720_v24 = vsel %vm1669_vm5, %v3623_v15, 0.0  ;;  %v1736_v25 = vpack.c.bf16 %v3623_v15, %v3623_v15 }
 0x4f9   : >> { %1721 = vadd.xlane.f32.xlu0 %v1720_v24  ;;  %3632 = vpow2.f32 %v1696_v6 }
 0x4fb   : >> { %3153 = vmatmul.mubr.msk.bf16.vlgmr.msra.gmra.mxu0 %vm1669_vm5, %v1736_v25  ;;  %v3625_v26 = vpop.eup %3624 }
 0x4fc   : >> { %v1723_v27 = vsel %vm1669_vm5, %v3625_v26, 0.0  ;;  %v1737_v28 = vpack.c.bf16 %v3625_v26, %v3625_v26  ;;  %v3627_v34 = vpop.eup %3626 }
 0x4fd   : >> { %1724 = vadd.xlane.f32.xlu1 %v1723_v27  ;;  %v1710_v35 = vmul.f32 %v4058_v0, %v3627_v34  ;;  %v3629_v39 = vpop.eup %3628  ;;  %v1730_v10 = vmul.f32 %v4042_v59, %v3627_v34 }
 0x4fe   : >> { %3159 = vmatmul.mubr.msk.bf16.vlgmr.msra.gmra.mxu1 %vm1669_vm5, %v1737_v28  ;;  %v1711_v43 = vmul.f32 %v4054_v63, %v3629_v39  ;;  %v3631_v44 = vpop.eup %3630  ;;  %v1731_v5 = vmul.f32 %v4038_v58, %v3629_v39 }
 0x4ff   : >> { %v1712_v47 = vmul.f32 %v4050_v62, %v3631_v44  ;;  %v1732_v62 = vmul.f32 %v4034_v56, %v3631_v44 }
 0x506   : >> { %v3633_v51 = vpop.eup %3632 }
 0x507   : >> { %v1713_v61 = vmul.f32 %v4046_v60, %v3633_v51  ;;  %v1733_v2 = vmul.f32 %v4030_v55, %v3633_v51  ;;  %v5092_v51 = vmov (%p4741_p11), %v4714_v4 }
 0x57b   : >> { %v1716_v42 = vpop.xlane.xlu0 %1715 }
 0x57c   : >> { %v1726_v50 = vadd.f32 %v1716_v42, %v1710_v35  }
 0x57e   : >> { %v1719_v46 = vpop.xlane.xlu1 %1718 }
 0x57f   : >> { %v1727_v49 = vadd.f32 %v1719_v46, %v1711_v43  }
 0x582   : >> { %v1722_v52 = vpop.xlane.xlu0 %1721 }
 0x583   : >> { %v1728_v53 = vadd.f32 %v1722_v52, %v1712_v47   ;;  %v5093_v52 = vmov (%p4741_p11), %v4708_v13 }
 0x585   : > { %v5091_v47 = vmov (%p4741_p11), %v1728_v53 }
 0x586   : >> { %v1725_v7 = vpop.xlane.xlu1 %1724 }
 0x587   : >> { %v1729_v40 = vadd.f32 %v1725_v7, %v1713_v61  }
 0x589   : > { %v5090_v46 = vmov (%p4741_p11), %v1729_v40 }
 0x5b3   : >> { %v1779_v0 = vpop.f32.mrf.mxu0 }
 0x5b4   : >> { %v1923_v11 = vadd.f32 %v1779_v0, %v1730_v10   ;;  %v5081_v0 = vmov %v1726_v50 }
 0x5b5   : >> { %v3142_v12 = vpop.f32.mrf.mxu0 }
 0x5b6   : >> { %v1825_v14 = vpop.f32.mrf.mxu1  ;;  %v5089_v44 = vmov (%p4741_p11), %v1923_v11 }
 0x5b7   : >> { %v1782_v63 = vpop.f32.mrf.mxu0  ;;  %v1924_v18 = vadd.f32 %v1825_v14, %v1731_v5   ;;  %v5085_v5 = vmov %v5072_v54 }
 0x5b8   : >> { %v3148_v3 = vpop.f32.mrf.mxu1  ;;  %v5080_v63 = vmov %v1727_v49 }
 0x5b9   : >> { %v3143_v19 = vpop.f32.mrf.mxu0  ;;  %v5084_v3 = vmov %v4702_v8  ;;  %v5088_v43 = vmov (%p4741_p11), %v1924_v18 }
 0x5ba   : >> { %v1828_v17 = vpop.f32.mrf.mxu1 }
 0x5bb   : >> { %v1871_v20 = vpop.f32.mrf.mxu0 }
 0x5bc   : >> { %v1925_v48 = vadd.f32 %v1871_v20, %v1732_v62   ;;  %v3149_v60 = vpop.f32.mrf.mxu1  ;;  %v5079_v62 = vmov %v1728_v53  ;;  %v5094_v53 = vmov (%p4741_p11), %v4702_v8 }
 0x5bd   : >> { %v3154_v36 = vpop.f32.mrf.mxu0  ;;  %v5078_v60 = vmov %v1729_v40 }
 0x5be   : >> { %v1917_v22 = vpop.f32.mrf.mxu1  ;;  %v5075_v56 = vmov %v1925_v48  ;;  %v5087_v42 = vmov (%p4741_p11), %v1925_v48 }
 0x5bf   : >> { %v1874_v59 = vpop.f32.mrf.mxu0  ;;  %v1926_v23 = vadd.f32 %v1917_v22, %v1733_v2   ;;  %v5083_v2 = vmov %v4708_v13 }
 0x5c0   : >> { %v3160_v15 = vpop.f32.mrf.mxu1  ;;  %v5077_v59 = vmov %v1923_v11  ;;  %1456 = sbr.rel (!%p4741_p11) target bundleno = 899 (0x383), region = 121 }
 0x5c1   : >> { %v3155_v1 = vpop.f32.mrf.mxu0  ;;  %v5074_v55 = vmov %v1926_v23  ;;  %v5086_v39 = vmov (%p4741_p11), %v1926_v23 }
 0x5c2   : >> { %v1920_v58 = vpop.f32.mrf.mxu1  ;;  %v5082_v1 = vmov %v4714_v4 }
 0x5c3   : >> { %v5076_v58 = vmov %v1924_v18 }
 0x5c4   : >> { %v3161_v24 = vpop.f32.mrf.mxu1 }
 0x5c5 PF: > { %3162 = vmatprep.subr.bf16.mxu1 %v4143_v21  ;;  %vm1939_vm7 = vcmask 261120   ;;  %3164 = vmatprep.mubr.msk.bf16.mxu1 %vm4144_vm2, %v4143_v21  ;;  %s1928_s17 = scalar_lea.vmem [#allocation2], %s4515_s9  ;;  %vm2135_vm9 = vcmask 64512   ;;  %s1934_s20 = scalar_lea.vmem [#allocation3], %s4515_s9  ;;  %vm2207_vm10 = vcmask 1043456   ;;  %vm2572_vm11 = vcmask 523264   ;;  %v4126_v54 = vphi %v4584_v54, %v5072_v54   ;;  %v4122_v53 = vphi %v4582_v53, %v5094_v53   ;;  %v4118_v52 = vphi %v4580_v52, %v5093_v52   ;;  %v4114_v51 = vphi %v4578_v51, %v5092_v51   ;;  %v4110_v50 = vphi %v4576_v50, %v1726_v50   ;;  %v4106_v49 = vphi %v4574_v49, %v1727_v49   ;;  %v4102_v47 = vphi %v4572_v47, %v5091_v47   ;;  %v4098_v46 = vphi %v4570_v46, %v5090_v46   ;;  %v4094_v44 = vphi %v4568_v44, %v5089_v44   ;;  %v4090_v43 = vphi %v4566_v43, %v5088_v43   ;;  %v4086_v42 = vphi %v4564_v42, %v5087_v42   ;;  %v4082_v39 = vphi %v4562_v39, %v5086_v39  }
 0x5c6   : > { %v1929_v55 = vld [vmem:[%s1928_s17] sm:$0xf]  ;;  %3186 = vmatprep.subr.bf16.mxu0 %v4143_v21  ;;  %3188 = vmatprep.mubr.msk.bf16.mxu0 %vm4144_vm2, %v4143_v21  ;;  %v1930_v8 = vld [vmem:[%s1928_s17 + $0x8] sm:$0xf]  ;;  %v1931_v4 = vld [vmem:[%s1928_s17 + $0x10] sm:$0xf] }
 0x5c7   : > { %v1944_v56 = vsel %vm1939_vm7, %v1929_v55, 0  ;;  %v1990_v13 = vsel %vm1939_vm7, %v1930_v8, 0  ;;  %v2036_v25 = vsel %vm1939_vm7, %v1931_v4, 0  ;;  %v1932_v26 = vld [vmem:[%s1928_s17 + $0x18] sm:$0xf]  ;;  %vm2575_vm12 = vcmask 785408  }
 0x5c8   : > { %3163 = vmatpush3.bf16.xpose.msra.mxu1 %v1944_v56  ;;  %v1935_v62 = vld [vmem:[%s1934_s20] sm:$0xf]  ;;  %v1936_v20 = vld [vmem:[%s1934_s20 + $0x8] sm:$0xf]  ;;  %v1938_v36 = vld [vmem:[%s1934_s20 + $0x18] sm:$0xf] }
 0x5c9   : > { %3168 = vmatprep.subr.bf16.mxu1 %v4143_v21  ;;  %v2209_v17 = vsel %vm2207_vm10, %v1935_v62, 0  ;;  %v2255_v48 = vsel %vm2207_vm10, %v1936_v20, 0  ;;  %v2347_v2 = vsel %vm2207_vm10, %v1938_v36, 0  ;;  %s2981_s15 = sshll.u32 %s4014_s28, 1  ;;  %s2707_s24 = sshll.u32 %s341_s14, 4  ;;  %s4971_s24 = int_to_ptr.vmem [resolvable:$true] %s2707_s24 }
 0x5ca   : > { %3187 = vmatpush3.bf16.msra.mxu0 %v2209_v17  ;;  %s2703_s9 = sadd.s32 %s4010_s27, %s2981_s15  ;;  %s5096_s18 = sld [smem:[#allocation27_spill]] }
 0x5cb   : > { %3198 = vmatprep.subr.bf16.mxu0 %v4143_v21  ;;  %s2692_s27 = scalar_lea.sflag [#allocation6], %s339_s5  ;;  %s3798_s28 = scalar_lea.vmem %s4971_s24, 128 }
 0x5cc   : > { %p3799_p13 = scmp.ne.s32.totalorder %s4971_s24, %s3798_s28  ;;  %s4153_s6 = smov [#allocation13]  }
 0x5cd   : > { %s3802_s10 = sshll.u32 %s4153_s6, 4  ;;  %s3803_s10 = int_to_ptr.vmem [resolvable:$false] %s3802_s10 }
 0x5ce   : > { %p3800_p8 = pnand %p3799_p13, %p4259_p6  ;;  %s3804_s17 = scalar_lea.vmem %s3803_s10, 256 }
 0x5cf   : > { %3165 = vmatmul.mubr.msk.bf16.vlgmr.msra.gmra.mxu1 %vm1939_vm7, %v4553_v30  ;;  %v2082_v30 = vsel %vm1939_vm7, %v1932_v26, 0  ;;  %p3805_p10 = scmp.lt.s32.totalorder %s4971_s24, %s3803_s10  ;;  %p3806_p0 = scmp.lt.s32.totalorder %s3804_s17, %s3798_s28 }
 0x5d0   : > { %3169 = vmatpush3.bf16.xpose.msra.mxu1 %v1990_v13  ;;  %3170 = vmatprep.mubr.msk.bf16.mxu1 %vm4144_vm2, %v4143_v21  ;;  %p3801_p9 = pneg %p3800_p8 }
 0x5d1   : > { %3174 = vmatprep.subr.bf16.mxu1 %v4143_v21  ;;  %p3807_p12 = por %p3806_p0, %p3805_p10 }
 0x5d3   : > { %p3808_p2 = pnand %p3807_p12, %p3801_p9 }
 0x5d7   : > { %3171 = vmatmul.mubr.msk.bf16.vlgmr.msra.gmra.mxu1 %vm1939_vm7, %v4555_v32  ;;  %v2127_v32 = vand.u32 127, %v1293_v16 }
 0x5d8   : > { %3175 = vmatpush3.bf16.xpose.msra.mxu1 %v2036_v25  ;;  %3176 = vmatprep.mubr.msk.bf16.mxu1 %vm4144_vm2, %v4143_v21 }
 0x5d9   : > { %3180 = vmatprep.subr.bf16.mxu1 %v4143_v21  ;;  %vm2128_vm8 = vcmp.ge.s32.totalorder %v4525_v38, %v2127_v32  ;;  %v1937_v38 = vld [vmem:[%s1934_s20 + $0x10] sm:$0xf] }
 0x5da   : > { %v2301_v60 = vsel %vm2207_vm10, %v1937_v38, 0 }
 0x5df   : > { %3177 = vmatmul.mubr.msk.bf16.vlgmr.msra.gmra.mxu1 %vm1939_vm7, %v4557_v33 }
 0x5e0   : > { %3181 = vmatpush3.bf16.xpose.msra.mxu1 %v2082_v30  ;;  %3182 = vmatprep.mubr.msk.bf16.mxu1 %vm4144_vm2, %v4143_v21 }
 0x5e1   : > { %3192 = vmatprep.subr.bf16.mxu1 %v4143_v21 }
 0x5e7   : > { %3183 = vmatmul.mubr.msk.bf16.vlgmr.msra.gmra.mxu1 %vm1939_vm7, %v4559_v37 }
 0x5e8   : > { %3194 = vmatprep.mubr.msk.bf16.mxu1 %vm4144_vm2, %v4143_v21  ;;  %3193 = vmatpush3.bf16.msra.mxu1 %v2255_v48 }
 0x5e9   : > { %3204 = vmatprep.subr.bf16.mxu1 %v4143_v21 }
 0x68f   : > { %v1980_v27 = vpop.f32.mrf.mxu1 }
 0x690   : > { %v2131_v33 = vsel %vm2128_vm8, %v1980_v27, -inf }
 0x691   : > { %v3166_v28 = vpop.f32.mrf.mxu1  ;;  %v2136_v29 = vsel %vm2135_vm9, %v2131_v33, -inf }
 0x692   : > { %2137 = vmax.xlane.f32.xlu0 %v2136_v29 }
 0x693   : > { %v1983_v9 = vpop.f32.mrf.mxu1 }
 0x695   : > { %v3167_v31 = vpop.f32.mrf.mxu1 }
 0x697   : > { %v2026_v6 = vpop.f32.mrf.mxu1 }
 0x698   : > { %v2132_v37 = vsel %vm2128_vm8, %v2026_v6, -inf }
 0x699   : > { %v3172_v34 = vpop.f32.mrf.mxu1  ;;  %v2139_v16 = vsel %vm2135_vm9, %v2132_v37, -inf }
 0x69a   : > { %2140 = vmax.xlane.f32.xlu0 %v2139_v16 }
 0x69b   : > { %v2029_v35 = vpop.f32.mrf.mxu1 }
 0x69d   : > { %v3173_v61 = vpop.f32.mrf.mxu1 }
 0x69f   : > { %v2072_v7 = vpop.f32.mrf.mxu1 }
 0x6a0   : > { %v2133_v40 = vsel %vm2128_vm8, %v2072_v7, -inf  ;;  %v3634_v7 = vld [vmem:[#allocation12 + $0x38] sm:$0xff]  }
 0x6a1   : > { %v3178_v10 = vpop.f32.mrf.mxu1  ;;  %v2142_v0 = vsel %vm2135_vm9, %v2133_v40, -inf }
 0x6a2   : > { %2143 = vmax.xlane.f32.xlu1 %v2142_v0  ;;  %v3636_v10 = vld [vmem:[#allocation12 + $0x28] sm:$0xff]   ;;  %v3637_v0 = vld [vmem:[#allocation12 + $0x20] sm:$0xff]  }
 0x6a3   : > { %v2075_v11 = vpop.f32.mrf.mxu1 }
 0x6a4   : > { %v3638_v11 = vld [vmem:[#allocation12 + $0x18] sm:$0xff]  }
 0x6a5   : > { %v3179_v12 = vpop.f32.mrf.mxu1 }
 0x6a6   : > { %v3639_v12 = vld [vmem:[#allocation12 + $0x10] sm:$0xff]  }
 0x6a7   : > { %v2118_v5 = vpop.f32.mrf.mxu1 }
 0x6a8   : > { %v2134_v63 = vsel %vm2128_vm8, %v2118_v5, -inf  ;;  %v3640_v5 = vld [vmem:[#allocation12 + $0x8] sm:$0xff]  }
 0x6a9   : > { %v3184_v14 = vpop.f32.mrf.mxu1  ;;  %v2145_v18 = vsel %vm2135_vm9, %v2134_v63, -inf }
 0x6aa   : > { %2146 = vmax.xlane.f32.xlu1 %v2145_v18 }
 0x6ab   : > { %v2121_v19 = vpop.f32.mrf.mxu1 }
 0x6ad   : > { %v3185_v3 = vpop.f32.mrf.mxu1 }
 0x71b   : > { %v2138_v59 = vpop.xlane.xlu0 %2137 }
 0x71c   : > { %v4890_v22 = vmax.f32 %v4126_v54, %v2138_v59 }
 0x71e   : > { %v2164_v23 = vsub.f32 %v2131_v33, %v4890_v22 }
 0x720   : > { %v2168_v1 = vmul.f32 1.442695, %v2164_v23 }
 0x722   : > { %3642 = vpow2.f32 %v2168_v1 }
 0x723   : > { %v2141_v15 = vpop.xlane.xlu0 %2140 }
 0x724   : > { %v4894_v58 = vmax.f32 %v4122_v53, %v2141_v15 }
 0x726   : > { %v2165_v24 = vsub.f32 %v2132_v37, %v4894_v58  ;;  %v2153_v3 = vsub.f32 %v4122_v53, %v4894_v58 }
 0x728   : > { %v2170_v55 = vmul.f32 1.442695, %v2165_v24  ;;  %v2158_v17 = vmul.f32 1.442695, %v2153_v3 }
 0x72a   : > { %3644 = vpow2.f32 %v2170_v55 }
 0x72b   : > { %v2144_v56 = vpop.xlane.xlu1 %2143 }
 0x72c   : > { %v2150_v8 = vmax.f32 %v4118_v52, %v2144_v56 }
 0x72e   : > { %v2166_v13 = vsub.f32 %v2133_v40, %v2150_v8  ;;  %v3635_v40 = vld [vmem:[#allocation12 + $0x30] sm:$0xff]   ;;  %v2154_v18 = vsub.f32 %v4118_v52, %v2150_v8 }
 0x72f   : > { %v3643_v4 = vpop.eup %3642 }
 0x730   : > { %v2172_v25 = vmul.f32 1.442695, %v2166_v13  ;;  %v2180_v26 = vsel %vm2135_vm9, %v3643_v4, 0.0  ;;  %v2200_v30 = vpack.c.bf16 %v3643_v4, %v3643_v4  ;;  %v2160_v19 = vmul.f32 1.442695, %v2154_v18 }
 0x731   : > { %2181 = vadd.xlane.f32.xlu0 %v2180_v26 }
 0x732   : > { %3646 = vpow2.f32 %v2172_v25  ;;  %3189 = vmatmul.mubr.msk.bf16.vlgmr.msra.gmra.mxu0 %vm2135_vm9, %v2200_v30 }
 0x733   : > { %v2147_v32 = vpop.xlane.xlu1 %2146  ;;  %3199 = vmatpush3.bf16.msra.mxu0 %v2301_v60  ;;  %3200 = vmatprep.mubr.msk.bf16.mxu0 %vm4144_vm2, %v4143_v21 }
 0x734   : > { %v2151_v27 = vmax.f32 %v4114_v51, %v2147_v32  ;;  %3210 = vmatprep.subr.bf16.mxu0 %v4143_v21 }
 0x736   : > { %v2167_v33 = vsub.f32 %v2134_v63, %v2151_v27  ;;  %v2152_v63 = vsub.f32 %v4126_v54, %v4890_v22  ;;  %v2155_v62 = vsub.f32 %v4114_v51, %v2151_v27 }
 0x737   : > { %v3645_v28 = vpop.eup %3644 }
 0x738   : > { %v2174_v29 = vmul.f32 1.442695, %v2167_v33  ;;  %v2183_v9 = vsel %vm2135_vm9, %v3645_v28, 0.0  ;;  %v2201_v31 = vpack.c.bf16 %v3645_v28, %v3645_v28  ;;  %v2156_v14 = vmul.f32 1.442695, %v2152_v63 }
 0x739   : > { %2184 = vadd.xlane.f32.xlu1 %v2183_v9  ;;  %v2162_v20 = vmul.f32 1.442695, %v2155_v62 }
 0x73a   : > { %3648 = vpow2.f32 %v2174_v29  ;;  %3195 = vmatmul.mubr.msk.bf16.vlgmr.msra.gmra.mxu1 %vm2135_vm9, %v2201_v31 }
 0x73b   : > { %3205 = vmatpush3.bf16.msra.mxu1 %v2347_v2  ;;  %3206 = vmatprep.mubr.msk.bf16.mxu1 %vm4144_vm2, %v4143_v21  ;;  %3650 = vpow2.f32 %v2156_v14 }
 0x73c   : > { %3652 = vpow2.f32 %v2160_v19 }
 0x73d   : > { %3654 = vpow2.f32 %v2158_v17 }
 0x73e   : > { %3656 = vpow2.f32 %v2162_v20 }
 0x73f   : > { %v3647_v6 = vpop.eup %3646 }
 0x740   : > { %v2186_v37 = vsel %vm2135_vm9, %v3647_v6, 0.0  ;;  %v2202_v34 = vpack.c.bf16 %v3647_v6, %v3647_v6 }
 0x741   : > { %2187 = vadd.xlane.f32.xlu0 %v2186_v37 }
 0x742   : > { %3201 = vmatmul.mubr.msk.bf16.vlgmr.msra.gmra.mxu0 %vm2135_vm9, %v2202_v34 }
 0x743   : > { %3226 = vmatprep.mubr.msk.bf16.mxu0 %vm4144_vm2, %v4143_v21  ;;  %3211 = vmatpush3.bf16.msra.mxu0 %v3634_v7 }
 0x744   : > { %3212 = vmatprep.subr.bf16.mxu0 %v4143_v21 }
 0x747   : > { %v3649_v16 = vpop.eup %3648  ;;  %3213 = vmatpush3.bf16.msra.mxu0 %v3635_v40 }
 0x748   : > { %v2189_v35 = vsel %vm2135_vm9, %v3649_v16, 0.0  ;;  %v2203_v61 = vpack.c.bf16 %v3649_v16, %v3649_v16  ;;  %3214 = vmatprep.subr.bf16.mxu0 %v4143_v21  ;;  %v3651_v48 = vpop.eup %3650 }
 0x749   : > { %2190 = vadd.xlane.f32.xlu1 %v2189_v35  ;;  %v2176_v38 = vmul.f32 %v4110_v50, %v3651_v48  ;;  %v3653_v54 = vpop.eup %3652 }
 0x74a   : > { %3207 = vmatmul.mubr.msk.bf16.vlgmr.msra.gmra.mxu1 %vm2135_vm9, %v2203_v61  ;;  %v2178_v52 = vmul.f32 %v4102_v47, %v3653_v54  ;;  %v3655_v59 = vpop.eup %3654  ;;  %v2196_v47 = vmul.f32 %v4094_v44, %v3651_v48 }
 0x74b   : > { %3215 = vmatpush3.bf16.msra.mxu0 %v3636_v10  ;;  %v3657_v51 = vpop.eup %3656  ;;  %v2177_v1 = vmul.f32 %v4106_v49, %v3655_v59  ;;  %v2198_v49 = vmul.f32 %v4086_v42, %v3653_v54  ;;  %v2197_v29 = vmul.f32 %v4090_v43, %v3655_v59 }
 0x74c   : > { %3216 = vmatprep.subr.bf16.mxu0 %v4143_v21  ;;  %v2179_v50 = vmul.f32 %v4098_v46, %v3657_v51  ;;  %v2199_v7 = vmul.f32 %v4082_v39, %v3657_v51 }
 0x74f   : > { %3217 = vmatpush3.bf16.msra.mxu0 %v3637_v0 }
 0x750   : > { %3218 = vmatprep.subr.bf16.mxu0 %v4143_v21 }
 0x753   : > { %3219 = vmatpush3.bf16.msra.mxu0 %v3638_v11 }
 0x754   : > { %3220 = vmatprep.subr.bf16.mxu0 %v4143_v21 }
 0x757   : > { %3221 = vmatpush3.bf16.msra.mxu0 %v3639_v12 }
 0x758   : > { %3222 = vmatprep.subr.bf16.mxu0 %v4143_v21 }
 0x75b   : > { %3223 = vmatpush3.bf16.msra.mxu0 %v3640_v5 }
 0x75c   : > { %3224 = vmatprep.subr.bf16.mxu0 %v4143_v21 }
 0x7ba   : > { %v2182_v21 = vpop.xlane.xlu0 %2181 }
 0x7bb   : > { %v2192_v60 = vadd.f32 %v2182_v21, %v2176_v38 }
 0x7bd   : > { %3658 = vrcp.f32 %v2192_v60 }
 0x7c2   : > { %v2185_v22 = vpop.xlane.xlu1 %2184 }
 0x7c3   : > { %v2193_v58 = vadd.f32 %v2185_v22, %v2177_v1 }
 0x7ca   : > { %v2188_v36 = vpop.xlane.xlu0 %2187  ;;  %v3659_v26 = vpop.eup %3658 }
 0x7cb   : > { %v2194_v53 = vadd.f32 %v2188_v36, %v2178_v52 }
 0x7cd   : > { %3660 = vrcp.f32 %v2194_v53 }
 0x7ce   : > { %3662 = vrcp.f32 %v2193_v58 }
 0x7d2   : > { %v2191_v24 = vpop.xlane.xlu1 %2190 }
 0x7d3   : > { %v2195_v8 = vadd.f32 %v2191_v24, %v2179_v50 }
 0x7d5   : > { %3664 = vrcp.f32 %v2195_v8 }
 0x7da   : > { %v3661_v28 = vpop.eup %3660 }
 0x7db   : > { %v3663_v16 = vpop.eup %3662 }
 0x7e2   : > { %v3665_v43 = vpop.eup %3664 }
 0x7f2   : > { %v2245_v2 = vpop.f32.mrf.mxu0 }
 0x7f3   : > { %v2389_v4 = vadd.f32 %v2245_v2, %v2196_v47 }
 0x7f4   : > { %v3190_v23 = vpop.f32.mrf.mxu0 }
 0x7f5   : > { %v2397_v32 = vmul.f32 %v3659_v26, %v2389_v4 }
 0x7f6   : > { %v2248_v15 = vpop.f32.mrf.mxu0 }
 0x7f7   : > { %v2401_v9 = vpack.c.bf16 %v2397_v32, %v2397_v32 }
 0x7f8   : > { %v3191_v55 = vpop.f32.mrf.mxu0 }
 0x7f9   : > { %v2408_v35 = vrot.slane %v2401_v9, %v4528_v41 }
 0x7fa   : > { %v2291_v56 = vpop.f32.mrf.mxu1 }
 0x7fb   : > { %v2390_v6 = vadd.f32 %v2291_v56, %v2197_v29 }
 0x7fc   : > { %v3196_v13 = vpop.f32.mrf.mxu1 }
 0x7fd   : > { %v2398_v42 = vmul.f32 %v3663_v16, %v2390_v6 }
 0x7fe   : > { %v2294_v25 = vpop.f32.mrf.mxu1 }
 0x7ff   : > { %v2435_v63 = vpack.c.bf16 %v2398_v42, %v2398_v42 }
 0x800   : > { %v3197_v30 = vpop.f32.mrf.mxu1 }
 0x801   : > { %v2442_v62 = vrot.slane %v2435_v63, %v4528_v41 }
 0x802   : > { %v2337_v27 = vpop.f32.mrf.mxu0 }
 0x803   : > { %v2391_v33 = vadd.f32 %v2337_v27, %v2198_v49  ;;  %v3641_v49 = vld [vmem:[#allocation12] sm:$0xff]  }
 0x804   : > { %v3202_v46 = vpop.f32.mrf.mxu0  ;;  %3225 = vmatpush3.bf16.msra.mxu0 %v3641_v49 }
 0x805   : > { %v2399_v31 = vmul.f32 %v3661_v28, %v2391_v33 }
 0x806   : > { %v2340_v44 = vpop.f32.mrf.mxu0 }
 0x807   : > { %v2409_v37 = vpack.c.bf16 %v2399_v31, %v2399_v31 }
 0x808   : > { %v3203_v34 = vpop.f32.mrf.mxu0 }
 0x809   : > { %v2416_v61 = vrot.slane %v2409_v37, %v4528_v41 }
 0x80a   : > { %v2383_v40 = vpop.f32.mrf.mxu1 }
 0x80b   : > { %v2417_v10 = vcombine.low %v2408_v35, %v2416_v61  ;;  %v2418_v0 = vcombine.high %v2408_v35, %v2416_v61  ;;  %v2392_v11 = vadd.f32 %v2383_v40, %v2199_v7 }
 0x80c   : > { %v3208_v12 = vpop.f32.mrf.mxu1 }
 0x80d   : > { %v2400_v5 = vmul.f32 %v3665_v43, %v2392_v11  ;;  %v2425_v3 = vrot.slane %v2417_v10, %v4532_v45  ;;  %v2432_v39 = vrot.slane %v2418_v0, %v4532_v45 }
 0x80e   : > { %v2386_v14 = vpop.f32.mrf.mxu1 }
 0x80f   : > { %v2443_v18 = vpack.c.bf16 %v2400_v5, %v2400_v5  ;;  %v2433_v21 = vcombine.high %v2425_v3, %v4150_v57  ;;  %v2434_v60 = vcombine.high %v2432_v39, %v4150_v57  ;;  %v2473_v36 = vshrl.u32 %v2425_v3, 16 }
 0x810   : > { %v3209_v19 = vpop.f32.mrf.mxu1  ;;  %v2489_v23 = vshrl.u32 %v2432_v39, 16 }
 0x811   : > { %v2450_v17 = vrot.slane %v2443_v18, %v4528_v41  ;;  %v2481_v22 = vshrl.u32 %v2433_v21, 16  ;;  %v2497_v50 = vshrl.u32 %v2434_v60, 16 }
 0x813   : > { %v2451_v20 = vcombine.low %v2442_v62, %v2450_v17  ;;  %v2452_v48 = vcombine.high %v2442_v62, %v2450_v17 }
 0x815   : > { %v2459_v38 = vrot.slane %v2451_v20, %v4532_v45  ;;  %v2466_v54 = vrot.slane %v2452_v48, %v4532_v45 }
 0x817   : > { %v2467_v52 = vcombine.high %v2459_v38, %v4150_v57  ;;  %v2468_v2 = vcombine.high %v2466_v54, %v4150_v57  ;;  %v2471_v59 = vpack.i.b16 %v2459_v38, %v2425_v3  ;;  %v2474_v53 = vshrl.u32 %v2459_v38, 16 }
 0x818   : > { %v2487_v51 = vpack.i.b16 %v2466_v54, %v2432_v39  ;;  %v2490_v1 = vshrl.u32 %v2466_v54, 16 }
 0x819   : > { %v2475_v15 = vpack.i.b16 %v2474_v53, %v2473_v36  ;;  %v2479_v58 = vpack.i.b16 %v2467_v52, %v2433_v21  ;;  %v2482_v24 = vshrl.u32 %v2467_v52, 16  ;;  %v2495_v55 = vpack.i.b16 %v2468_v2, %v2434_v60 }
 0x81a   : > { %v2491_v56 = vpack.i.b16 %v2490_v1, %v2489_v23  ;;  %v2498_v8 = vshrl.u32 %v2468_v2, 16  ;;  %v2501_v47 = vcombine.low %v2471_v59, %v2487_v51 }
 0x81b   : > { %v2483_v13 = vpack.i.b16 %v2482_v24, %v2481_v22  ;;  %v2509_v4 = vcombine.low %v2479_v58, %v2495_v55 }
 0x81c   : > { %v2499_v25 = vpack.i.b16 %v2498_v8, %v2497_v50  ;;  %v2526_v26 = vcombine.low %v2475_v15, %v2491_v56  ;;  %v2508_v30 = vrot.slane %v2501_v47, %v4528_v41 }
 0x81d   : > { %v2516_v32 = vrot.slane %v2509_v4, %v4528_v41 }
 0x81e   : > { %v2534_v27 = vcombine.low %v2483_v13, %v2499_v25  ;;  %v2533_v28 = vrot.slane %v2526_v26, %v4528_v41 }
 0x81f   : > { %v2517_v33 = vcombine.low %v2508_v30, %v2516_v32 }
 0x820   : > { %v2541_v29 = vrot.slane %v2534_v27, %v4528_v41 }
 0x821   : > { %v2524_v46 = vrot.slane %v2517_v33, %v4532_v45 }
 0x822   : > { %v2542_v9 = vcombine.low %v2533_v28, %v2541_v29 }
 0x823   : > { %v2525_v6 = vcombine.high %v2524_v46, %v4150_v57  ;;  %v2554_v44 = vshrl.u32 %v2524_v46, 16 }
 0x824   : > { %v2549_v31 = vrot.slane %v2542_v9, %v4532_v45 }
 0x825   : > { %v2560_v7 = vshrl.u32 %v2525_v6, 16 }
 0x826   : > { %v2555_v37 = vshrl.u32 %v2549_v31, 16  ;;  %v2550_v34 = vcombine.high %v2549_v31, %v4150_v57  ;;  %v2553_v16 = vpack.i.b16 %v2549_v31, %v2524_v46 }
 0x828   : > { %v2556_v35 = vpack.i.b16 %v2555_v37, %v2554_v44  ;;  %v2559_v61 = vpack.i.b16 %v2550_v34, %v2525_v6  ;;  %v2561_v42 = vshrl.u32 %v2550_v34, 16 }
 0x82a   : > { %2563 = vrot.lane.b32.xlu0 %v2556_v35, %s4145_s3  ;;  %2565 = vrot.lane.b32.xlu1 %v2559_v61, %s4147_s29  ;;  %v2562_v41 = vpack.i.b16 %v2561_v42, %v2560_v7  ;;  %s5095_s29 = sld [smem:[#allocation26_spill]] }
 0x82e   : > { %2567 = vrot.lane.b32.xlu1 %v2562_v41, %s4146_s4  ;;  %s2982_s4 = sshll.u32 %s2703_s9, 7 }
 0x82f   : > { %s4969_s21 = scalar_lea.hbm %s5096_s18, %s2982_s4 }
 0x830   : > { %v2971_v43 = vld [vmem:[%s5095_s29] ss:$0 sm:$0xff] }
 0x89c   : > { %v2564_v45 = vpop.permute.xlu0 %2563  ;;  %v2566_v40 = vpop.permute.xlu1 %2565 }
 0x89d   : > { %v2571_v10 = vsel %vm1939_vm7, %v2553_v16, %v2564_v45 }
 0x89e   : > { %v2574_v57 = vsel %vm2572_vm11, %v2571_v10, %v2566_v40 }
 0x8a0   : > { %v2568_v0 = vpop.permute.xlu1 %2567 }
 0x8a1   : > { %v2577_v11 = vsel %vm2575_vm12, %v2574_v57, %v2568_v0 }
 0x8a2   : > { %3227 = vmatmul.mubr.bf16.vlgmr.msra.gmra.mxu0 %v2577_v11 }
 0x962   : > { %v2684_v12 = vpop.f32.mrf.mxu0 }
 0x963   : > { %v2685_v5 = vadd.f32 %v2971_v43, %v2684_v12 }
 0x964   : > { %v3228_v63 = vpop.f32.mrf.mxu0 }
 0x965   : > { %2690 = vst [vmem:[%s341_s14] sm:$0xff] %v2685_v5 }
 0x966   : > { %v2687_v14 = vpop.f32.mrf.mxu0 }
 0x967   : > { %3811 = shalt.err (!%p3808_p2)
}
 0x968   : > { %s3812_s11 = scalar_lea.hbm %s4969_s21, 128  ;;  %s3816_s20 = scalar_lea.hbm %s5096_s18, 512 }
 0x969   : > { %p3813_p5 = scmp.ne.s32.totalorder %s4969_s21, %s3812_s11  ;;  %p3817_p4 = scmp.lt.s32.totalorder %s4969_s21, %s5096_s18 }
 0x96a   : > { %p3818_p1 = scmp.lt.s32.totalorder %s3816_s20, %s3812_s11 }
 0x96b   : > { %p3814_p7 = pnand %p3813_p5, %p4259_p6 }
 0x96c   : > { %p3819_p11 = por %p3818_p1, %p3817_p4 }
 0x96d   : > { %p3815_p3 = pneg %p3814_p7 }
 0x96f   : > { %p3820_p13 = pnand %p3819_p11, %p3815_p3 }
 0x971   : > { %3823 = shalt.err (!%p3820_p13)
}
 0x972   : > { %3248 = dma.vmem_to_hbm [thread:$0]  (%p4259_p6), %s4971_s24, 128, %s4969_s21, %s2692_s27   ;;  %v3229_v18 = vpop.f32.mrf.mxu0 }
 0x973 PF: > { %s5097_s13 = sld [smem:[#allocation18_spill]]  ;;  %p3280_p8 = scmp.ge.s32.totalorder %s4026_s7, 2 }
 0x974   : > { %s5098_s3 = sld [smem:[#allocation20_spill]] }
 0x979   : > { %s2719_s29 = sand.u32 1, %s5097_s13  }
 0x97a   : > { %p5099_p9 = scmp.ne.s32.totalorder %s5098_s3, 0  ;;  %s2720_s4 = scalar_lea.sflag [#allocation6], %s2719_s29 }
 0x97c   : > { %p3268_p10 = pnand %p3280_p8, %p5099_p9 }
 0x97e   : > { %p3269_p0 = pneg %p3268_p10 }
 0x980   : > { %3981 = dma.done.wait (%p3269_p0), %s2720_s4, 128  }
 0x981   : > { %3983 = vsyncadd (%p3269_p0), %s2720_s4, 4294967168  ;;  %s24_s7 = sadd.s32 1, %s4026_s7   ;;  %s5100_s27 = sld [smem:[#allocation19_spill]] }
 0x982   : > { %p21_p12 = scmp.ge.s32.totalorder %s24_s7, 6   ;;  %s5101_s29 = sld [smem:[#allocation21_spill]] }
 0x983   : > { %s5102_s21 = smov %s3990_s22  ;;  %s5103_s22 = smov %s3994_s23 }
 0x984   : > { %s5104_s23 = smov %s4354_s2  ;;  %s5105_s24 = smov %s4002_s25 }
 0x985   : > { %s5106_s25 = smov %s4006_s26  ;;  %s5107_s26 = smov %s4351_s8 }
 0x986   : > { %s5108_s28 = smov %s4022_s30  ;;  %s5109_s30 = smov %s5115_s16 }
 0x987   :  { %23 = sbr.rel (!%p21_p12) target bundleno = 18 (0x12), region = 132 }
 0x98c   :  { %2725 = vsyncpa [#allocation5], 1 }
 0x98d   :  { %2727 = vsyncpa [#allocation5 + $0x1], 1 }
 0x98e   :  { %2728 = vsyncpa [#allocation8], 1 }
 0x98f   :  { %2729 = vsyncpa [#allocation11], 1 }
 0x990   :  { %2730 = vsyncpa [#allocation6], 1 }
 0x991   :  { %2732 = vsyncpa [#allocation6 + $0x1], 1 }

</bundles_post_ra>
